<compile_context>
chip_gen: v5e
topology: v5e:2x2
jax: 0.10.0
libtpu: 0.0.40
codegen_flags: <defaults>
</compile_context>

<pallas_src>
import jax
import jax.numpy as jnp
from jax import lax
from jax.experimental import pallas as pl
from jax.experimental.pallas import tpu as pltpu

NEG_INF = -9.0e15          # torch: -9000000000000000.0
LRELU_SLOPE = 0.01         # nn.LeakyReLU() default


def _lrelu(v):
    return jnp.where(v > 0, v, LRELU_SLOPE * v)


def gat_rnn_kernel(x_ref, xp_ref, adj_ref, w_ref, wsc_ref, fcw_ref, fccw_ref,
                   wih_ref, whhf_ref, whhb_ref, brnn_ref, wor_ref, woh_ref,
                   bout_ref, bias_ref, out_ref, rnn_ref):
    f32, bf16 = jnp.float32, jnp.bfloat16
    BT, N, _ = adj_ref.shape
    R, _ = x_ref.shape                       # R = BT * N  (atom-major rows)
    E = fcw_ref.shape[1]
    F = fccw_ref.shape[1]
    H = whhf_ref.shape[0]
    Fout = bout_ref.shape[1]
    half = N // 2

    fc_b = bias_ref[0]                       # SMEM scalars
    fcc_b = bias_ref[1]

    # ---- per-atom features -------------------------------------------------
    feat = jnp.dot(x_ref[...], w_ref[...], preferred_element_type=f32)     # [R, F]
    # fcc(att * feat_i) collapses to att * (feat_i . fcc_w) + fcc_b
    c = jnp.sum(feat * fccw_ref[...], axis=-1, keepdims=True)              # [R, 1]

    # ---- attention scores: paired input x fused weight ----------------------
    spre = jnp.dot(xp_ref[...], wsc_ref[...], preferred_element_type=f32)  # [R, 3E]
    fcw = fcw_ref[...]                                                      # [1, E]

    def fc1(v):                                 # fc(leakyrelu(v)), Linear(E, 1)
        return jnp.sum(_lrelu(v) * fcw, axis=-1, keepdims=True) + fc_b

    ue = fc1(spre[:, 0:E]).reshape(BT, N, 1)            # u[2k]   at row k (< half)
    uo = fc1(spre[:, E:2 * E]).reshape(BT, N, 1)        # u[2k+1] at row k (< half)
    ze = fc1(spre[:, 2 * E:3 * E]).reshape(BT, N, 1)    # z pair  at row k (< half)

    row_i = lax.broadcasted_iota(jnp.int32, (BT, N, N), 1)
    col_i = lax.broadcasted_iota(jnp.int32, (BT, N, N), 2)
    top = jnp.where(col_i < half, ue, uo)                       # rows n1 <  half
    col_m = jnp.where(col_i < half, col_i, col_i - half)        # n2 mod half
    bot = jnp.zeros((BT, N, N), f32)                            # rows n1 >= half
    for k in range(half):                                       # tiny static loop (VPU)
        bot = jnp.where(col_m == k, ze[:, k:k + 1, :], bot)
    scores = jnp.where(row_i < half, top, bot)                  # [BT, N, N]

    # ---- masked softmax over the neighbour axis (dim=2 in torch) -----------
    logits = jnp.where(adj_ref[...] > 0, scores, NEG_INF)
    mx = jnp.max(logits, axis=-1, keepdims=True)
    ex = jnp.exp(logits - mx)
    att = ex * pl.reciprocal(jnp.sum(ex, axis=-1, keepdims=True), approx=True)
    # TODO(synk): nn.Dropout(gnn_dropout) is eval-mode identity here (no train RNG).

    # ---- GAT node outputs ----------------------------------------------------
    hn = _lrelu(att * c.reshape(BT, N, 1) + fcc_b)              # [BT, N, N]
    h1 = jnp.einsum('bij,bjf->bif', att.astype(bf16),
                    feat.reshape(BT, N, F).astype(bf16),
                    preferred_element_type=f32)                 # [BT, N, F]

    # ---- bidirectional tanh-RNN over atoms -----------------------------------
    # input-side matmul hoisted out of the recurrence (one big matmul)
    ih = (jnp.dot(hn.reshape(R, N).astype(bf16), wih_ref[...],
                  preferred_element_type=f32) + brnn_ref[...])  # [R, 2H]
    ih3 = ih.reshape(BT, N, 2 * H)
    whhf = whhf_ref[...]
    whhb = whhb_ref[...]
    h_f = jnp.zeros((BT, H), f32)
    h_b = jnp.zeros((BT, H), f32)
    for t in range(N):                                          # unrolled serial chain
        tb = N - 1 - t
        h_f = jnp.tanh(ih3[:, t, 0:H]
                       + jnp.dot(h_f, whhf, preferred_element_type=f32))
        h_b = jnp.tanh(ih3[:, tb, H:2 * H]
                       + jnp.dot(h_b, whhb, preferred_element_type=f32))
        rnn_ref[:, t, 0:H] = h_f                                # scratch, not vregs
        rnn_ref[:, tb, H:2 * H] = h_b

    # ---- fc_out(concat([lrelu(rnn_fwd|bwd), h1])) + ELU -----------------------
    rnn_lr = _lrelu(rnn_ref[...]).reshape(R, 2 * H)
    pre = (jnp.dot(rnn_lr.astype(bf16), wor_ref[...], preferred_element_type=f32)
           + jnp.dot(h1.reshape(R, F).astype(bf16), woh_ref[...],
                     preferred_element_type=f32)
           + bout_ref[...])                                     # [R, Fout]
    # ELU(alpha=1); exp(x)-1 kept for guaranteed lowering (abs err ~1e-7 near 0).
    act = jnp.where(pre > 0, pre, jnp.exp(pre) - 1.0)
    act3 = act.reshape(BT, N, Fout)
    for n in range(N):                                          # lane-dense out block
        out_ref[0, :, n * Fout:(n + 1) * Fout] = act3[:, n, :]


def _tpu_two_tensorcores():
    """Best-effort detection of a 2-TensorCore-per-chip part (v7x)."""
    try:
        kind = (jax.devices()[0].device_kind or "").lower()
    except Exception:
        return False
    return ("v7" in kind) or ("7x" in kind)


def gat_layer_with_rnn(x, adj, params, *, grid_b=None):
    B, N, Fin = x.shape
    Fout = params["W"].shape[1]
    E = params["a_top"].shape[1]
    H = params["wih_f"].shape[1]
    half = N // 2
    assert N % 2 == 0, "even max_atom required by the cat/view decomposition"
    assert N % 8 == 0, "this implementation keeps N a multiple of 8 (sublane tile)"

    two_tc = _tpu_two_tensorcores()
    if grid_b is None:
        # v5e/v6e: one TensorCore -> single grid step with all B*N rows (MXU fill).
        # v7x: two TensorCores -> two grid steps, one per core.
        grid_b = 2 if (two_tc and B % 2 == 0) else 1
    if B % grid_b != 0:
        grid_b = 1
    block_b = B // grid_b
    assert (block_b * N) % 16 == 0, "bf16 input block needs a multiple of 16 rows"

    f32, bf16 = jnp.float32, jnp.bfloat16

    # ---- host-side parameter fusion (pure re-parametrisation of the forward) ---
    W = params["W"].astype(f32)
    a_top = params["a_top"].astype(f32)
    a_bot = params["a_bot"].astype(f32)
    asum = a_top + a_bot
    zcol = jnp.zeros((Fin, E), f32)
    w_scores = jnp.concatenate(
        [jnp.concatenate([W @ asum, zcol, W @ a_top], axis=1),
         jnp.concatenate([zcol, W @ asum, W @ a_bot], axis=1)], axis=0)   # [2Fin, 3E]
    wih_both = jnp.concatenate([params["wih_f"], params["wih_b"]], axis=1)  # [N, 2H]
    b_both = jnp.concatenate([params["b_f"], params["b_b"]], axis=1)        # [1, 2H]
    w_out_rnn = params["fco_wT"][:2 * H]                                     # [2H, Fout]
    w_out_h1 = params["fco_wT"][2 * H:]                                      # [F,  Fout]
    fc_biases = jnp.stack([params["fc_b"].reshape(()),
                           params["fcc_b"].reshape(())]).astype(f32)         # (2,)
    fcw_row = params["fc_w"].reshape(1, E).astype(f32)
    fccw_row = params["fcc_w"].reshape(1, Fout).astype(f32)

    # ---- host-side input packing (free XLA reshapes) ---------------------------
    x2 = x.reshape(B * N, Fin).astype(bf16)
    xp = x.reshape(B, half, 2 * Fin)                      # row k = [x[2k] | x[2k+1]]
    xp_full = jnp.concatenate([xp, xp], axis=1).reshape(B * N, 2 * Fin).astype(bf16)
    adj_f = adj.astype(f32)

    def full(shape):
        zeros = (0,) * len(shape)
        return pl.BlockSpec(shape, lambda i, _z=zeros: _z)

    in_specs = [
        pl.BlockSpec((block_b * N, Fin), lambda i: (i, 0)),          # x rows (bf16)
        pl.BlockSpec((block_b * N, 2 * Fin), lambda i: (i, 0)),      # paired x rows
        pl.BlockSpec((block_b, N, N), lambda i: (i, 0, 0)),          # adj
        full((Fin, Fout)),                                           # W
        full((2 * Fin, 3 * E)),                                      # W_scores (fused)
        full((1, E)),                                                # fc_w row
        full((1, Fout)),                                             # fcc_w row
        full((N, 2 * H)),                                            # wih (fwd|bwd)
        full((H, H)), full((H, H)),                                  # whh fwd / bwd
        full((1, 2 * H)),                                            # rnn biases
        full((2 * H, Fout)),                                         # fc_out (rnn part)
        full((Fout, Fout)),                                          # fc_out (h1 part)
        full((1, Fout)),                                             # fc_out bias
        pl.BlockSpec(memory_space=pltpu.MemorySpace.SMEM),           # fc_b, fcc_b
    ]

    dims = (pltpu.CORE_PARALLEL,) if (two_tc and grid_b > 1) else ("arbitrary",)

    out = pl.pallas_call(
        gat_rnn_kernel,
        out_shape=jax.ShapeDtypeStruct((grid_b, block_b, N * Fout), f32),
        grid_spec=pltpu.PrefetchScalarGridSpec(
            num_scalar_prefetch=0,
            grid=(grid_b,),
            in_specs=in_specs,
            out_specs=pl.BlockSpec((1, block_b, N * Fout), lambda i: (i, 0, 0)),
            scratch_shapes=[pltpu.VMEM((block_b, N, 2 * H), f32)],
        ),
        compiler_params=pltpu.CompilerParams(dimension_semantics=dims),
    )(x2, xp_full, adj_f,
      W.astype(bf16), w_scores.astype(bf16), fcw_row, fccw_row,
      wih_both.astype(bf16),
      params["whh_f"].astype(f32), params["whh_b"].astype(f32),
      b_both.astype(f32),
      w_out_rnn.astype(bf16), w_out_h1.astype(bf16),
      params["b_out"].astype(f32), fc_biases)

    return out.reshape(B, N, Fout)


def init_params(key, N, Fin, Fout, E, H):
    ks = jax.random.split(key, 16)

    def xavier(k, shape, gain=1.414):
        bound = gain * (6.0 / (shape[0] + shape[1])) ** 0.5
        return jax.random.uniform(k, shape, jnp.float32, -bound, bound)

    def unif(k, shape, bound):
        return jax.random.uniform(k, shape, jnp.float32, -bound, bound)

    W = xavier(ks[0], (Fin, Fout))
    a = xavier(ks[1], (2 * Fout, E))
    fc_wT = unif(ks[2], (E, 1), 1.0 / E ** 0.5)
    fc_b = unif(ks[3], (1, 1), 1.0 / E ** 0.5)
    fcc_wT = unif(ks[4], (Fout, 1), 1.0 / Fout ** 0.5)
    fcc_b = unif(ks[5], (1, 1), 1.0 / Fout ** 0.5)
    fo_in = 2 * H + Fout
    fco_wT = unif(ks[6], (fo_in, Fout), 1.0 / fo_in ** 0.5)
    fco_b = unif(ks[7], (1, Fout), 1.0 / fo_in ** 0.5)
    rb = 1.0 / H ** 0.5
    wih_f = unif(ks[8], (N, H), rb)      # = torch weight_ih_l0.T
    whh_f = unif(ks[9], (H, H), rb)      # = torch weight_hh_l0.T
    bih_f = unif(ks[10], (1, H), rb)
    bhh_f = unif(ks[11], (1, H), rb)
    wih_b = unif(ks[12], (N, H), rb)
    whh_b = unif(ks[13], (H, H), rb)
    bih_b = unif(ks[14], (1, H), rb)
    bhh_b = unif(ks[15], (1, H), rb)

    return dict(
        W=W, a_top=a[:Fout], a_bot=a[Fout:],
        fc_w=fc_wT, fc_b=fc_b, fcc_w=fcc_wT, fcc_b=fcc_b,
        fco_wT=fco_wT, b_out=fco_b,
        wih_f=wih_f, whh_f=whh_f, b_f=bih_f + bhh_f,
        wih_b=wih_b, whh_b=whh_b, b_b=bih_b + bhh_b,
    )


def reference(x, adj, p):
    """Literal JAX transcription of the torch forward (for validation)."""
    feat = jnp.matmul(x, p["W"])                                   # [B, N, F]
    B, N, F = feat.shape
    a = jnp.concatenate([p["a_top"], p["a_bot"]], axis=0)          # [2F, E]
    A = jnp.tile(feat, (1, 1, N)).reshape(B, N * N, F)
    Bm = jnp.tile(feat, (1, N, 1))
    atom_trans = jnp.concatenate([A, Bm], axis=1).reshape(B, N, N, 2 * F)
    e = _lrelu(jnp.matmul(atom_trans, a))                          # [B, N, N, E]
    e = (jnp.matmul(e, p["fc_w"]) + p["fc_b"][0, 0])[..., 0]       # [B, N, N]
    logits = jnp.where(adj > 0, e, jnp.full_like(e, NEG_INF))
    att = jax.nn.softmax(logits, axis=2)
    at_input = att[..., None] * feat[:, :, None, :]                # query-atom feature
    hn = _lrelu(jnp.matmul(at_input, p["fcc_w"])[..., 0] + p["fcc_b"][0, 0])

    def rnn_dir(xseq, wih, whh, b):
        h = jnp.zeros((xseq.shape[0], whh.shape[0]), jnp.float32)
        outs = []
        for t in range(xseq.shape[1]):
            h = jnp.tanh(xseq[:, t] @ wih + h @ whh + b)
            outs.append(h)
        return jnp.stack(outs, axis=1)

    out_f = rnn_dir(hn, p["wih_f"], p["whh_f"], p["b_f"])
    out_b = rnn_dir(hn[:, ::-1], p["wih_b"], p["whh_b"], p["b_b"])[:, ::-1]
    rnn_out = _lrelu(jnp.concatenate([out_f, out_b], axis=2))      # [B, N, 2H]
    h1 = jnp.matmul(att, feat)
    cat = jnp.concatenate([rnn_out, h1], axis=2)
    pre = jnp.matmul(cat, p["fco_wT"]) + p["b_out"][0]
    return jnp.where(pre > 0, pre, jnp.exp(pre) - 1.0)


if __name__ == "__main__":
    # args: max_atom=N=8, gat_e_out_dim=8, gat_ci_out=8, gnn_dropout=0.0
    B, N, Fin, Fout, E, H = 8, 8, 16, 32, 8, 8
    key = jax.random.PRNGKey(0)
    kx, ka, kp = jax.random.split(key, 3)
    x = jax.random.normal(kx, (B, N, Fin), jnp.float32)
    adj = (jax.random.uniform(ka, (B, N, N)) > 0.4).astype(jnp.float32)
    adj = jnp.maximum(adj, jnp.eye(N, dtype=jnp.float32)[None])
    params = init_params(kp, N, Fin, Fout, E, H)

    out = jax.block_until_ready(gat_layer_with_rnn(x, adj, params))
    with jax.default_matmul_precision("highest"):
        ref = jax.block_until_ready(reference(x, adj, params))
    assert out.shape == (B, N, Fout)
    err = float(jnp.max(jnp.abs(out - ref)))
    # bf16 MXU operands + approx reciprocal: validated against the f32 reference
    assert jnp.allclose(out, ref, atol=5e-2, rtol=5e-2), f"max abs err {err}"
    print("KERNEL_OK")
</pallas_src>

<mosaic_0001>
module attributes {stable_mosaic.version = 11 : i64} {
  func.func @gat_rnn_kernel(%arg0: i32, %arg1: memref<64x16xbf16, #tpu.memory_space<vmem>>, %arg2: memref<64x32xbf16, #tpu.memory_space<vmem>>, %arg3: memref<8x8x8xf32, #tpu.memory_space<vmem>>, %arg4: memref<16x32xbf16, #tpu.memory_space<vmem>>, %arg5: memref<32x24xbf16, #tpu.memory_space<vmem>>, %arg6: memref<1x8xf32, #tpu.memory_space<vmem>>, %arg7: memref<1x32xf32, #tpu.memory_space<vmem>>, %arg8: memref<8x16xbf16, #tpu.memory_space<vmem>>, %arg9: memref<8x8xf32, #tpu.memory_space<vmem>>, %arg10: memref<8x8xf32, #tpu.memory_space<vmem>>, %arg11: memref<1x16xf32, #tpu.memory_space<vmem>>, %arg12: memref<16x32xbf16, #tpu.memory_space<vmem>>, %arg13: memref<32x32xbf16, #tpu.memory_space<vmem>>, %arg14: memref<1x32xf32, #tpu.memory_space<vmem>>, %arg15: memref<2xf32, #tpu.memory_space<smem>>, %arg16: memref<1x8x256xf32, #tpu.memory_space<vmem>>, %arg17: memref<8x8x16xf32, #tpu.memory_space<vmem>>) attributes {dimension_semantics = [#tpu.dimension_semantics<arbitrary>], iteration_bounds = array<i64: 1>, scalar_prefetch = 0 : i64, scratch_operands = 1 : i64, tpu.core_type = #tpu.core_type<tc>, window_params = [{transform_indices = @transform_0, window_bounds = array<i64: 64, 16>}, {transform_indices = @transform_1, window_bounds = array<i64: 64, 32>}, {transform_indices = @transform_2, window_bounds = array<i64: 8, 8, 8>}, {pipeline_mode = #tpu.pipeline_mode<synchronous>, transform_indices = @transform_3, window_bounds = array<i64: 16, 32>}, {pipeline_mode = #tpu.pipeline_mode<synchronous>, transform_indices = @transform_4, window_bounds = array<i64: 32, 24>}, {pipeline_mode = #tpu.pipeline_mode<synchronous>, transform_indices = @transform_5, window_bounds = array<i64: 1, 8>}, {pipeline_mode = #tpu.pipeline_mode<synchronous>, transform_indices = @transform_6, window_bounds = array<i64: 1, 32>}, {pipeline_mode = #tpu.pipeline_mode<synchronous>, transform_indices = @transform_7, window_bounds = array<i64: 8, 16>}, {pipeline_mode = #tpu.pipeline_mode<synchronous>, transform_indices = @transform_8, window_bounds = array<i64: 8, 8>}, {pipeline_mode = #tpu.pipeline_mode<synchronous>, transform_indices = @transform_9, window_bounds = array<i64: 8, 8>}, {pipeline_mode = #tpu.pipeline_mode<synchronous>, transform_indices = @transform_10, window_bounds = array<i64: 1, 16>}, {pipeline_mode = #tpu.pipeline_mode<synchronous>, transform_indices = @transform_11, window_bounds = array<i64: 16, 32>}, {pipeline_mode = #tpu.pipeline_mode<synchronous>, transform_indices = @transform_12, window_bounds = array<i64: 32, 32>}, {pipeline_mode = #tpu.pipeline_mode<synchronous>, transform_indices = @transform_13, window_bounds = array<i64: 1, 32>}, {transform_indices = @transform_14, window_bounds = array<i64: 2>}, {transform_indices = @transform_15, window_bounds = array<i64: 1, 8, 256>}]} {
    %c0 = arith.constant 0 : index
    %0 = memref.load %arg15[%c0] : memref<2xf32, #tpu.memory_space<smem>>
    %c1 = arith.constant 1 : index
    %1 = memref.load %arg15[%c1] : memref<2xf32, #tpu.memory_space<smem>>
    %c0_0 = arith.constant 0 : index
    %c0_1 = arith.constant 0 : index
    %2 = vector.load %arg1[%c0_0, %c0_1] : memref<64x16xbf16, #tpu.memory_space<vmem>>, vector<64x16xbf16>
    %c0_2 = arith.constant 0 : index
    %c0_3 = arith.constant 0 : index
    %3 = vector.load %arg4[%c0_2, %c0_3] : memref<16x32xbf16, #tpu.memory_space<vmem>>, vector<16x32xbf16>
    %cst = arith.constant dense<0.000000e+00> : vector<64x32xf32>
    %4 = tpu.matmul %2, %3, %cst {dimension_numbers = #tpu.dot_dimension_numbers<[1], [0], [0], [1], [0, 0, 1, 1], [], []>} : vector<64x16xbf16>, vector<16x32xbf16>, vector<64x32xf32> -> vector<64x32xf32>
    %c0_4 = arith.constant 0 : index
    %c0_5 = arith.constant 0 : index
    %5 = vector.load %arg7[%c0_4, %c0_5] : memref<1x32xf32, #tpu.memory_space<vmem>>, vector<1x32xf32>
    %6 = vector.broadcast %5 : vector<1x32xf32> to vector<64x32xf32>
    %7 = arith.mulf %4, %6 : vector<64x32xf32>
    %cst_6 = arith.constant dense<0.000000e+00> : vector<64xf32>
    %8 = vector.multi_reduction <add>, %7, %cst_6 [1] : vector<64x32xf32> to vector<64xf32>
    %9 = vector.shape_cast %8 : vector<64xf32> to vector<64x1xf32>
    %c0_7 = arith.constant 0 : index
    %c0_8 = arith.constant 0 : index
    %10 = vector.load %arg2[%c0_7, %c0_8] : memref<64x32xbf16, #tpu.memory_space<vmem>>, vector<64x32xbf16>
    %c0_9 = arith.constant 0 : index
    %c0_10 = arith.constant 0 : index
    %11 = vector.load %arg5[%c0_9, %c0_10] : memref<32x24xbf16, #tpu.memory_space<vmem>>, vector<32x24xbf16>
    %cst_11 = arith.constant dense<0.000000e+00> : vector<64x24xf32>
    %12 = tpu.matmul %10, %11, %cst_11 {dimension_numbers = #tpu.dot_dimension_numbers<[1], [0], [0], [1], [0, 0, 1, 1], [], []>} : vector<64x32xbf16>, vector<32x24xbf16>, vector<64x24xf32> -> vector<64x24xf32>
    %c0_12 = arith.constant 0 : index
    %c0_13 = arith.constant 0 : index
    %13 = vector.load %arg6[%c0_12, %c0_13] : memref<1x8xf32, #tpu.memory_space<vmem>>, vector<1x8xf32>
    %14 = vector.extract_strided_slice %12 {offsets = [0, 0], sizes = [64, 8], strides = [1, 1]} : vector<64x24xf32> to vector<64x8xf32>
    %cst_14 = arith.constant 0.000000e+00 : f32
    %15 = vector.broadcast %cst_14 : f32 to vector<64x8xf32>
    %16 = arith.cmpf ogt, %14, %15 : vector<64x8xf32>
    %cst_15 = arith.constant 0.00999999977 : f32
    %17 = vector.broadcast %cst_15 : f32 to vector<64x8xf32>
    %18 = arith.mulf %17, %14 : vector<64x8xf32>
    %19 = arith.select %16, %14, %18 : vector<64x8xi1>, vector<64x8xf32>
    %20 = vector.broadcast %13 : vector<1x8xf32> to vector<64x8xf32>
    %21 = arith.mulf %19, %20 : vector<64x8xf32>
    %cst_16 = arith.constant dense<0.000000e+00> : vector<64xf32>
    %22 = vector.multi_reduction <add>, %21, %cst_16 [1] : vector<64x8xf32> to vector<64xf32>
    %23 = vector.shape_cast %22 : vector<64xf32> to vector<64x1xf32>
    %24 = vector.broadcast %0 : f32 to vector<64x1xf32>
    %25 = arith.addf %23, %24 : vector<64x1xf32>
    %26 = vector.shape_cast %25 : vector<64x1xf32> to vector<8x8x1xf32>
    %27 = vector.extract_strided_slice %12 {offsets = [0, 8], sizes = [64, 8], strides = [1, 1]} : vector<64x24xf32> to vector<64x8xf32>
    %cst_17 = arith.constant 0.000000e+00 : f32
    %28 = vector.broadcast %cst_17 : f32 to vector<64x8xf32>
    %29 = arith.cmpf ogt, %27, %28 : vector<64x8xf32>
    %cst_18 = arith.constant 0.00999999977 : f32
    %30 = vector.broadcast %cst_18 : f32 to vector<64x8xf32>
    %31 = arith.mulf %30, %27 : vector<64x8xf32>
    %32 = arith.select %29, %27, %31 : vector<64x8xi1>, vector<64x8xf32>
    %33 = vector.broadcast %13 : vector<1x8xf32> to vector<64x8xf32>
    %34 = arith.mulf %32, %33 : vector<64x8xf32>
    %cst_19 = arith.constant dense<0.000000e+00> : vector<64xf32>
    %35 = vector.multi_reduction <add>, %34, %cst_19 [1] : vector<64x8xf32> to vector<64xf32>
    %36 = vector.shape_cast %35 : vector<64xf32> to vector<64x1xf32>
    %37 = vector.broadcast %0 : f32 to vector<64x1xf32>
    %38 = arith.addf %36, %37 : vector<64x1xf32>
    %39 = vector.shape_cast %38 : vector<64x1xf32> to vector<8x8x1xf32>
    %40 = vector.extract_strided_slice %12 {offsets = [0, 16], sizes = [64, 8], strides = [1, 1]} : vector<64x24xf32> to vector<64x8xf32>
    %cst_20 = arith.constant 0.000000e+00 : f32
    %41 = vector.broadcast %cst_20 : f32 to vector<64x8xf32>
    %42 = arith.cmpf ogt, %40, %41 : vector<64x8xf32>
    %cst_21 = arith.constant 0.00999999977 : f32
    %43 = vector.broadcast %cst_21 : f32 to vector<64x8xf32>
    %44 = arith.mulf %43, %40 : vector<64x8xf32>
    %45 = arith.select %42, %40, %44 : vector<64x8xi1>, vector<64x8xf32>
    %46 = vector.broadcast %13 : vector<1x8xf32> to vector<64x8xf32>
    %47 = arith.mulf %45, %46 : vector<64x8xf32>
    %cst_22 = arith.constant dense<0.000000e+00> : vector<64xf32>
    %48 = vector.multi_reduction <add>, %47, %cst_22 [1] : vector<64x8xf32> to vector<64xf32>
    %49 = vector.shape_cast %48 : vector<64xf32> to vector<64x1xf32>
    %50 = vector.broadcast %0 : f32 to vector<64x1xf32>
    %51 = arith.addf %49, %50 : vector<64x1xf32>
    %52 = vector.shape_cast %51 : vector<64x1xf32> to vector<8x8x1xf32>
    %53 = tpu.iota {dimensions = array<i32: 1>} : vector<8x8x8xi32>
    %54 = tpu.iota {dimensions = array<i32: 2>} : vector<8x8x8xi32>
    %c4_i32 = arith.constant 4 : i32
    %55 = vector.broadcast %c4_i32 : i32 to vector<8x8x8xi32>
    %56 = arith.cmpi slt, %54, %55 : vector<8x8x8xi32>
    %57 = vector.shape_cast %26 : vector<8x8x1xf32> to vector<8x8x1xf32>
    %58 = vector.broadcast %57 : vector<8x8x1xf32> to vector<8x8x8xf32>
    %59 = vector.shape_cast %39 : vector<8x8x1xf32> to vector<8x8x1xf32>
    %60 = vector.broadcast %59 : vector<8x8x1xf32> to vector<8x8x8xf32>
    %61 = arith.select %56, %58, %60 : vector<8x8x8xi1>, vector<8x8x8xf32>
    %c4_i32_23 = arith.constant 4 : i32
    %62 = vector.broadcast %c4_i32_23 : i32 to vector<8x8x8xi32>
    %63 = arith.cmpi slt, %54, %62 : vector<8x8x8xi32>
    %c4_i32_24 = arith.constant 4 : i32
    %64 = vector.broadcast %c4_i32_24 : i32 to vector<8x8x8xi32>
    %65 = arith.subi %54, %64 : vector<8x8x8xi32>
    %66 = arith.select %63, %54, %65 : vector<8x8x8xi1>, vector<8x8x8xi32>
    %cst_25 = arith.constant 0.000000e+00 : f32
    %67 = vector.broadcast %cst_25 : f32 to vector<8x8x8xf32>
    %c0_i32 = arith.constant 0 : i32
    %68 = vector.broadcast %c0_i32 : i32 to vector<8x8x8xi32>
    %69 = arith.cmpi eq, %66, %68 : vector<8x8x8xi32>
    %70 = vector.extract_strided_slice %52 {offsets = [0, 0, 0], sizes = [8, 1, 1], strides = [1, 1, 1]} : vector<8x8x1xf32> to vector<8x1x1xf32>
    %71 = vector.shape_cast %70 : vector<8x1x1xf32> to vector<8x1x1xf32>
    %72 = vector.broadcast %71 : vector<8x1x1xf32> to vector<8x8x8xf32>
    %73 = arith.select %69, %72, %67 : vector<8x8x8xi1>, vector<8x8x8xf32>
    %c1_i32 = arith.constant 1 : i32
    %74 = vector.broadcast %c1_i32 : i32 to vector<8x8x8xi32>
    %75 = arith.cmpi eq, %66, %74 : vector<8x8x8xi32>
    %76 = vector.extract_strided_slice %52 {offsets = [0, 1, 0], sizes = [8, 1, 1], strides = [1, 1, 1]} : vector<8x8x1xf32> to vector<8x1x1xf32>
    %77 = vector.shape_cast %76 : vector<8x1x1xf32> to vector<8x1x1xf32>
    %78 = vector.broadcast %77 : vector<8x1x1xf32> to vector<8x8x8xf32>
    %79 = arith.select %75, %78, %73 : vector<8x8x8xi1>, vector<8x8x8xf32>
    %c2_i32 = arith.constant 2 : i32
    %80 = vector.broadcast %c2_i32 : i32 to vector<8x8x8xi32>
    %81 = arith.cmpi eq, %66, %80 : vector<8x8x8xi32>
    %82 = vector.extract_strided_slice %52 {offsets = [0, 2, 0], sizes = [8, 1, 1], strides = [1, 1, 1]} : vector<8x8x1xf32> to vector<8x1x1xf32>
    %83 = vector.shape_cast %82 : vector<8x1x1xf32> to vector<8x1x1xf32>
    %84 = vector.broadcast %83 : vector<8x1x1xf32> to vector<8x8x8xf32>
    %85 = arith.select %81, %84, %79 : vector<8x8x8xi1>, vector<8x8x8xf32>
    %c3_i32 = arith.constant 3 : i32
    %86 = vector.broadcast %c3_i32 : i32 to vector<8x8x8xi32>
    %87 = arith.cmpi eq, %66, %86 : vector<8x8x8xi32>
    %88 = vector.extract_strided_slice %52 {offsets = [0, 3, 0], sizes = [8, 1, 1], strides = [1, 1, 1]} : vector<8x8x1xf32> to vector<8x1x1xf32>
    %89 = vector.shape_cast %88 : vector<8x1x1xf32> to vector<8x1x1xf32>
    %90 = vector.broadcast %89 : vector<8x1x1xf32> to vector<8x8x8xf32>
    %91 = arith.select %87, %90, %85 : vector<8x8x8xi1>, vector<8x8x8xf32>
    %c4_i32_26 = arith.constant 4 : i32
    %92 = vector.broadcast %c4_i32_26 : i32 to vector<8x8x8xi32>
    %93 = arith.cmpi slt, %53, %92 : vector<8x8x8xi32>
    %94 = arith.select %93, %61, %91 : vector<8x8x8xi1>, vector<8x8x8xf32>
    %c0_27 = arith.constant 0 : index
    %c0_28 = arith.constant 0 : index
    %c0_29 = arith.constant 0 : index
    %95 = vector.load %arg3[%c0_27, %c0_28, %c0_29] : memref<8x8x8xf32, #tpu.memory_space<vmem>>, vector<8x8x8xf32>
    %cst_30 = arith.constant 0.000000e+00 : f32
    %96 = vector.broadcast %cst_30 : f32 to vector<8x8x8xf32>
    %97 = arith.cmpf ogt, %95, %96 : vector<8x8x8xf32>
    %cst_31 = arith.constant -9.000000e+15 : f32
    %98 = vector.broadcast %cst_31 : f32 to vector<8x8x8xf32>
    %99 = arith.select %97, %94, %98 : vector<8x8x8xi1>, vector<8x8x8xf32>
    %cst_32 = arith.constant dense<0xFF800000> : vector<8x8xf32>
    %100 = vector.multi_reduction <maximumf>, %99, %cst_32 [2] : vector<8x8x8xf32> to vector<8x8xf32>
    %101 = vector.shape_cast %100 : vector<8x8xf32> to vector<8x8x1xf32>
    %102 = vector.broadcast %101 : vector<8x8x1xf32> to vector<8x8x8xf32>
    %103 = arith.subf %99, %102 : vector<8x8x8xf32>
    %104 = math.exp %103 : vector<8x8x8xf32>
    %cst_33 = arith.constant dense<0.000000e+00> : vector<8x8xf32>
    %105 = vector.multi_reduction <add>, %104, %cst_33 [2] : vector<8x8x8xf32> to vector<8x8xf32>
    %106 = vector.shape_cast %105 : vector<8x8xf32> to vector<8x8x1xf32>
    %107 = tpu.reciprocal %106 {approx = true} : vector<8x8x1xf32> -> vector<8x8x1xf32>
    %108 = vector.broadcast %107 : vector<8x8x1xf32> to vector<8x8x8xf32>
    %109 = arith.mulf %104, %108 : vector<8x8x8xf32>
    %110 = vector.shape_cast %9 : vector<64x1xf32> to vector<8x8x1xf32>
    %111 = vector.broadcast %110 : vector<8x8x1xf32> to vector<8x8x8xf32>
    %112 = arith.mulf %109, %111 : vector<8x8x8xf32>
    %113 = vector.broadcast %1 : f32 to vector<8x8x8xf32>
    %114 = arith.addf %112, %113 : vector<8x8x8xf32>
    %cst_34 = arith.constant 0.000000e+00 : f32
    %115 = vector.broadcast %cst_34 : f32 to vector<8x8x8xf32>
    %116 = arith.cmpf ogt, %114, %115 : vector<8x8x8xf32>
    %cst_35 = arith.constant 0.00999999977 : f32
    %117 = vector.broadcast %cst_35 : f32 to vector<8x8x8xf32>
    %118 = arith.mulf %117, %114 : vector<8x8x8xf32>
    %119 = arith.select %116, %114, %118 : vector<8x8x8xi1>, vector<8x8x8xf32>
    %120 = arith.truncf %109 : vector<8x8x8xf32> to vector<8x8x8xbf16>
    %121 = vector.shape_cast %4 : vector<64x32xf32> to vector<8x8x32xf32>
    %122 = arith.truncf %121 : vector<8x8x32xf32> to vector<8x8x32xbf16>
    "tpu.trace_start"() <{level = 10 : i32, message = "bij,bjf->bif"}> : () -> ()
    %cst_36 = arith.constant dense<0.000000e+00> : vector<8x8x32xf32>
    %123 = tpu.matmul %120, %122, %cst_36 {dimension_numbers = #tpu.dot_dimension_numbers<[2], [1], [1], [2], [0, 0, 0, 1, 1, 2], [0], [0]>} : vector<8x8x8xbf16>, vector<8x8x32xbf16>, vector<8x8x32xf32> -> vector<8x8x32xf32>
    "tpu.trace_stop"() : () -> ()
    %124 = vector.shape_cast %119 : vector<8x8x8xf32> to vector<64x8xf32>
    %125 = arith.truncf %124 : vector<64x8xf32> to vector<64x8xbf16>
    %c0_37 = arith.constant 0 : index
    %c0_38 = arith.constant 0 : index
    %126 = vector.load %arg8[%c0_37, %c0_38] : memref<8x16xbf16, #tpu.memory_space<vmem>>, vector<8x16xbf16>
    %cst_39 = arith.constant dense<0.000000e+00> : vector<64x16xf32>
    %127 = tpu.matmul %125, %126, %cst_39 {dimension_numbers = #tpu.dot_dimension_numbers<[1], [0], [0], [1], [0, 0, 1, 1], [], []>} : vector<64x8xbf16>, vector<8x16xbf16>, vector<64x16xf32> -> vector<64x16xf32>
    %c0_40 = arith.constant 0 : index
    %c0_41 = arith.constant 0 : index
    %128 = vector.load %arg11[%c0_40, %c0_41] : memref<1x16xf32, #tpu.memory_space<vmem>>, vector<1x16xf32>
    %129 = vector.broadcast %128 : vector<1x16xf32> to vector<64x16xf32>
    %130 = arith.addf %127, %129 : vector<64x16xf32>
    %131 = vector.shape_cast %130 : vector<64x16xf32> to vector<8x8x16xf32>
    %c0_42 = arith.constant 0 : index
    %c0_43 = arith.constant 0 : index
    %132 = vector.load %arg9[%c0_42, %c0_43] : memref<8x8xf32, #tpu.memory_space<vmem>>, vector<8x8xf32>
    %c0_44 = arith.constant 0 : index
    %c0_45 = arith.constant 0 : index
    %133 = vector.load %arg10[%c0_44, %c0_45] : memref<8x8xf32, #tpu.memory_space<vmem>>, vector<8x8xf32>
    %cst_46 = arith.constant 0.000000e+00 : f32
    %134 = vector.broadcast %cst_46 : f32 to vector<8x8xf32>
    %cst_47 = arith.constant 0.000000e+00 : f32
    %135 = vector.broadcast %cst_47 : f32 to vector<8x8xf32>
    %136 = vector.extract_strided_slice %131 {offsets = [0, 0, 0], sizes = [8, 1, 8], strides = [1, 1, 1]} : vector<8x8x16xf32> to vector<8x1x8xf32>
    %137 = vector.shape_cast %136 : vector<8x1x8xf32> to vector<8x8xf32>
    %cst_48 = arith.constant dense<0.000000e+00> : vector<8x8xf32>
    %138 = tpu.matmul %134, %132, %cst_48 {dimension_numbers = #tpu.dot_dimension_numbers<[1], [0], [0], [1], [0, 0, 1, 1], [], []>} : vector<8x8xf32>, vector<8x8xf32>, vector<8x8xf32> -> vector<8x8xf32>
    %139 = arith.addf %137, %138 : vector<8x8xf32>
    %140 = math.tanh %139 : vector<8x8xf32>
    %141 = vector.extract_strided_slice %131 {offsets = [0, 7, 8], sizes = [8, 1, 8], strides = [1, 1, 1]} : vector<8x8x16xf32> to vector<8x1x8xf32>
    %142 = vector.shape_cast %141 : vector<8x1x8xf32> to vector<8x8xf32>
    %cst_49 = arith.constant dense<0.000000e+00> : vector<8x8xf32>
    %143 = tpu.matmul %135, %133, %cst_49 {dimension_numbers = #tpu.dot_dimension_numbers<[1], [0], [0], [1], [0, 0, 1, 1], [], []>} : vector<8x8xf32>, vector<8x8xf32>, vector<8x8xf32> -> vector<8x8xf32>
    %144 = arith.addf %142, %143 : vector<8x8xf32>
    %145 = math.tanh %144 : vector<8x8xf32>
    %c0_50 = arith.constant 0 : index
    %c0_51 = arith.constant 0 : index
    %c0_52 = arith.constant 0 : index
    %146 = vector.load %arg17[%c0_50, %c0_51, %c0_52] : memref<8x8x16xf32, #tpu.memory_space<vmem>>, vector<8x1x8xf32>
    %147 = vector.shape_cast %146 : vector<8x1x8xf32> to vector<8x8xf32>
    %148 = vector.shape_cast %140 : vector<8x8xf32> to vector<8x1x8xf32>
    tpu.vector_store %arg17[%c0_50, %c0_51, %c0_52], %148 {strides = array<i32>} : memref<8x8x16xf32, #tpu.memory_space<vmem>>, vector<8x1x8xf32>,
    %c0_53 = arith.constant 0 : index
    %c7 = arith.constant 7 : index
    %c8 = arith.constant 8 : index
    %149 = vector.load %arg17[%c0_53, %c7, %c8] : memref<8x8x16xf32, #tpu.memory_space<vmem>>, vector<8x1x8xf32>
    %150 = vector.shape_cast %149 : vector<8x1x8xf32> to vector<8x8xf32>
    %151 = vector.shape_cast %145 : vector<8x8xf32> to vector<8x1x8xf32>
    tpu.vector_store %arg17[%c0_53, %c7, %c8], %151 {strides = array<i32>} : memref<8x8x16xf32, #tpu.memory_space<vmem>>, vector<8x1x8xf32>,
    %152 = vector.extract_strided_slice %131 {offsets = [0, 1, 0], sizes = [8, 1, 8], strides = [1, 1, 1]} : vector<8x8x16xf32> to vector<8x1x8xf32>
    %153 = vector.shape_cast %152 : vector<8x1x8xf32> to vector<8x8xf32>
    %cst_54 = arith.constant dense<0.000000e+00> : vector<8x8xf32>
    %154 = tpu.matmul %140, %132, %cst_54 {dimension_numbers = #tpu.dot_dimension_numbers<[1], [0], [0], [1], [0, 0, 1, 1], [], []>} : vector<8x8xf32>, vector<8x8xf32>, vector<8x8xf32> -> vector<8x8xf32>
    %155 = arith.addf %153, %154 : vector<8x8xf32>
    %156 = math.tanh %155 : vector<8x8xf32>
    %157 = vector.extract_strided_slice %131 {offsets = [0, 6, 8], sizes = [8, 1, 8], strides = [1, 1, 1]} : vector<8x8x16xf32> to vector<8x1x8xf32>
    %158 = vector.shape_cast %157 : vector<8x1x8xf32> to vector<8x8xf32>
    %cst_55 = arith.constant dense<0.000000e+00> : vector<8x8xf32>
    %159 = tpu.matmul %145, %133, %cst_55 {dimension_numbers = #tpu.dot_dimension_numbers<[1], [0], [0], [1], [0, 0, 1, 1], [], []>} : vector<8x8xf32>, vector<8x8xf32>, vector<8x8xf32> -> vector<8x8xf32>
    %160 = arith.addf %158, %159 : vector<8x8xf32>
    %161 = math.tanh %160 : vector<8x8xf32>
    %c0_56 = arith.constant 0 : index
    %c1_57 = arith.constant 1 : index
    %c0_58 = arith.constant 0 : index
    %162 = vector.load %arg17[%c0_56, %c1_57, %c0_58] : memref<8x8x16xf32, #tpu.memory_space<vmem>>, vector<8x1x8xf32>
    %163 = vector.shape_cast %162 : vector<8x1x8xf32> to vector<8x8xf32>
    %164 = vector.shape_cast %156 : vector<8x8xf32> to vector<8x1x8xf32>
    tpu.vector_store %arg17[%c0_56, %c1_57, %c0_58], %164 {strides = array<i32>} : memref<8x8x16xf32, #tpu.memory_space<vmem>>, vector<8x1x8xf32>,
    %c0_59 = arith.constant 0 : index
    %c6 = arith.constant 6 : index
    %c8_60 = arith.constant 8 : index
    %165 = vector.load %arg17[%c0_59, %c6, %c8_60] : memref<8x8x16xf32, #tpu.memory_space<vmem>>, vector<8x1x8xf32>
    %166 = vector.shape_cast %165 : vector<8x1x8xf32> to vector<8x8xf32>
    %167 = vector.shape_cast %161 : vector<8x8xf32> to vector<8x1x8xf32>
    tpu.vector_store %arg17[%c0_59, %c6, %c8_60], %167 {strides = array<i32>} : memref<8x8x16xf32, #tpu.memory_space<vmem>>, vector<8x1x8xf32>,
    %168 = vector.extract_strided_slice %131 {offsets = [0, 2, 0], sizes = [8, 1, 8], strides = [1, 1, 1]} : vector<8x8x16xf32> to vector<8x1x8xf32>
    %169 = vector.shape_cast %168 : vector<8x1x8xf32> to vector<8x8xf32>
    %cst_61 = arith.constant dense<0.000000e+00> : vector<8x8xf32>
    %170 = tpu.matmul %156, %132, %cst_61 {dimension_numbers = #tpu.dot_dimension_numbers<[1], [0], [0], [1], [0, 0, 1, 1], [], []>} : vector<8x8xf32>, vector<8x8xf32>, vector<8x8xf32> -> vector<8x8xf32>
    %171 = arith.addf %169, %170 : vector<8x8xf32>
    %172 = math.tanh %171 : vector<8x8xf32>
    %173 = vector.extract_strided_slice %131 {offsets = [0, 5, 8], sizes = [8, 1, 8], strides = [1, 1, 1]} : vector<8x8x16xf32> to vector<8x1x8xf32>
    %174 = vector.shape_cast %173 : vector<8x1x8xf32> to vector<8x8xf32>
    %cst_62 = arith.constant dense<0.000000e+00> : vector<8x8xf32>
    %175 = tpu.matmul %161, %133, %cst_62 {dimension_numbers = #tpu.dot_dimension_numbers<[1], [0], [0], [1], [0, 0, 1, 1], [], []>} : vector<8x8xf32>, vector<8x8xf32>, vector<8x8xf32> -> vector<8x8xf32>
    %176 = arith.addf %174, %175 : vector<8x8xf32>
    %177 = math.tanh %176 : vector<8x8xf32>
    %c0_63 = arith.constant 0 : index
    %c2 = arith.constant 2 : index
    %c0_64 = arith.constant 0 : index
    %178 = vector.load %arg17[%c0_63, %c2, %c0_64] : memref<8x8x16xf32, #tpu.memory_space<vmem>>, vector<8x1x8xf32>
    %179 = vector.shape_cast %178 : vector<8x1x8xf32> to vector<8x8xf32>
    %180 = vector.shape_cast %172 : vector<8x8xf32> to vector<8x1x8xf32>
    tpu.vector_store %arg17[%c0_63, %c2, %c0_64], %180 {strides = array<i32>} : memref<8x8x16xf32, #tpu.memory_space<vmem>>, vector<8x1x8xf32>,
    %c0_65 = arith.constant 0 : index
    %c5 = arith.constant 5 : index
    %c8_66 = arith.constant 8 : index
    %181 = vector.load %arg17[%c0_65, %c5, %c8_66] : memref<8x8x16xf32, #tpu.memory_space<vmem>>, vector<8x1x8xf32>
    %182 = vector.shape_cast %181 : vector<8x1x8xf32> to vector<8x8xf32>
    %183 = vector.shape_cast %177 : vector<8x8xf32> to vector<8x1x8xf32>
    tpu.vector_store %arg17[%c0_65, %c5, %c8_66], %183 {strides = array<i32>} : memref<8x8x16xf32, #tpu.memory_space<vmem>>, vector<8x1x8xf32>,
    %184 = vector.extract_strided_slice %131 {offsets = [0, 3, 0], sizes = [8, 1, 8], strides = [1, 1, 1]} : vector<8x8x16xf32> to vector<8x1x8xf32>
    %185 = vector.shape_cast %184 : vector<8x1x8xf32> to vector<8x8xf32>
    %cst_67 = arith.constant dense<0.000000e+00> : vector<8x8xf32>
    %186 = tpu.matmul %172, %132, %cst_67 {dimension_numbers = #tpu.dot_dimension_numbers<[1], [0], [0], [1], [0, 0, 1, 1], [], []>} : vector<8x8xf32>, vector<8x8xf32>, vector<8x8xf32> -> vector<8x8xf32>
    %187 = arith.addf %185, %186 : vector<8x8xf32>
    %188 = math.tanh %187 : vector<8x8xf32>
    %189 = vector.extract_strided_slice %131 {offsets = [0, 4, 8], sizes = [8, 1, 8], strides = [1, 1, 1]} : vector<8x8x16xf32> to vector<8x1x8xf32>
    %190 = vector.shape_cast %189 : vector<8x1x8xf32> to vector<8x8xf32>
    %cst_68 = arith.constant dense<0.000000e+00> : vector<8x8xf32>
    %191 = tpu.matmul %177, %133, %cst_68 {dimension_numbers = #tpu.dot_dimension_numbers<[1], [0], [0], [1], [0, 0, 1, 1], [], []>} : vector<8x8xf32>, vector<8x8xf32>, vector<8x8xf32> -> vector<8x8xf32>
    %192 = arith.addf %190, %191 : vector<8x8xf32>
    %193 = math.tanh %192 : vector<8x8xf32>
    %c0_69 = arith.constant 0 : index
    %c3 = arith.constant 3 : index
    %c0_70 = arith.constant 0 : index
    %194 = vector.load %arg17[%c0_69, %c3, %c0_70] : memref<8x8x16xf32, #tpu.memory_space<vmem>>, vector<8x1x8xf32>
    %195 = vector.shape_cast %194 : vector<8x1x8xf32> to vector<8x8xf32>
    %196 = vector.shape_cast %188 : vector<8x8xf32> to vector<8x1x8xf32>
    tpu.vector_store %arg17[%c0_69, %c3, %c0_70], %196 {strides = array<i32>} : memref<8x8x16xf32, #tpu.memory_space<vmem>>, vector<8x1x8xf32>,
    %c0_71 = arith.constant 0 : index
    %c4 = arith.constant 4 : index
    %c8_72 = arith.constant 8 : index
    %197 = vector.load %arg17[%c0_71, %c4, %c8_72] : memref<8x8x16xf32, #tpu.memory_space<vmem>>, vector<8x1x8xf32>
    %198 = vector.shape_cast %197 : vector<8x1x8xf32> to vector<8x8xf32>
    %199 = vector.shape_cast %193 : vector<8x8xf32> to vector<8x1x8xf32>
    tpu.vector_store %arg17[%c0_71, %c4, %c8_72], %199 {strides = array<i32>} : memref<8x8x16xf32, #tpu.memory_space<vmem>>, vector<8x1x8xf32>,
    %200 = vector.extract_strided_slice %131 {offsets = [0, 4, 0], sizes = [8, 1, 8], strides = [1, 1, 1]} : vector<8x8x16xf32> to vector<8x1x8xf32>
    %201 = vector.shape_cast %200 : vector<8x1x8xf32> to vector<8x8xf32>
    %cst_73 = arith.constant dense<0.000000e+00> : vector<8x8xf32>
    %202 = tpu.matmul %188, %132, %cst_73 {dimension_numbers = #tpu.dot_dimension_numbers<[1], [0], [0], [1], [0, 0, 1, 1], [], []>} : vector<8x8xf32>, vector<8x8xf32>, vector<8x8xf32> -> vector<8x8xf32>
    %203 = arith.addf %201, %202 : vector<8x8xf32>
    %204 = math.tanh %203 : vector<8x8xf32>
    %205 = vector.extract_strided_slice %131 {offsets = [0, 3, 8], sizes = [8, 1, 8], strides = [1, 1, 1]} : vector<8x8x16xf32> to vector<8x1x8xf32>
    %206 = vector.shape_cast %205 : vector<8x1x8xf32> to vector<8x8xf32>
    %cst_74 = arith.constant dense<0.000000e+00> : vector<8x8xf32>
    %207 = tpu.matmul %193, %133, %cst_74 {dimension_numbers = #tpu.dot_dimension_numbers<[1], [0], [0], [1], [0, 0, 1, 1], [], []>} : vector<8x8xf32>, vector<8x8xf32>, vector<8x8xf32> -> vector<8x8xf32>
    %208 = arith.addf %206, %207 : vector<8x8xf32>
    %209 = math.tanh %208 : vector<8x8xf32>
    %c0_75 = arith.constant 0 : index
    %c4_76 = arith.constant 4 : index
    %c0_77 = arith.constant 0 : index
    %210 = vector.load %arg17[%c0_75, %c4_76, %c0_77] : memref<8x8x16xf32, #tpu.memory_space<vmem>>, vector<8x1x8xf32>
    %211 = vector.shape_cast %210 : vector<8x1x8xf32> to vector<8x8xf32>
    %212 = vector.shape_cast %204 : vector<8x8xf32> to vector<8x1x8xf32>
    tpu.vector_store %arg17[%c0_75, %c4_76, %c0_77], %212 {strides = array<i32>} : memref<8x8x16xf32, #tpu.memory_space<vmem>>, vector<8x1x8xf32>,
    %c0_78 = arith.constant 0 : index
    %c3_79 = arith.constant 3 : index
    %c8_80 = arith.constant 8 : index
    %213 = vector.load %arg17[%c0_78, %c3_79, %c8_80] : memref<8x8x16xf32, #tpu.memory_space<vmem>>, vector<8x1x8xf32>
    %214 = vector.shape_cast %213 : vector<8x1x8xf32> to vector<8x8xf32>
    %215 = vector.shape_cast %209 : vector<8x8xf32> to vector<8x1x8xf32>
    tpu.vector_store %arg17[%c0_78, %c3_79, %c8_80], %215 {strides = array<i32>} : memref<8x8x16xf32, #tpu.memory_space<vmem>>, vector<8x1x8xf32>,
    %216 = vector.extract_strided_slice %131 {offsets = [0, 5, 0], sizes = [8, 1, 8], strides = [1, 1, 1]} : vector<8x8x16xf32> to vector<8x1x8xf32>
    %217 = vector.shape_cast %216 : vector<8x1x8xf32> to vector<8x8xf32>
    %cst_81 = arith.constant dense<0.000000e+00> : vector<8x8xf32>
    %218 = tpu.matmul %204, %132, %cst_81 {dimension_numbers = #tpu.dot_dimension_numbers<[1], [0], [0], [1], [0, 0, 1, 1], [], []>} : vector<8x8xf32>, vector<8x8xf32>, vector<8x8xf32> -> vector<8x8xf32>
    %219 = arith.addf %217, %218 : vector<8x8xf32>
    %220 = math.tanh %219 : vector<8x8xf32>
    %221 = vector.extract_strided_slice %131 {offsets = [0, 2, 8], sizes = [8, 1, 8], strides = [1, 1, 1]} : vector<8x8x16xf32> to vector<8x1x8xf32>
    %222 = vector.shape_cast %221 : vector<8x1x8xf32> to vector<8x8xf32>
    %cst_82 = arith.constant dense<0.000000e+00> : vector<8x8xf32>
    %223 = tpu.matmul %209, %133, %cst_82 {dimension_numbers = #tpu.dot_dimension_numbers<[1], [0], [0], [1], [0, 0, 1, 1], [], []>} : vector<8x8xf32>, vector<8x8xf32>, vector<8x8xf32> -> vector<8x8xf32>
    %224 = arith.addf %222, %223 : vector<8x8xf32>
    %225 = math.tanh %224 : vector<8x8xf32>
    %c0_83 = arith.constant 0 : index
    %c5_84 = arith.constant 5 : index
    %c0_85 = arith.constant 0 : index
    %226 = vector.load %arg17[%c0_83, %c5_84, %c0_85] : memref<8x8x16xf32, #tpu.memory_space<vmem>>, vector<8x1x8xf32>
    %227 = vector.shape_cast %226 : vector<8x1x8xf32> to vector<8x8xf32>
    %228 = vector.shape_cast %220 : vector<8x8xf32> to vector<8x1x8xf32>
    tpu.vector_store %arg17[%c0_83, %c5_84, %c0_85], %228 {strides = array<i32>} : memref<8x8x16xf32, #tpu.memory_space<vmem>>, vector<8x1x8xf32>,
    %c0_86 = arith.constant 0 : index
    %c2_87 = arith.constant 2 : index
    %c8_88 = arith.constant 8 : index
    %229 = vector.load %arg17[%c0_86, %c2_87, %c8_88] : memref<8x8x16xf32, #tpu.memory_space<vmem>>, vector<8x1x8xf32>
    %230 = vector.shape_cast %229 : vector<8x1x8xf32> to vector<8x8xf32>
    %231 = vector.shape_cast %225 : vector<8x8xf32> to vector<8x1x8xf32>
    tpu.vector_store %arg17[%c0_86, %c2_87, %c8_88], %231 {strides = array<i32>} : memref<8x8x16xf32, #tpu.memory_space<vmem>>, vector<8x1x8xf32>,
    %232 = vector.extract_strided_slice %131 {offsets = [0, 6, 0], sizes = [8, 1, 8], strides = [1, 1, 1]} : vector<8x8x16xf32> to vector<8x1x8xf32>
    %233 = vector.shape_cast %232 : vector<8x1x8xf32> to vector<8x8xf32>
    %cst_89 = arith.constant dense<0.000000e+00> : vector<8x8xf32>
    %234 = tpu.matmul %220, %132, %cst_89 {dimension_numbers = #tpu.dot_dimension_numbers<[1], [0], [0], [1], [0, 0, 1, 1], [], []>} : vector<8x8xf32>, vector<8x8xf32>, vector<8x8xf32> -> vector<8x8xf32>
    %235 = arith.addf %233, %234 : vector<8x8xf32>
    %236 = math.tanh %235 : vector<8x8xf32>
    %237 = vector.extract_strided_slice %131 {offsets = [0, 1, 8], sizes = [8, 1, 8], strides = [1, 1, 1]} : vector<8x8x16xf32> to vector<8x1x8xf32>
    %238 = vector.shape_cast %237 : vector<8x1x8xf32> to vector<8x8xf32>
    %cst_90 = arith.constant dense<0.000000e+00> : vector<8x8xf32>
    %239 = tpu.matmul %225, %133, %cst_90 {dimension_numbers = #tpu.dot_dimension_numbers<[1], [0], [0], [1], [0, 0, 1, 1], [], []>} : vector<8x8xf32>, vector<8x8xf32>, vector<8x8xf32> -> vector<8x8xf32>
    %240 = arith.addf %238, %239 : vector<8x8xf32>
    %241 = math.tanh %240 : vector<8x8xf32>
    %c0_91 = arith.constant 0 : index
    %c6_92 = arith.constant 6 : index
    %c0_93 = arith.constant 0 : index
    %242 = vector.load %arg17[%c0_91, %c6_92, %c0_93] : memref<8x8x16xf32, #tpu.memory_space<vmem>>, vector<8x1x8xf32>
    %243 = vector.shape_cast %242 : vector<8x1x8xf32> to vector<8x8xf32>
    %244 = vector.shape_cast %236 : vector<8x8xf32> to vector<8x1x8xf32>
    tpu.vector_store %arg17[%c0_91, %c6_92, %c0_93], %244 {strides = array<i32>} : memref<8x8x16xf32, #tpu.memory_space<vmem>>, vector<8x1x8xf32>,
    %c0_94 = arith.constant 0 : index
    %c1_95 = arith.constant 1 : index
    %c8_96 = arith.constant 8 : index
    %245 = vector.load %arg17[%c0_94, %c1_95, %c8_96] : memref<8x8x16xf32, #tpu.memory_space<vmem>>, vector<8x1x8xf32>
    %246 = vector.shape_cast %245 : vector<8x1x8xf32> to vector<8x8xf32>
    %247 = vector.shape_cast %241 : vector<8x8xf32> to vector<8x1x8xf32>
    tpu.vector_store %arg17[%c0_94, %c1_95, %c8_96], %247 {strides = array<i32>} : memref<8x8x16xf32, #tpu.memory_space<vmem>>, vector<8x1x8xf32>,
    %248 = vector.extract_strided_slice %131 {offsets = [0, 7, 0], sizes = [8, 1, 8], strides = [1, 1, 1]} : vector<8x8x16xf32> to vector<8x1x8xf32>
    %249 = vector.shape_cast %248 : vector<8x1x8xf32> to vector<8x8xf32>
    %cst_97 = arith.constant dense<0.000000e+00> : vector<8x8xf32>
    %250 = tpu.matmul %236, %132, %cst_97 {dimension_numbers = #tpu.dot_dimension_numbers<[1], [0], [0], [1], [0, 0, 1, 1], [], []>} : vector<8x8xf32>, vector<8x8xf32>, vector<8x8xf32> -> vector<8x8xf32>
    %251 = arith.addf %249, %250 : vector<8x8xf32>
    %252 = math.tanh %251 : vector<8x8xf32>
    %253 = vector.extract_strided_slice %131 {offsets = [0, 0, 8], sizes = [8, 1, 8], strides = [1, 1, 1]} : vector<8x8x16xf32> to vector<8x1x8xf32>
    %254 = vector.shape_cast %253 : vector<8x1x8xf32> to vector<8x8xf32>
    %cst_98 = arith.constant dense<0.000000e+00> : vector<8x8xf32>
    %255 = tpu.matmul %241, %133, %cst_98 {dimension_numbers = #tpu.dot_dimension_numbers<[1], [0], [0], [1], [0, 0, 1, 1], [], []>} : vector<8x8xf32>, vector<8x8xf32>, vector<8x8xf32> -> vector<8x8xf32>
    %256 = arith.addf %254, %255 : vector<8x8xf32>
    %257 = math.tanh %256 : vector<8x8xf32>
    %c0_99 = arith.constant 0 : index
    %c7_100 = arith.constant 7 : index
    %c0_101 = arith.constant 0 : index
    %258 = vector.load %arg17[%c0_99, %c7_100, %c0_101] : memref<8x8x16xf32, #tpu.memory_space<vmem>>, vector<8x1x8xf32>
    %259 = vector.shape_cast %258 : vector<8x1x8xf32> to vector<8x8xf32>
    %260 = vector.shape_cast %252 : vector<8x8xf32> to vector<8x1x8xf32>
    tpu.vector_store %arg17[%c0_99, %c7_100, %c0_101], %260 {strides = array<i32>} : memref<8x8x16xf32, #tpu.memory_space<vmem>>, vector<8x1x8xf32>,
    %c0_102 = arith.constant 0 : index
    %c0_103 = arith.constant 0 : index
    %c8_104 = arith.constant 8 : index
    %261 = vector.load %arg17[%c0_102, %c0_103, %c8_104] : memref<8x8x16xf32, #tpu.memory_space<vmem>>, vector<8x1x8xf32>
    %262 = vector.shape_cast %261 : vector<8x1x8xf32> to vector<8x8xf32>
    %263 = vector.shape_cast %257 : vector<8x8xf32> to vector<8x1x8xf32>
    tpu.vector_store %arg17[%c0_102, %c0_103, %c8_104], %263 {strides = array<i32>} : memref<8x8x16xf32, #tpu.memory_space<vmem>>, vector<8x1x8xf32>,
    %c0_105 = arith.constant 0 : index
    %c0_106 = arith.constant 0 : index
    %c0_107 = arith.constant 0 : index
    %264 = vector.load %arg17[%c0_105, %c0_106, %c0_107] : memref<8x8x16xf32, #tpu.memory_space<vmem>>, vector<8x8x16xf32>
    %cst_108 = arith.constant 0.000000e+00 : f32
    %265 = vector.broadcast %cst_108 : f32 to vector<8x8x16xf32>
    %266 = arith.cmpf ogt, %264, %265 : vector<8x8x16xf32>
    %cst_109 = arith.constant 0.00999999977 : f32
    %267 = vector.broadcast %cst_109 : f32 to vector<8x8x16xf32>
    %268 = arith.mulf %267, %264 : vector<8x8x16xf32>
    %269 = arith.select %266, %264, %268 : vector<8x8x16xi1>, vector<8x8x16xf32>
    %270 = vector.shape_cast %269 : vector<8x8x16xf32> to vector<64x16xf32>
    %271 = arith.truncf %270 : vector<64x16xf32> to vector<64x16xbf16>
    %c0_110 = arith.constant 0 : index
    %c0_111 = arith.constant 0 : index
    %272 = vector.load %arg12[%c0_110, %c0_111] : memref<16x32xbf16, #tpu.memory_space<vmem>>, vector<16x32xbf16>
    %cst_112 = arith.constant dense<0.000000e+00> : vector<64x32xf32>
    %273 = tpu.matmul %271, %272, %cst_112 {dimension_numbers = #tpu.dot_dimension_numbers<[1], [0], [0], [1], [0, 0, 1, 1], [], []>} : vector<64x16xbf16>, vector<16x32xbf16>, vector<64x32xf32> -> vector<64x32xf32>
    %274 = vector.shape_cast %123 : vector<8x8x32xf32> to vector<64x32xf32>
    %275 = arith.truncf %274 : vector<64x32xf32> to vector<64x32xbf16>
    %c0_113 = arith.constant 0 : index
    %c0_114 = arith.constant 0 : index
    %276 = vector.load %arg13[%c0_113, %c0_114] : memref<32x32xbf16, #tpu.memory_space<vmem>>, vector<32x32xbf16>
    %cst_115 = arith.constant dense<0.000000e+00> : vector<64x32xf32>
    %277 = tpu.matmul %275, %276, %cst_115 {dimension_numbers = #tpu.dot_dimension_numbers<[1], [0], [0], [1], [0, 0, 1, 1], [], []>} : vector<64x32xbf16>, vector<32x32xbf16>, vector<64x32xf32> -> vector<64x32xf32>
    %278 = arith.addf %273, %277 : vector<64x32xf32>
    %c0_116 = arith.constant 0 : index
    %c0_117 = arith.constant 0 : index
    %279 = vector.load %arg14[%c0_116, %c0_117] : memref<1x32xf32, #tpu.memory_space<vmem>>, vector<1x32xf32>
    %280 = vector.broadcast %279 : vector<1x32xf32> to vector<64x32xf32>
    %281 = arith.addf %278, %280 : vector<64x32xf32>
    %cst_118 = arith.constant 0.000000e+00 : f32
    %282 = vector.broadcast %cst_118 : f32 to vector<64x32xf32>
    %283 = arith.cmpf ogt, %281, %282 : vector<64x32xf32>
    %284 = math.exp %281 : vector<64x32xf32>
    %cst_119 = arith.constant 1.000000e+00 : f32
    %285 = vector.broadcast %cst_119 : f32 to vector<64x32xf32>
    %286 = arith.subf %284, %285 : vector<64x32xf32>
    %287 = arith.select %283, %281, %286 : vector<64x32xi1>, vector<64x32xf32>
    %288 = vector.shape_cast %287 : vector<64x32xf32> to vector<8x8x32xf32>
    %289 = vector.extract_strided_slice %288 {offsets = [0, 0, 0], sizes = [8, 1, 32], strides = [1, 1, 1]} : vector<8x8x32xf32> to vector<8x1x32xf32>
    %290 = vector.shape_cast %289 : vector<8x1x32xf32> to vector<8x32xf32>
    %c0_120 = arith.constant 0 : index
    %c0_121 = arith.constant 0 : index
    %c0_122 = arith.constant 0 : index
    %291 = vector.load %arg16[%c0_120, %c0_121, %c0_122] : memref<1x8x256xf32, #tpu.memory_space<vmem>>, vector<1x8x32xf32>
    %292 = vector.shape_cast %291 : vector<1x8x32xf32> to vector<8x32xf32>
    %293 = vector.shape_cast %290 : vector<8x32xf32> to vector<1x8x32xf32>
    tpu.vector_store %arg16[%c0_120, %c0_121, %c0_122], %293 {strides = array<i32>} : memref<1x8x256xf32, #tpu.memory_space<vmem>>, vector<1x8x32xf32>,
    %294 = vector.extract_strided_slice %288 {offsets = [0, 1, 0], sizes = [8, 1, 32], strides = [1, 1, 1]} : vector<8x8x32xf32> to vector<8x1x32xf32>
    %295 = vector.shape_cast %294 : vector<8x1x32xf32> to vector<8x32xf32>
    %c0_123 = arith.constant 0 : index
    %c0_124 = arith.constant 0 : index
    %c32 = arith.constant 32 : index
    %296 = vector.load %arg16[%c0_123, %c0_124, %c32] : memref<1x8x256xf32, #tpu.memory_space<vmem>>, vector<1x8x32xf32>
    %297 = vector.shape_cast %296 : vector<1x8x32xf32> to vector<8x32xf32>
    %298 = vector.shape_cast %295 : vector<8x32xf32> to vector<1x8x32xf32>
    tpu.vector_store %arg16[%c0_123, %c0_124, %c32], %298 {strides = array<i32>} : memref<1x8x256xf32, #tpu.memory_space<vmem>>, vector<1x8x32xf32>,
    %299 = vector.extract_strided_slice %288 {offsets = [0, 2, 0], sizes = [8, 1, 32], strides = [1, 1, 1]} : vector<8x8x32xf32> to vector<8x1x32xf32>
    %300 = vector.shape_cast %299 : vector<8x1x32xf32> to vector<8x32xf32>
    %c0_125 = arith.constant 0 : index
    %c0_126 = arith.constant 0 : index
    %c64 = arith.constant 64 : index
    %301 = vector.load %arg16[%c0_125, %c0_126, %c64] : memref<1x8x256xf32, #tpu.memory_space<vmem>>, vector<1x8x32xf32>
    %302 = vector.shape_cast %301 : vector<1x8x32xf32> to vector<8x32xf32>
    %303 = vector.shape_cast %300 : vector<8x32xf32> to vector<1x8x32xf32>
    tpu.vector_store %arg16[%c0_125, %c0_126, %c64], %303 {strides = array<i32>} : memref<1x8x256xf32, #tpu.memory_space<vmem>>, vector<1x8x32xf32>,
    %304 = vector.extract_strided_slice %288 {offsets = [0, 3, 0], sizes = [8, 1, 32], strides = [1, 1, 1]} : vector<8x8x32xf32> to vector<8x1x32xf32>
    %305 = vector.shape_cast %304 : vector<8x1x32xf32> to vector<8x32xf32>
    %c0_127 = arith.constant 0 : index
    %c0_128 = arith.constant 0 : index
    %c96 = arith.constant 96 : index
    %306 = vector.load %arg16[%c0_127, %c0_128, %c96] : memref<1x8x256xf32, #tpu.memory_space<vmem>>, vector<1x8x32xf32>
    %307 = vector.shape_cast %306 : vector<1x8x32xf32> to vector<8x32xf32>
    %308 = vector.shape_cast %305 : vector<8x32xf32> to vector<1x8x32xf32>
    tpu.vector_store %arg16[%c0_127, %c0_128, %c96], %308 {strides = array<i32>} : memref<1x8x256xf32, #tpu.memory_space<vmem>>, vector<1x8x32xf32>,
    %309 = vector.extract_strided_slice %288 {offsets = [0, 4, 0], sizes = [8, 1, 32], strides = [1, 1, 1]} : vector<8x8x32xf32> to vector<8x1x32xf32>
    %310 = vector.shape_cast %309 : vector<8x1x32xf32> to vector<8x32xf32>
    %c0_129 = arith.constant 0 : index
    %c0_130 = arith.constant 0 : index
    %c128 = arith.constant 128 : index
    %311 = vector.load %arg16[%c0_129, %c0_130, %c128] : memref<1x8x256xf32, #tpu.memory_space<vmem>>, vector<1x8x32xf32>
    %312 = vector.shape_cast %311 : vector<1x8x32xf32> to vector<8x32xf32>
    %313 = vector.shape_cast %310 : vector<8x32xf32> to vector<1x8x32xf32>
    tpu.vector_store %arg16[%c0_129, %c0_130, %c128], %313 {strides = array<i32>} : memref<1x8x256xf32, #tpu.memory_space<vmem>>, vector<1x8x32xf32>,
    %314 = vector.extract_strided_slice %288 {offsets = [0, 5, 0], sizes = [8, 1, 32], strides = [1, 1, 1]} : vector<8x8x32xf32> to vector<8x1x32xf32>
    %315 = vector.shape_cast %314 : vector<8x1x32xf32> to vector<8x32xf32>
    %c0_131 = arith.constant 0 : index
    %c0_132 = arith.constant 0 : index
    %c160 = arith.constant 160 : index
    %316 = vector.load %arg16[%c0_131, %c0_132, %c160] : memref<1x8x256xf32, #tpu.memory_space<vmem>>, vector<1x8x32xf32>
    %317 = vector.shape_cast %316 : vector<1x8x32xf32> to vector<8x32xf32>
    %318 = vector.shape_cast %315 : vector<8x32xf32> to vector<1x8x32xf32>
    tpu.vector_store %arg16[%c0_131, %c0_132, %c160], %318 {strides = array<i32>} : memref<1x8x256xf32, #tpu.memory_space<vmem>>, vector<1x8x32xf32>,
    %319 = vector.extract_strided_slice %288 {offsets = [0, 6, 0], sizes = [8, 1, 32], strides = [1, 1, 1]} : vector<8x8x32xf32> to vector<8x1x32xf32>
    %320 = vector.shape_cast %319 : vector<8x1x32xf32> to vector<8x32xf32>
    %c0_133 = arith.constant 0 : index
    %c0_134 = arith.constant 0 : index
    %c192 = arith.constant 192 : index
    %321 = vector.load %arg16[%c0_133, %c0_134, %c192] : memref<1x8x256xf32, #tpu.memory_space<vmem>>, vector<1x8x32xf32>
    %322 = vector.shape_cast %321 : vector<1x8x32xf32> to vector<8x32xf32>
    %323 = vector.shape_cast %320 : vector<8x32xf32> to vector<1x8x32xf32>
    tpu.vector_store %arg16[%c0_133, %c0_134, %c192], %323 {strides = array<i32>} : memref<1x8x256xf32, #tpu.memory_space<vmem>>, vector<1x8x32xf32>,
    %324 = vector.extract_strided_slice %288 {offsets = [0, 7, 0], sizes = [8, 1, 32], strides = [1, 1, 1]} : vector<8x8x32xf32> to vector<8x1x32xf32>
    %325 = vector.shape_cast %324 : vector<8x1x32xf32> to vector<8x32xf32>
    %c0_135 = arith.constant 0 : index
    %c0_136 = arith.constant 0 : index
    %c224 = arith.constant 224 : index
    %326 = vector.load %arg16[%c0_135, %c0_136, %c224] : memref<1x8x256xf32, #tpu.memory_space<vmem>>, vector<1x8x32xf32>
    %327 = vector.shape_cast %326 : vector<1x8x32xf32> to vector<8x32xf32>
    %328 = vector.shape_cast %325 : vector<8x32xf32> to vector<1x8x32xf32>
    tpu.vector_store %arg16[%c0_135, %c0_136, %c224], %328 {strides = array<i32>} : memref<1x8x256xf32, #tpu.memory_space<vmem>>, vector<1x8x32xf32>,
    return
  }
  func.func @transform_0(%arg0: i32) -> (i32, i32) {
    %c0_i32 = arith.constant 0 : i32
    %c0_i32_0 = arith.constant 0 : i32
    return %arg0, %c0_i32 : i32, i32
  }
  func.func @transform_1(%arg0: i32) -> (i32, i32) {
    %c0_i32 = arith.constant 0 : i32
    %c0_i32_0 = arith.constant 0 : i32
    return %arg0, %c0_i32 : i32, i32
  }
  func.func @transform_2(%arg0: i32) -> (i32, i32, i32) {
    %c0_i32 = arith.constant 0 : i32
    %c0_i32_0 = arith.constant 0 : i32
    %c0_i32_1 = arith.constant 0 : i32
    return %arg0, %c0_i32, %c0_i32_0 : i32, i32, i32
  }
  func.func @transform_3(%arg0: i32) -> (i32, i32) {
    %c0_i32 = arith.constant 0 : i32
    %c0_i32_0 = arith.constant 0 : i32
    %c0_i32_1 = arith.constant 0 : i32
    return %c0_i32, %c0_i32_0 : i32, i32
  }
  func.func @transform_4(%arg0: i32) -> (i32, i32) {
    %c0_i32 = arith.constant 0 : i32
    %c0_i32_0 = arith.constant 0 : i32
    %c0_i32_1 = arith.constant 0 : i32
    return %c0_i32, %c0_i32_0 : i32, i32
  }
  func.func @transform_5(%arg0: i32) -> (i32, i32) {
    %c0_i32 = arith.constant 0 : i32
    %c0_i32_0 = arith.constant 0 : i32
    %c0_i32_1 = arith.constant 0 : i32
    return %c0_i32, %c0_i32_0 : i32, i32
  }
  func.func @transform_6(%arg0: i32) -> (i32, i32) {
    %c0_i32 = arith.constant 0 : i32
    %c0_i32_0 = arith.constant 0 : i32
    %c0_i32_1 = arith.constant 0 : i32
    return %c0_i32, %c0_i32_0 : i32, i32
  }
  func.func @transform_7(%arg0: i32) -> (i32, i32) {
    %c0_i32 = arith.constant 0 : i32
    %c0_i32_0 = arith.constant 0 : i32
    %c0_i32_1 = arith.constant 0 : i32
    return %c0_i32, %c0_i32_0 : i32, i32
  }
  func.func @transform_8(%arg0: i32) -> (i32, i32) {
    %c0_i32 = arith.constant 0 : i32
    %c0_i32_0 = arith.constant 0 : i32
    %c0_i32_1 = arith.constant 0 : i32
    return %c0_i32, %c0_i32_0 : i32, i32
  }
  func.func @transform_9(%arg0: i32) -> (i32, i32) {
    %c0_i32 = arith.constant 0 : i32
    %c0_i32_0 = arith.constant 0 : i32
    %c0_i32_1 = arith.constant 0 : i32
    return %c0_i32, %c0_i32_0 : i32, i32
  }
  func.func @transform_10(%arg0: i32) -> (i32, i32) {
    %c0_i32 = arith.constant 0 : i32
    %c0_i32_0 = arith.constant 0 : i32
    %c0_i32_1 = arith.constant 0 : i32
    return %c0_i32, %c0_i32_0 : i32, i32
  }
  func.func @transform_11(%arg0: i32) -> (i32, i32) {
    %c0_i32 = arith.constant 0 : i32
    %c0_i32_0 = arith.constant 0 : i32
    %c0_i32_1 = arith.constant 0 : i32
    return %c0_i32, %c0_i32_0 : i32, i32
  }
  func.func @transform_12(%arg0: i32) -> (i32, i32) {
    %c0_i32 = arith.constant 0 : i32
    %c0_i32_0 = arith.constant 0 : i32
    %c0_i32_1 = arith.constant 0 : i32
    return %c0_i32, %c0_i32_0 : i32, i32
  }
  func.func @transform_13(%arg0: i32) -> (i32, i32) {
    %c0_i32 = arith.constant 0 : i32
    %c0_i32_0 = arith.constant 0 : i32
    %c0_i32_1 = arith.constant 0 : i32
    return %c0_i32, %c0_i32_0 : i32, i32
  }
  func.func @transform_14(%arg0: i32) -> i32 {
    %c0_i32 = arith.constant 0 : i32
    %c0_i32_0 = arith.constant 0 : i32
    return %c0_i32 : i32
  }
  func.func @transform_15(%arg0: i32) -> (i32, i32, i32) {
    %c0_i32 = arith.constant 0 : i32
    %c0_i32_0 = arith.constant 0 : i32
    %c0_i32_1 = arith.constant 0 : i32
    return %arg0, %c0_i32, %c0_i32_0 : i32, i32, i32
  }
}

</mosaic_0001>

<bundles_post_ra>
// kernel: tpu_custom_call.1
= control target key start
LH: loop header
LB: loop body
LE: loop exit
PB: predicated region body
PF: predicated region fallthrough
CT: control target
= control target key end

     0   :  { %20 = vsyncpa [#allocation4], 0  ;;  %s4771_s0 = inlined_call_operand.vmem [shape: bf16[64,16], index: 0, kind: input, shape index: {}]   ;;  %s4772_s1 = inlined_call_operand.vmem [shape: bf16[64,32], index: 1, kind: input, shape index: {}]   ;;  %s4773_s2 = inlined_call_operand.vmem [shape: f32[8,8,8], index: 2, kind: input, shape index: {}]   ;;  %s4774_s3 = inlined_call_operand.vmem [shape: bf16[16,32], index: 3, kind: input, shape index: {}]   ;;  %s4775_s4 = inlined_call_operand.vmem [shape: bf16[32,24], index: 4, kind: input, shape index: {}]   ;;  %s4776_s5 = inlined_call_operand.vmem [shape: f32[1,8], index: 5, kind: input, shape index: {}]   ;;  %s4777_s6 = inlined_call_operand.hbm [shape: f32[1,32], index: 6, kind: input, shape index: {}]   ;;  %s4778_s7 = inlined_call_operand.hbm [shape: bf16[8,16], index: 7, kind: input, shape index: {}]   ;;  %s4779_s8 = inlined_call_operand.vmem [shape: f32[8,8], index: 8, kind: input, shape index: {}]   ;;  %s4780_s9 = inlined_call_operand.hbm [shape: f32[8,8], index: 9, kind: input, shape index: {}]   ;;  %s4781_s10 = inlined_call_operand.vmem [shape: f32[1,16], index: 10, kind: input, shape index: {}]   ;;  %s4782_s11 = inlined_call_operand.hbm [shape: bf16[16,32], index: 11, kind: input, shape index: {}]   ;;  %s4783_s12 = inlined_call_operand.vmem [shape: bf16[32,32], index: 12, kind: input, shape index: {}]   ;;  %s4784_s13 = inlined_call_operand.vmem [shape: f32[1,32], index: 13, kind: input, shape index: {}]   ;;  %s4785_s14 = inlined_call_operand.vmem [shape: f32[2], index: 14, kind: input, shape index: {}]   ;;  %s4786_s15 = inlined_call_operand.hbm [shape: f32[1,8,256], index: 15, kind: output, shape index: {}]  }
   0x1   :  { %21 = vsyncpa [#allocation8], 0 }
   0x2   :  { %22 = vsyncpa [#allocation11], 0 }
   0x3   :  { %23 = vsyncpa [#allocation6], 0  ;;  %s53_s20 = sshll.u32 %s4778_s7, 4  ;;  %s54_s20 = int_to_ptr.hbm [resolvable:$true] %s53_s20 }
   0x4   :  { %24 = vsyncpa [#allocation5], 0  ;;  %s3437_s21 = smov [#allocation7]   ;;  %s42_s25 = sshll.u32 %s4777_s6, 4  ;;  %s43_s25 = int_to_ptr.hbm [resolvable:$true] %s42_s25 }
   0x5   :  { %s55_s22 = sshll.u32 %s3437_s21, 4  ;;  %s3438_s26 = smov [#allocation3]   ;;  %s56_s22 = int_to_ptr.vmem [resolvable:$true] %s55_s22 }
   0x6   :  { %58 = dma.hbm_to_vmem [thread:$0]  %s54_s20, 64, %s56_s22, [#allocation8]  }
   0x7   :  { %s44_s27 = sshll.u32 %s3438_s26, 4  ;;  %s66_s30 = sshll.u32 %s4780_s9, 4  ;;  %s45_s27 = int_to_ptr.vmem [resolvable:$true] %s44_s27  ;;  %s67_s30 = int_to_ptr.hbm [resolvable:$true] %s66_s30 }
   0x8   :  { %47 = dma.hbm_to_vmem [thread:$0]  %s43_s25, 16, %s45_s27, [#allocation4]  }
   0x9   :  { %s78_s17 = sshll.u32 %s4782_s11, 4  ;;  %s3439_s18 = smov [#allocation9]   ;;  %s79_s17 = int_to_ptr.hbm [resolvable:$true] %s78_s17 }
   0xa   :  { %s68_s19 = sshll.u32 %s3439_s18, 4  ;;  %s3440_s6 = smov [#allocation10]   ;;  %s69_s19 = int_to_ptr.vmem [resolvable:$true] %s68_s19 }
   0xb   :  { %71 = dma.hbm_to_vmem [thread:$0]  %s67_s30, 128, %s69_s19, [#allocation8]  }
   0xc   :  { %s80_s20 = sshll.u32 %s3440_s6, 4  ;;  %s3441_s21 = smov 64   ;;  %s81_s20 = int_to_ptr.vmem [resolvable:$true] %s80_s20 }
   0xd   :  { %s3442_s22 = smov 4   ;;  %s96_s24 = sshll.u32 %s4785_s14, 4  ;;  %s97_s24 = int_to_ptr.vmem [resolvable:$true] %s96_s24 }
   0xe   :  { %86 = dma.hbm_to_vmem [thread:$0]  %s79_s17, 128, %s81_s20, [#allocation11], %s3441_s21, %s3441_s21, %s3442_s22  }
   0xf   :  { %s3443_s25 = smov [#allocation12]  }
  0x10   :  { %99 = dma.vmem_to_smem %s97_s24, 16, %s3443_s25, [#allocation6]  }
  0x11   :  { %3427 = dma.done.wait [#allocation4], 16  }
  0x12   :  { %3428 = vsyncadd [#allocation4], 4294967280 }
  0x13   :  { %3429 = dma.done.wait [#allocation8], 192  }
  0x14   :  { %3430 = vsyncadd [#allocation8], 4294967104 }
  0x15   :  { %3431 = dma.done.wait [#allocation11], 128  }
  0x16   :  { %3432 = vsyncadd [#allocation11], 4294967168 }
  0x17   :  { %3433 = dma.done.wait [#allocation6], 16  }
  0x18   :  { %3434 = vsyncadd [#allocation6], 4294967280 }
  0x19   :  { %120 = sfence }
  0x1a   :  { %v2964_v0 = vld [vmem:[%s4775_s4 + $0x8] sm:$0xff]  ;;  %v3555_v1 = vld [vmem:[%s4776_s5] ss:$0 sm:$0xff]  ;;  %s3444_s30 = smov 16   ;;  %v2962_v4 = vld [vmem:[%s4772_s1 + $0x18] sm:$0xff]  ;;  %vm214_vm0 = vcmask 261120  }
  0x1b   :  { %301 = vmatpush.bf16.msra.mxu1 %v2964_v0  ;;  %2968 = vmatpush.bf16.msra.mxu2 %v2964_v0  ;;  %v2963_v2 = vld [vmem:[%s4775_s4] sm:$0xff]  ;;  %s3445_s5 = smov 8   ;;  %v2960_v5 = vld [vmem:[%s4772_s1 + $0x8] sm:$0xff]  ;;  %v2961_v6 = vld [vmem:[%s4772_s1 + $0x10] sm:$0xff]  ;;  %vm360_vm2 = vcmask 64512   ;;  %s3446_s22 = smov 112  }
  0x1c   :  { %469 = vrot.lane.b32.xlu0 %v3555_v1, %s3444_s30  ;;  %v2959_v3 = vld [vmem:[%s4772_s1] sm:$0xff]  ;;  %s3447_s1 = smov 120   ;;  %s122_s9 = sld [smem:[#allocation12]] }
  0x1d   :  { %s2846_s27 = sld [smem:[#allocation12 + $0x1]]  ;;  %s3451_s16 = smov [#allocation13]  }
  0x1e   :  { %s2831_s17 = sshll.u32 %s3451_s16, 4  ;;  %s2833_s19 = sshll.u32 %s4786_s15, 4  ;;  %s2832_s17 = int_to_ptr.vmem [resolvable:$true] %s2831_s17  ;;  %s2834_s19 = int_to_ptr.hbm [resolvable:$true] %s2833_s19 }
  0x1f   :  { %302 = vmatpush.bf16.msra.mxu1 %v2963_v2  ;;  %2969 = vmatpush.bf16.msra.mxu2 %v2963_v2 }
  0x22   :  { %2895 = vmatmul.msk.bf16.vlgmr.msra.gmra.mxu1 %vm214_vm0, %v2959_v3  ;;  %2898 = vmatmul.msk.bf16.vlgmr.msra.gmra.mxu2 %vm214_vm0, %v2962_v4 }
  0x24   :  { %394 = vrot.lane.b32.xlu0 %v3555_v1, %s3445_s5 }
  0x32   :  { %2896 = vmatmul.msk.bf16.gmra.mxu1 %vm214_vm0, %v2960_v5 }
  0x42   :  { %2897 = vmatmul.msk.bf16.gmra.mxu1 %vm214_vm0, %v2961_v6 }
  0x8e   :  { %v3579_v7 = vpop.permute.xlu0 %469 }
  0x96   :  { %v3585_v17 = vpop.permute.xlu0 %394 }
  0x9f   :  { %v304_v8 = vpop.f32.mrf.mxu1 }
  0xa0   :  { %vm325_vm1 = vcmp.gt.f32.partialorder %v304_v8, 0.0  ;;  %v333_v9 = vmul.f32 0.01, %v304_v8 }
  0xa2   :  { %v341_v10 = vsel %vm325_vm1, %v304_v8, %v333_v9 }
  0xa3   :  { %v472_v11 = vmul.f32 %v3579_v7, %v341_v10  ;;  %v352_v12 = vmul.f32 %v3555_v1, %v341_v10  ;;  %v397_v20 = vmul.f32 %v3585_v17, %v341_v10 }
  0xa5   :  { %v319_v13 = vpop.f32.mrf.mxu2  ;;  %488 = vrot.lane.b32.xlu1 %v472_v11, %s3446_s22  ;;  %v361_v14 = vsel %vm360_vm2, %v352_v12, 0.0 }
  0xa6   :  { %vm331_vm3 = vcmp.gt.f32.partialorder %v319_v13, 0.0  ;;  %v339_v15 = vmul.f32 0.01, %v319_v13  ;;  %362 = vadd.xlane.f32.xlu0 %v361_v14 }
  0xa7   :  { %v306_v16 = vpop.f32.mrf.mxu1 }
  0xa8   :  { %v347_v18 = vsel %vm331_vm3, %v319_v13, %v339_v15  ;;  %v334_v21 = vmul.f32 0.01, %v306_v16  ;;  %vm326_vm4 = vcmp.gt.f32.partialorder %v306_v16, 0.0 }
  0xa9   :  { %v478_v19 = vmul.f32 %v3579_v7, %v347_v18  ;;  %v403_v28 = vmul.f32 %v3585_v17, %v347_v18  ;;  %v358_v36 = vmul.f32 %v3555_v1, %v347_v18 }
  0xaa   :  { %v3591_v23 = vsel %vm326_vm4, %v306_v16, %v334_v21  ;;  %v544_v16 = vlaneseq  ;;  %vm160_vm4 = vcmask 130048  }
  0xab   :  { %500 = vrot.lane.b32.xlu2 %v478_v19, %s3446_s22  ;;  %v473_v26 = vmul.f32 %v3579_v7, %v3591_v23  ;;  %v379_v39 = vsel %vm360_vm2, %v358_v36, 0.0  ;;  %v398_v43 = vmul.f32 %v3585_v17, %v3591_v23  ;;  %v353_v11 = vmul.f32 %v3555_v1, %v3591_v23 }
  0xac   :  { %v3647_v18 = vand.u32 127, %v544_v16 }
  0xad   :  { %413 = vrot.lane.b32.xlu1 %v397_v20, %s3447_s1  ;;  %v364_v15 = vsel %vm360_vm2, %v353_v11, 0.0 }
  0xae   :  { %v2899_v20 = vadd.s32 4294967292, %v3647_v18  ;;  %vm548_vm9 = vcmp.lt.s32.totalorder %v3647_v18, 4 }
  0xaf   :  { %v309_v22 = vpop.f32.mrf.mxu1 }
  0xb0   :  { %vm327_vm5 = vcmp.gt.f32.partialorder %v309_v22, 0.0  ;;  %v335_v24 = vmul.f32 0.01, %v309_v22  ;;  %v3656_v21 = vsel %vm548_vm9, %v3647_v18, %v2899_v20 }
  0xb1   :  { %vm559_vm10 = vcmp.eq.s32.totalorder %v3656_v21, 0  ;;  %vm576_vm11 = vcmp.eq.s32.totalorder %v3656_v21, 1  ;;  %vm593_vm12 = vcmp.eq.s32.totalorder %v3656_v21, 2  ;;  %vm610_vm14 = vcmp.eq.s32.totalorder %v3656_v21, 3 }
  0xb2   :  { %v343_v25 = vsel %vm327_vm5, %v309_v22, %v335_v24  ;;  %v3658_v22 = vstv %s122_s9 }
  0xb3   :  { %v474_v27 = vmul.f32 %v3579_v7, %v343_v25  ;;  %v399_v30 = vmul.f32 %v3585_v17, %v343_v25  ;;  %v354_v34 = vmul.f32 %v3555_v1, %v343_v25 }
  0xb5   :  { %490 = vrot.lane.b32.xlu1 %v473_v26, %s3446_s22  ;;  %492 = vrot.lane.b32.xlu2 %v474_v27, %s3446_s22  ;;  %v367_v35 = vsel %vm360_vm2, %v354_v34, 0.0  ;;  %v321_v27 = vpop.f32.mrf.mxu2 }
  0xb6   :  { %vm332_vm13 = vcmp.gt.f32.partialorder %v321_v27, 0.0 }
  0xb7   :  { %v311_v29 = vpop.f32.mrf.mxu1 }
  0xb8   :  { %v336_v31 = vmul.f32 0.01, %v311_v29  ;;  %vm328_vm6 = vcmp.gt.f32.partialorder %v311_v29, 0.0 }
  0xba   :  { %425 = vrot.lane.b32.xlu0 %v403_v28, %s3447_s1  ;;  %v3602_v32 = vsel %vm328_vm6, %v311_v29, %v336_v31 }
  0xbb   :  { %v400_v33 = vmul.f32 %v3585_v17, %v3602_v32  ;;  %v475_v45 = vmul.f32 %v3579_v7, %v3602_v32 }
  0xbd   :  { %417 = vrot.lane.b32.xlu2 %v399_v30, %s3447_s1  ;;  %v3667_v30 = vshrl.u32 %v544_v16, 7 }
  0xbf   :  { %v314_v37 = vpop.f32.mrf.mxu1  ;;  %vm627_vm15 = vcmp.lt.s32.totalorder %v3667_v30, 4 }
  0xc0   :  { %v337_v38 = vmul.f32 0.01, %v314_v37  ;;  %vm329_vm7 = vcmp.gt.f32.partialorder %v314_v37, 0.0 }
  0xc2   :  { %v345_v40 = vsel %vm329_vm7, %v314_v37, %v337_v38 }
  0xc3   :  { %v356_v41 = vmul.f32 %v3555_v1, %v345_v40  ;;  %v401_v44 = vmul.f32 %v3585_v17, %v345_v40  ;;  %v476_v46 = vmul.f32 %v3579_v7, %v345_v40 }
  0xc5   :  { %419 = vrot.lane.b32.xlu2 %v400_v33, %s3447_s1  ;;  %v373_v42 = vsel %vm360_vm2, %v356_v41, 0.0  ;;  %v340_v33 = vmul.f32 0.01, %v321_v27 }
  0xc7   :  { %v316_v56 = vpop.f32.mrf.mxu1  ;;  %v3682_v41 = vsel %vm332_vm13, %v321_v27, %v340_v33  ;;  %vm808_vm13 = vcmask 1043456  }
  0xc8   :  { %v338_v59 = vmul.f32 0.01, %v316_v56  ;;  %vm330_vm8 = vcmp.gt.f32.partialorder %v316_v56, 0.0  ;;  %v479_v11 = vmul.f32 %v3579_v7, %v3682_v41 }
  0xca   :  { %v3628_v60 = vsel %vm330_vm8, %v316_v56, %v338_v59 }
  0xcb   :  { %v477_v61 = vmul.f32 %v3579_v7, %v3628_v60  ;;  %v402_v29 = vmul.f32 %v3585_v17, %v3628_v60 }
  0xdf   :  { %368 = vadd.xlane.f32.xlu1 %v367_v35  ;;  %v636_v35 = vld [vmem:[%s4773_s2] sm:$0xff] }
  0xe0   :  { %vm644_vm1 = vcmp.gt.f32.partialorder %v636_v35, 0.0 }
  0xe4   :  { %380 = vadd.xlane.f32.xlu0 %v379_v39 }
  0xee   :  { %374 = vadd.xlane.f32.xlu2 %v373_v42 }
  0xf8   :  { %415 = vrot.lane.b32.xlu0 %v398_v43, %s3447_s1  ;;  %421 = vrot.lane.b32.xlu1 %v401_v44, %s3447_s1 }
 0x100   :  { %494 = vrot.lane.b32.xlu0 %v475_v45, %s3446_s22  ;;  %v404_v45 = vmul.f32 %v3585_v17, %v3682_v41 }
 0x105   :  { %v501_v49 = vpop.permute.xlu2 %500 }
 0x106   :  { %v530_v2 = vsel %vm360_vm2, %v501_v49, 0.0 }
 0x108   :  { %496 = vrot.lane.b32.xlu0 %v476_v46, %s3446_s22 }
 0x10f   :  { %v493_v52 = vpop.permute.xlu2 %492 }
 0x110   :  { %v518_v57 = vsel %vm360_vm2, %v493_v52, 0.0 }
 0x117   :  { %v489_v47 = vpop.permute.xlu1 %488  ;;  %v418_v55 = vpop.permute.xlu2 %417 }
 0x118   :  { %v512_v48 = vsel %vm360_vm2, %v489_v47, 0.0  ;;  %v443_v58 = vsel %vm360_vm2, %v418_v55, 0.0  ;;  %v638_v55 = vld [vmem:[%s4773_s2 + $0x10] sm:$0xff] }
 0x119   :  { %513 = vadd.xlane.f32.xlu2 %v512_v48  ;;  %v363_v62 = vpop.xlane.xlu0 %362  ;;  %vm646_vm3 = vcmp.gt.f32.partialorder %v638_v55, 0.0 }
 0x11a   :  { %v386_v38 = vadd.f32 %v3658_v22, %v363_v62 }
 0x11f   :  { %v414_v50 = vpop.permute.xlu1 %413  ;;  %v3644_v14 = vpop.permute.xlu2 %419 }
 0x120   :  { %v437_v51 = vsel %vm360_vm2, %v414_v50, 0.0 }
 0x122   :  { %438 = vadd.xlane.f32.xlu1 %v437_v51 }
 0x127   :  { %v491_v53 = vpop.permute.xlu1 %490 }
 0x128   :  { %v515_v54 = vsel %vm360_vm2, %v491_v53, 0.0 }
 0x129   :  { %516 = vadd.xlane.f32.xlu2 %v515_v54 }
 0x12c   :  { %v426_v63 = vpop.permute.xlu0 %425 }
 0x12d   :  { %v455_v6 = vsel %vm360_vm2, %v426_v63, 0.0 }
 0x131   :  { %519 = vadd.xlane.f32.xlu2 %v518_v57 }
 0x132   :  { %444 = vadd.xlane.f32.xlu0 %v443_v58 }
 0x13b   :  { %498 = vrot.lane.b32.xlu1 %v477_v61, %s3446_s22 }
 0x152   :  { %v3636_v3 = vpop.xlane.xlu1 %368 }
 0x153   :  { %v388_v58 = vadd.f32 %v3658_v22, %v3636_v3 }
 0x157   :  { %v3633_v0 = vpop.xlane.xlu0 %380 }
 0x161   :  { %v3649_v19 = vpop.xlane.xlu2 %374 }
 0x165   :  { %531 = vadd.xlane.f32.xlu1 %v530_v2 }
 0x16a   :  { %v416_v4 = vpop.permute.xlu0 %415  ;;  %v422_v8 = vpop.permute.xlu1 %421 }
 0x16b   :  { %v440_v5 = vsel %vm360_vm2, %v416_v4, 0.0  ;;  %v449_v10 = vsel %vm360_vm2, %v422_v8, 0.0 }
 0x16c   :  { %441 = vadd.xlane.f32.xlu0 %v440_v5 }
 0x16d   :  { %456 = vadd.xlane.f32.xlu1 %v455_v6 }
 0x172   :  { %v495_v9 = vpop.permute.xlu0 %494 }
 0x173   :  { %v521_v49 = vsel %vm360_vm2, %v495_v9, 0.0  ;;  %v357_v9 = vmul.f32 %v3555_v1, %v3628_v60  ;;  %v2954_v60 = vld [vmem:[%s4771_s0] sm:$0xff] }
 0x175   :  { %450 = vadd.xlane.f32.xlu1 %v449_v10  ;;  %v376_v10 = vsel %vm360_vm2, %v357_v9, 0.0 }
 0x17a   :  { %v497_v12 = vpop.permute.xlu0 %496 }
 0x17b   :  { %v524_v13 = vsel %vm360_vm2, %v497_v12, 0.0  ;;  %v446_v12 = vsel %vm360_vm2, %v3644_v14, 0.0  ;;  %v2955_v14 = vld [vmem:[%s4771_s0 + $0x8] sm:$0xff] }
 0x17c   :  { %525 = vadd.xlane.f32.xlu2 %v524_v13  ;;  %v2958_v13 = vld [vmem:[%s4774_s3] sm:$0xff] }
 0x17d   :  { %365 = vadd.xlane.f32.xlu1 %v364_v15  ;;  %180 = vmatpush.bf16.msra.mxu0 %v2958_v13 }
 0x180   :  { %2867 = vmatmul.msk.bf16.vlgmr.msra.gmra.mxu0 %vm160_vm4, %v2954_v60 }
 0x18c   :  { %v514_v23 = vpop.xlane.xlu2 %513 }
 0x18d   :  { %v536_v24 = vadd.f32 %v514_v23, %v3658_v22 }
 0x18f   :  { %v560_v25 = vperm.slane %v536_v24, 0  ;;  %v577_v26 = vperm.slane %v536_v24, 1  ;;  %v594_v34 = vperm.slane %v536_v24, 2  ;;  %v611_v39 = vperm.slane %v536_v24, 3 }
 0x190   :  { %2868 = vmatmul.msk.bf16.gmra.mxu0 %vm160_vm4, %v2955_v14 }
 0x191   :  { %v568_v28 = vsel %vm559_vm10, %v560_v25, 0.0  ;;  %v355_v25 = vmul.f32 %v3555_v1, %v3602_v32 }
 0x192   :  { %v585_v31 = vsel %vm576_vm11, %v577_v26, %v568_v28 }
 0x193   :  { %v602_v37 = vsel %vm593_vm12, %v594_v34, %v585_v31  ;;  %v370_v27 = vsel %vm360_vm2, %v355_v25, 0.0  ;;  %v637_v34 = vld [vmem:[%s4773_s2 + $0x8] sm:$0xff] }
 0x194   :  { %423 = vrot.lane.b32.xlu2 %v402_v29, %s3447_s1  ;;  %v619_v43 = vsel %vm610_vm14, %v611_v39, %v602_v37  ;;  %vm645_vm5 = vcmp.gt.f32.partialorder %v637_v34, 0.0 }
 0x195   :  { %v439_v36 = vpop.xlane.xlu1 %438 }
 0x196   :  { %v461_v40 = vadd.f32 %v439_v36, %v3658_v22 }
 0x198   :  { %v549_v42 = vsel %vm548_vm9, %v386_v38, %v461_v40 }
 0x199   :  { %v628_v44 = vsel %vm627_vm15, %v549_v42, %v619_v43 }
 0x19a   :  { %v3692_v46 = vsel %vm644_vm1, %v628_v44, -9e+15 }
 0x19b   :  { %v660_v47 = vsel %vm360_vm2, %v3692_v46, -inf }
 0x19c   :  { %v517_v48 = vpop.xlane.xlu2 %516  ;;  %427 = vrot.lane.b32.xlu2 %v404_v45, %s3447_s1  ;;  %661 = vmax.xlane.f32.xlu1 %v660_v47 }
 0x19d   :  { %v537_v16 = vadd.f32 %v517_v48, %v3658_v22  ;;  %v640_v48 = vld [vmem:[%s4773_s2 + $0x20] sm:$0xff] }
 0x19e   :  { %vm648_vm6 = vcmp.gt.f32.partialorder %v640_v48, 0.0 }
 0x19f   :  { %v561_v20 = vperm.slane %v537_v16, 0  ;;  %v578_v24 = vperm.slane %v537_v16, 1  ;;  %v595_v29 = vperm.slane %v537_v16, 2  ;;  %v612_v37 = vperm.slane %v537_v16, 3 }
 0x1a1   :  { %v569_v26 = vsel %vm559_vm10, %v561_v20, 0.0 }
 0x1a2   :  { %v586_v28 = vsel %vm576_vm11, %v578_v24, %v569_v26 }
 0x1a3   :  { %v603_v36 = vsel %vm593_vm12, %v595_v29, %v586_v28 }
 0x1a4   :  { %v520_v50 = vpop.xlane.xlu2 %519  ;;  %522 = vadd.xlane.f32.xlu1 %v521_v49  ;;  %v620_v47 = vsel %vm610_vm14, %v612_v37, %v603_v36 }
 0x1a5   :  { %v538_v51 = vadd.f32 %v520_v50, %v3658_v22  ;;  %v445_v52 = vpop.xlane.xlu0 %444 }
 0x1a6   :  { %v463_v17 = vadd.f32 %v445_v52, %v3658_v22  ;;  %v390_v52 = vadd.f32 %v3658_v22, %v3649_v19 }
 0x1a7   :  { %v562_v53 = vperm.slane %v538_v51, 0  ;;  %v579_v54 = vperm.slane %v538_v51, 1  ;;  %v596_v57 = vperm.slane %v538_v51, 2  ;;  %v613_v59 = vperm.slane %v538_v51, 3 }
 0x1a8   :  { %v551_v63 = vsel %vm548_vm9, %v388_v58, %v463_v17 }
 0x1a9   :  { %v570_v56 = vsel %vm559_vm10, %v562_v53, 0.0 }
 0x1aa   :  { %v587_v61 = vsel %vm576_vm11, %v579_v54, %v570_v56 }
 0x1ab   :  { %v604_v62 = vsel %vm593_vm12, %v596_v57, %v587_v61 }
 0x1ac   :  { %v621_v2 = vsel %vm610_vm14, %v613_v59, %v604_v62  ;;  %v2956_v62 = vld [vmem:[%s4771_s0 + $0x10] sm:$0xff] }
 0x1ad   :  { %v499_v4 = vpop.permute.xlu1 %498  ;;  %v630_v5 = vsel %vm627_vm15, %v551_v63, %v621_v2  ;;  %2869 = vmatmul.msk.bf16.gmra.mxu0 %vm160_vm4, %v2956_v62 }
 0x1ae   :  { %v527_v3 = vsel %vm360_vm2, %v499_v4, 0.0  ;;  %v3718_v6 = vsel %vm646_vm3, %v630_v5, -9e+15 }
 0x1af   :  { %528 = vadd.xlane.f32.xlu1 %v527_v3  ;;  %v666_v8 = vsel %vm360_vm2, %v3718_v6, -inf }
 0x1b0   :  { %667 = vmax.xlane.f32.xlu0 %v666_v8 }
 0x1b7   :  { %377 = vadd.xlane.f32.xlu1 %v376_v10  ;;  %v392_v10 = vadd.f32 %v3658_v22, %v3633_v0 }
 0x1c4   :  { %502 = vrot.lane.b32.xlu0 %v479_v11, %s3446_s22 }
 0x1c5   :  { %447 = vadd.xlane.f32.xlu2 %v446_v12 }
 0x1d8   :  { %v532_v15 = vpop.xlane.xlu1 %531 }
 0x1d9   :  { %v542_v40 = vadd.f32 %v532_v15, %v3658_v22 }
 0x1db   :  { %v566_v55 = vperm.slane %v542_v40, 0  ;;  %v583_v63 = vperm.slane %v542_v40, 1  ;;  %v600_v9 = vperm.slane %v542_v40, 2  ;;  %v617_v60 = vperm.slane %v542_v40, 3 }
 0x1dd   :  { %v574_v4 = vsel %vm559_vm10, %v566_v55, 0.0 }
 0x1de   :  { %v591_v8 = vsel %vm576_vm11, %v583_v63, %v574_v4 }
 0x1df   :  { %v442_v31 = vpop.xlane.xlu0 %441  ;;  %v608_v13 = vsel %vm593_vm12, %v600_v9, %v591_v8 }
 0x1e0   :  { %v457_v7 = vpop.xlane.xlu1 %456  ;;  %v462_v38 = vadd.f32 %v442_v31, %v3658_v22  ;;  %v625_v0 = vsel %vm610_vm14, %v617_v60, %v608_v13  ;;  %v359_v31 = vmul.f32 %v3555_v1, %v3682_v41 }
 0x1e1   :  { %v467_v3 = vadd.f32 %v457_v7, %v3658_v22  ;;  %v642_v7 = vld [vmem:[%s4773_s2 + $0x30] sm:$0xff] }
 0x1e2   :  { %vm650_vm7 = vcmp.gt.f32.partialorder %v642_v7, 0.0 }
 0x1e3   :  { %v555_v15 = vsel %vm548_vm9, %v392_v10, %v467_v3 }
 0x1e4   :  { %v634_v20 = vsel %vm627_vm15, %v555_v15, %v625_v0  ;;  %v641_v15 = vld [vmem:[%s4773_s2 + $0x28] sm:$0xff] }
 0x1e5   :  { %v3814_v14 = vsel %vm650_vm7, %v634_v20, -9e+15  ;;  %vm649_vm1 = vcmp.gt.f32.partialorder %v641_v15, 0.0 }
 0x1e6   :  { %v678_v24 = vsel %vm360_vm2, %v3814_v14, -inf }
 0x1e8   :  { %v451_v23 = vpop.xlane.xlu1 %450 }
 0x1e9   :  { %v465_v44 = vadd.f32 %v451_v23, %v3658_v22  ;;  %v2957_v23 = vld [vmem:[%s4771_s0 + $0x18] sm:$0xff] }
 0x1ea   :  { %2870 = vmatmul.msk.bf16.gmra.mxu0 %vm160_vm4, %v2957_v23 }
 0x1eb   :  { %v553_v59 = vsel %vm548_vm9, %v390_v52, %v465_v44 }
 0x1ee   :  { %371 = vadd.xlane.f32.xlu0 %v370_v27 }
 0x1ef   :  { %v526_v33 = vpop.xlane.xlu2 %525 }
 0x1f0   :  { %v540_v32 = vadd.f32 %v526_v33, %v3658_v22  ;;  %v366_v35 = vpop.xlane.xlu1 %365  ;;  %v382_v33 = vsel %vm360_vm2, %v359_v31, 0.0 }
 0x1f1   :  { %v387_v39 = vadd.f32 %v3658_v22, %v366_v35 }
 0x1f2   :  { %v564_v42 = vperm.slane %v540_v32, 0  ;;  %v581_v43 = vperm.slane %v540_v32, 1  ;;  %v598_v50 = vperm.slane %v540_v32, 2  ;;  %v615_v53 = vperm.slane %v540_v32, 3 }
 0x1f3   :  { %v550_v45 = vsel %vm548_vm9, %v387_v39, %v462_v38 }
 0x1f4   :  { %v572_v49 = vsel %vm559_vm10, %v564_v42, 0.0  ;;  %v629_v51 = vsel %vm627_vm15, %v550_v45, %v620_v47  ;;  %v639_v47 = vld [vmem:[%s4773_s2 + $0x18] sm:$0xff] }
 0x1f5   :  { %v3772_v54 = vsel %vm645_vm5, %v629_v51, -9e+15  ;;  %v589_v17 = vsel %vm576_vm11, %v581_v43, %v572_v49  ;;  %vm647_vm8 = vcmp.gt.f32.partialorder %v639_v47, 0.0  ;;  %vm1136_vm5 = vcmask 57344  }
 0x1f6   :  { %v663_v56 = vsel %vm360_vm2, %v3772_v54, -inf  ;;  %v606_v57 = vsel %vm593_vm12, %v598_v50, %v589_v17 }
 0x1f7   :  { %v424_v58 = vpop.permute.xlu2 %423  ;;  %664 = vmax.xlane.f32.xlu2 %v663_v56  ;;  %v623_v19 = vsel %vm610_vm14, %v615_v53, %v606_v57 }
 0x1f8   :  { %v632_v61 = vsel %vm627_vm15, %v553_v59, %v623_v19  ;;  %v452_v16 = vsel %vm360_vm2, %v424_v58, 0.0 }
 0x1f9   :  { %v3789_v2 = vsel %vm648_vm6, %v632_v61, -9e+15  ;;  %vm1163_vm6 = vcmask 1041409  }
 0x1fa   :  { %v672_v5 = vsel %vm360_vm2, %v3789_v2, -inf }
 0x1fb   :  { %673 = vmax.xlane.f32.xlu1 %v672_v5 }
 0x1fd   :  { %v182_v56 = vpop.f32.mrf.mxu0 }
 0x1ff   :  { %v428_v11 = vpop.permute.xlu2 %427 }
 0x200   :  { %v458_v12 = vsel %vm360_vm2, %v428_v11, 0.0  ;;  %v797_v11 = vpack.c.bf16 %v182_v56, %v182_v56 }
 0x201   :  { %459 = vadd.xlane.f32.xlu2 %v458_v12 }
 0x202   :  { %v810_v20 = vsel %vm808_vm13, %v797_v11, 0 }
 0x203   :  { %453 = vadd.xlane.f32.xlu1 %v452_v16  ;;  %819 = vmatpush.bf16.msrb.mxu2 %v810_v20 }
 0x205   :  { %v3860_v3 = vpop.f32.mrf.mxu0 }
 0x206   :  { %v798_v18 = vpack.c.bf16 %v3860_v3, %v3860_v3 }
 0x208   :  { %v829_v30 = vsel %vm808_vm13, %v798_v18, 0 }
 0x209   :  { %838 = vmatpush.bf16.msrb.mxu0 %v829_v30 }
 0x20b   :  { %679 = vmax.xlane.f32.xlu1 %v678_v24 }
 0x20f   :  { %v662_v25 = vpop.xlane.xlu1 %661 }
 0x210   :  { %v684_v26 = vsub.f32 %v3692_v46, %v662_v25 }
 0x212   :  { %v692_v27 = vmul.f32 1.442695, %v684_v26  ;;  %v187_v26 = vpop.f32.mrf.mxu0 }
 0x214   :  { %2989 = vpow2.f32 %v692_v27 }
 0x217   :  { %v523_v39 = vpop.xlane.xlu1 %522 }
 0x218   :  { %v539_v1 = vadd.f32 %v523_v39, %v3658_v22 }
 0x21a   :  { %v3823_v28 = vpop.eup %2989  ;;  %v563_v41 = vperm.slane %v539_v1, 0  ;;  %v580_v40 = vperm.slane %v539_v1, 1  ;;  %v597_v44 = vperm.slane %v539_v1, 2  ;;  %v614_v50 = vperm.slane %v539_v1, 3  ;;  %v3896_v39 = vpop.f32.mrf.mxu0 }
 0x21b   :  { %v708_v29 = vsel %vm360_vm2, %v3823_v28, 0.0 }
 0x21c   :  { %709 = vadd.xlane.f32.xlu0 %v708_v29 }
 0x222   :  { %v529_v42 = vpop.xlane.xlu1 %528 }
 0x223   :  { %v668_v34 = vpop.xlane.xlu0 %667  ;;  %v541_v19 = vadd.f32 %v529_v42, %v3658_v22 }
 0x224   :  { %383 = vadd.xlane.f32.xlu0 %v382_v33  ;;  %v686_v32 = vsub.f32 %v3718_v6, %v668_v34  ;;  %v571_v6 = vsel %vm559_vm10, %v563_v41, 0.0 }
 0x225   :  { %v588_v43 = vsel %vm576_vm11, %v580_v40, %v571_v6  ;;  %v565_v61 = vperm.slane %v541_v19, 0  ;;  %v582_v4 = vperm.slane %v541_v19, 1  ;;  %v599_v13 = vperm.slane %v541_v19, 2 }
 0x226   :  { %v696_v35 = vmul.f32 1.442695, %v686_v32  ;;  %v605_v49 = vsel %vm593_vm12, %v597_v44, %v588_v43  ;;  %v616_v16 = vperm.slane %v541_v19, 3 }
 0x227   :  { %v622_v17 = vsel %vm610_vm14, %v614_v50, %v605_v49  ;;  %v573_v8 = vsel %vm559_vm10, %v565_v61, 0.0 }
 0x228   :  { %2991 = vpow2.f32 %v696_v35  ;;  %v590_v12 = vsel %vm576_vm11, %v582_v4, %v573_v8  ;;  %v643_v8 = vld [vmem:[%s4773_s2 + $0x38] sm:$0xff] }
 0x229   :  { %v607_v7 = vsel %vm593_vm12, %v599_v13, %v590_v12  ;;  %vm651_vm3 = vcmp.gt.f32.partialorder %v643_v8, 0.0 }
 0x22a   :  { %v378_v57 = vpop.xlane.xlu1 %377  ;;  %v624_v25 = vsel %vm610_vm14, %v616_v16, %v607_v7  ;;  %v192_v42 = vpop.f32.mrf.mxu0 }
 0x22e   :  { %v3832_v37 = vpop.eup %2991 }
 0x22f   :  { %v714_v38 = vsel %vm360_vm2, %v3832_v37, 0.0 }
 0x232   :  { %v3911_v50 = vpop.f32.mrf.mxu0 }
 0x236   :  { %v503_v46 = vpop.permute.xlu0 %502 }
 0x237   :  { %v533_v36 = vsel %vm360_vm2, %v503_v46, 0.0  ;;  %v3892_v46 = vld [vmem:[#allocation3] ss:$0 sm:$0xff] }
 0x238   :  { %534 = vadd.xlane.f32.xlu1 %v533_v36  ;;  %v448_v45 = vpop.xlane.xlu2 %447  ;;  %v207_v1 = vmul.f32 %v3892_v46, %v3860_v3  ;;  %v206_v6 = vmul.f32 %v3892_v46, %v182_v56  ;;  %v800_v3 = vpack.c.bf16 %v3896_v39, %v3896_v39 }
 0x239   :  { %v464_v51 = vadd.f32 %v448_v45, %v3658_v22  ;;  %v208_v45 = vmul.f32 %v3892_v46, %v187_v26 }
 0x23a   :  { %v218_v41 = vsel %vm214_vm0, %v207_v1, 0.0  ;;  %v215_v44 = vsel %vm214_vm0, %v206_v6, 0.0  ;;  %v962_v6 = vld [vmem:[#allocation7] sm:$0xf] }
 0x240   :  { %715 = vadd.xlane.f32.xlu1 %v714_v38 }
 0x261   :  { %v372_v48 = vpop.xlane.xlu0 %371 }
 0x262   :  { %v389_v52 = vadd.f32 %v3658_v22, %v372_v48  ;;  %v799_v48 = vpack.c.bf16 %v187_v26, %v187_v26  ;;  %v801_v26 = vpack.c.bf16 %v192_v42, %v192_v42 }
 0x264   :  { %v552_v53 = vsel %vm548_vm9, %v389_v52, %v464_v51  ;;  %v221_v51 = vsel %vm214_vm0, %v208_v45, 0.0 }
 0x265   :  { %v631_v55 = vsel %vm627_vm15, %v552_v53, %v622_v17  ;;  %v848_v53 = vsel %vm808_vm13, %v799_v48, 0  ;;  %v210_v17 = vmul.f32 %v3892_v46, %v192_v42 }
 0x266   :  { %v3854_v58 = vsel %vm647_vm8, %v631_v55, -9e+15  ;;  %857 = vmatpush.bf16.msra.mxu2 %v848_v53 }
 0x267   :  { %v669_v59 = vsel %vm360_vm2, %v3854_v58, -inf  ;;  %v227_v55 = vsel %vm214_vm0, %v210_v17, 0.0  ;;  %v197_v56 = vpop.f32.mrf.mxu0 }
 0x268   :  { %670 = vmax.xlane.f32.xlu0 %v669_v59 }
 0x26a   :  { %v665_v62 = vpop.xlane.xlu2 %664 }
 0x26b   :  { %v685_v9 = vsub.f32 %v3772_v54, %v665_v62  ;;  %v391_v54 = vadd.f32 %v3658_v22, %v378_v57 }
 0x26d   :  { %v694_v60 = vmul.f32 1.442695, %v685_v9 }
 0x26e   :  { %v674_v63 = vpop.xlane.xlu1 %673 }
 0x26f   :  { %v688_v5 = vsub.f32 %v3789_v2, %v674_v63 }
 0x271   :  { %v700_v10 = vmul.f32 1.442695, %v688_v5 }
 0x273   :  { %2993 = vpow2.f32 %v700_v10 }
 0x274   :  { %2995 = vpow2.f32 %v694_v60  ;;  %v460_v62 = vpop.xlane.xlu2 %459 }
 0x275   :  { %v468_v11 = vadd.f32 %v460_v62, %v3658_v22 }
 0x276   :  { %v454_v2 = vpop.xlane.xlu1 %453 }
 0x277   :  { %v466_v0 = vadd.f32 %v454_v2, %v3658_v22 }
 0x279   :  { %v3875_v23 = vpop.eup %2993  ;;  %v554_v24 = vsel %vm548_vm9, %v391_v54, %v466_v0 }
 0x27a   :  { %v720_v27 = vsel %vm360_vm2, %v3875_v23, 0.0  ;;  %v633_v29 = vsel %vm627_vm15, %v554_v24, %v624_v25  ;;  %v3889_v32 = vpop.eup %2995  ;;  %v209_v24 = vmul.f32 %v3892_v46, %v3896_v39 }
 0x27b   :  { %721 = vadd.xlane.f32.xlu2 %v720_v27  ;;  %v3885_v31 = vsel %vm649_vm1, %v633_v29, -9e+15  ;;  %v711_v38 = vsel %vm360_vm2, %v3889_v32, 0.0  ;;  %v867_v27 = vsel %vm808_vm13, %v800_v3, 0  ;;  %vm1169_vm1 = vcmask 1043459  }
 0x27c   :  { %v675_v33 = vsel %vm360_vm2, %v3885_v31, -inf  ;;  %v224_v25 = vsel %vm214_vm0, %v209_v24, 0.0  ;;  %876 = vmatpush.bf16.msra.mxu3 %v867_v27 }
 0x27d   :  { %676 = vmax.xlane.f32.xlu1 %v675_v33 }
 0x27e   :  { %v680_v34 = vpop.xlane.xlu1 %679 }
 0x27f   :  { %v690_v35 = vsub.f32 %v3814_v14, %v680_v34 }
 0x281   :  { %v704_v36 = vmul.f32 1.442695, %v690_v35  ;;  %v211_v35 = vmul.f32 %v3892_v46, %v3911_v50 }
 0x283   :  { %2997 = vpow2.f32 %v704_v36  ;;  %712 = vadd.xlane.f32.xlu2 %v711_v38  ;;  %v803_v36 = vpack.c.bf16 %v197_v56, %v197_v56  ;;  %v802_v38 = vpack.c.bf16 %v3911_v50, %v3911_v50  ;;  %v230_v1 = vsel %vm214_vm0, %v211_v35, 0.0 }
 0x285   :  { %v924_v39 = vsel %vm808_vm13, %v803_v36, 0 }
 0x289   :  { %v3901_v40 = vpop.eup %2997 }
 0x28a   :  { %v726_v14 = vsel %vm360_vm2, %v3901_v40, 0.0 }
 0x28b   :  { %727 = vadd.xlane.f32.xlu0 %v726_v14  ;;  %219 = vadd.xlane.f32.xlu2 %v218_v41 }
 0x28f   :  { %v710_v43 = vpop.xlane.xlu0 %709 }
 0x290   :  { %2999 = vrcp.f32 %v710_v43  ;;  %v3972_v43 = vpop.f32.mrf.mxu0 }
 0x291   :  { %v213_v45 = vmul.f32 %v3892_v46, %v3972_v43 }
 0x293   :  { %216 = vadd.xlane.f32.xlu0 %v215_v44  ;;  %225 = vadd.xlane.f32.xlu2 %v224_v25  ;;  %v980_v44 = vsel %vm808_vm13, %v962_v6, 0 }
 0x294   :  { %989 = vmatpush.bf16.msra.mxu0 %v980_v44 }
 0x296   :  { %v3000_v47 = vpop.eup %2999 }
 0x297   :  { %v3909_v49 = vmul.f32 %v3000_v47, %v3823_v28  ;;  %v212_v28 = vmul.f32 %v3892_v46, %v197_v56  ;;  %v384_v19 = vpop.xlane.xlu0 %383  ;;  %v3987_v46 = vld [vmem:[%s4779_s8] sm:$0xff] }
 0x298   :  { %v393_v5 = vadd.f32 %v3658_v22, %v384_v19 }
 0x299   :  { %v789_v52 = vpack.c.bf16 %v3909_v49, %v3909_v49  ;;  %v233_v57 = vsel %vm214_vm0, %v212_v28, 0.0 }
 0x29a   :  { %v556_v2 = vsel %vm548_vm9, %v393_v5, %v468_v11 }
 0x29b   :  { %2900 = vmatmul.msk.bf16.vlgmr.msrb.gmra.mxu2 %vm360_vm2, %v789_v52  ;;  %222 = vadd.xlane.f32.xlu0 %v221_v51  ;;  %v236_v51 = vsel %vm214_vm0, %v213_v45, 0.0 }
 0x29c   :  { %231 = vadd.xlane.f32.xlu2 %v230_v1 }
 0x2a3   :  { %228 = vadd.xlane.f32.xlu0 %v227_v55 }
 0x2a4   :  { %237 = vadd.xlane.f32.xlu2 %v236_v51 }
 0x2ab   :  { %234 = vadd.xlane.f32.xlu0 %v233_v57  ;;  %v535_v59 = vpop.xlane.xlu1 %534 }
 0x2ac   :  { %v543_v61 = vadd.f32 %v535_v59, %v3658_v22 }
 0x2ae   :  { %v567_v63 = vperm.slane %v543_v61, 0  ;;  %v584_v4 = vperm.slane %v543_v61, 1  ;;  %v601_v10 = vperm.slane %v543_v61, 2  ;;  %v618_v12 = vperm.slane %v543_v61, 3  ;;  %v3996_v61 = vld [vmem:[#allocation9] sm:$0xff] }
 0x2af   :  { %1466 = vmatpush.msrb.mxu1 %v3996_v61 }
 0x2b0   :  { %v575_v9 = vsel %vm559_vm10, %v567_v63, 0.0  ;;  %v4001_v63 = vstv %s2846_s27 }
 0x2b1   :  { %v592_v13 = vsel %vm576_vm11, %v584_v4, %v575_v9  ;;  %1764 = vmatpush.msra.mxu1 %v3987_v46 }
 0x2b2   :  { %v609_v60 = vsel %vm593_vm12, %v601_v10, %v592_v13 }
 0x2b3   :  { %v716_v15 = vpop.xlane.xlu1 %715  ;;  %v626_v7 = vsel %vm610_vm14, %v618_v12, %v609_v60 }
 0x2b4   :  { %3001 = vrcp.f32 %v716_v15  ;;  %v635_v16 = vsel %vm627_vm15, %v556_v2, %v626_v7  ;;  %v3448_v2 = vmov 0.0  }
 0x2b5   :  { %v3940_v22 = vsel %vm651_vm3, %v635_v16, -9e+15  ;;  %vm1145_vm3 = vcmask 130119  }
 0x2b6   :  { %v681_v54 = vsel %vm360_vm2, %v3940_v22, -inf }
 0x2b7   :  { %682 = vmax.xlane.f32.xlu1 %v681_v54 }
 0x2ba   :  { %v3002_v0 = vpop.eup %3001 }
 0x2bb   :  { %v3945_v20 = vmul.f32 %v3002_v0, %v3832_v37  ;;  %v886_v37 = vsel %vm808_vm13, %v801_v26, 0 }
 0x2bc   :  { %895 = vmatpush.bf16.msrb.mxu2 %v886_v37 }
 0x2bd   :  { %v791_v21 = vpack.c.bf16 %v3945_v20, %v3945_v20 }
 0x2bf   :  { %2902 = vmatmul.msk.bf16.vlgmr.msra.gmra.mxu2 %vm360_vm2, %v791_v21 }
 0x2c0   :  { %933 = vmatpush.bf16.msra.mxu2 %v924_v39 }
 0x2db   :  { %v671_v29 = vpop.xlane.xlu0 %670 }
 0x2dc   :  { %v687_v33 = vsub.f32 %v3854_v58, %v671_v29  ;;  %v905_v58 = vsel %vm808_vm13, %v802_v38, 0 }
 0x2dd   :  { %914 = vmatpush.bf16.msrb.mxu3 %v905_v58 }
 0x2de   :  { %v698_v34 = vmul.f32 1.442695, %v687_v33 }
 0x2e0   :  { %3003 = vpow2.f32 %v698_v34 }
 0x2e6   :  { %v3966_v41 = vpop.eup %3003 }
 0x2e7   :  { %v717_v14 = vsel %vm360_vm2, %v3966_v41, 0.0 }
 0x2e8   :  { %718 = vadd.xlane.f32.xlu1 %v717_v14 }
 0x2ee   :  { %v722_v42 = vpop.xlane.xlu2 %721 }
 0x2ef   :  { %3005 = vrcp.f32 %v722_v42 }
 0x2f0   :  { %v677_v47 = vpop.xlane.xlu1 %676 }
 0x2f1   :  { %v689_v48 = vsub.f32 %v3885_v31, %v677_v47 }
 0x2f3   :  { %v702_v50 = vmul.f32 1.442695, %v689_v48 }
 0x2f5   :  { %v3006_v52 = vpop.eup %3005  ;;  %3007 = vpow2.f32 %v702_v50 }
 0x2f6   :  { %v3980_v53 = vmul.f32 %v3006_v52, %v3875_v23  ;;  %v713_v17 = vpop.xlane.xlu2 %712 }
 0x2f7   :  { %3009 = vrcp.f32 %v713_v17 }
 0x2f8   :  { %v793_v55 = vpack.c.bf16 %v3980_v53, %v3980_v53 }
 0x2fa   :  { %2904 = vmatmul.msk.bf16.vlgmr.msrb.gmra.mxu2 %vm360_vm2, %v793_v55 }
 0x2fb   :  { %v3990_v31 = vpop.eup %3007  ;;  %1031 = vmatpush.msrb.mxu2 %v3987_v46 }
 0x2fc   :  { %v723_v23 = vsel %vm360_vm2, %v3990_v31, 0.0 }
 0x2fd   :  { %v3010_v56 = vpop.eup %3009  ;;  %724 = vadd.xlane.f32.xlu1 %v723_v23 }
 0x2fe   :  { %v728_v28 = vpop.xlane.xlu0 %727  ;;  %v741_v57 = vmul.f32 %v3010_v56, %v3889_v32  ;;  %v220_v19 = vpop.xlane.xlu2 %219 }
 0x2ff   :  { %3011 = vrcp.f32 %v728_v28 }
 0x300   :  { %v790_v59 = vpack.c.bf16 %v741_v57, %v741_v57  ;;  %v749_v62 = vmul.f32 %v741_v57, %v220_v19 }
 0x302   :  { %2901 = vmatmul.msk.bf16.vlgmr.msrb.gmra.mxu0 %vm360_vm2, %v790_v59  ;;  %v758_v32 = vadd.f32 %v4001_v63, %v749_v62 }
 0x304   :  { %v774_v12 = vmul.f32 0.01, %v758_v32  ;;  %vm766_vm10 = vcmp.gt.f32.partialorder %v758_v32, 0.0 }
 0x305   :  { %v3012_v4 = vpop.eup %3011 }
 0x306   :  { %v4004_v5 = vmul.f32 %v3012_v4, %v3901_v40  ;;  %v217_v8 = vpop.xlane.xlu0 %216  ;;  %v782_v60 = vsel %vm766_vm10, %v758_v32, %v774_v12  ;;  %v226_v27 = vpop.xlane.xlu2 %225  ;;  %v4050_v4 = vld [vmem:[%s4781_s10] ss:$0 sm:$0xff]  ;;  %vm1175_vm10 = vcmask 1045509  }
 0x307   :  { %v748_v9 = vmul.f32 %v3909_v49, %v217_v8 }
 0x308   :  { %v795_v10 = vpack.c.bf16 %v4004_v5, %v4004_v5 }
 0x309   :  { %v757_v11 = vadd.f32 %v4001_v63, %v748_v9 }
 0x30a   :  { %2906 = vmatmul.msk.bf16.vlgmr.msra.gmra.mxu2 %vm360_vm2, %v795_v10 }
 0x30b   :  { %vm765_vm9 = vcmp.gt.f32.partialorder %v757_v11, 0.0  ;;  %v773_v13 = vmul.f32 0.01, %v757_v11  ;;  %1083 = vmatpush.msra.mxu2 %v3996_v61 }
 0x30d   :  { %v781_v40 = vsel %vm765_vm9, %v757_v11, %v773_v13  ;;  %vm1172_vm9 = vcmask 1044484  }
 0x30e   :  { %v958_v15 = vpack.c.bf16 %v782_v60, %v781_v40  ;;  %v223_v26 = vpop.xlane.xlu0 %222 }
 0x30f   :  { %v750_v37 = vmul.f32 %v3945_v20, %v223_v26  ;;  %v232_v44 = vpop.xlane.xlu2 %231 }
 0x311   :  { %v759_v29 = vadd.f32 %v4001_v63, %v750_v37 }
 0x312   :  { %2908 = vmatmul.msk.bf16.vlgmr.msra.gmra.mxu0 %vm360_vm2, %v958_v15 }
 0x313   :  { %v775_v36 = vmul.f32 0.01, %v759_v29  ;;  %vm767_vm11 = vcmp.gt.f32.partialorder %v759_v29, 0.0 }
 0x315   :  { %v783_v39 = vsel %vm767_vm11, %v759_v29, %v775_v36  ;;  %vm1178_vm11 = vcmask 1046534  }
 0x31a   :  { %1032 = vmatmul.f32.vlgmr.msrb.gmra.mxu2 %v3448_v2 }
 0x31b   :  { %1200 = vmatpush.msrb.mxu2 %v3987_v46 }
 0x31e   :  { %v4015_v49 = vpop.f32.mrf.mxu2 }
 0x322   :  { %1084 = vmatmul.f32.vlgmr.msra.gmra.mxu2 %v3448_v2 }
 0x323   :  { %1278 = vmatpush.msra.mxu2 %v3996_v61 }
 0x326   :  { %v823_v7 = vpop.f32.mrf.mxu2 }
 0x32a   :  { %v683_v16 = vpop.xlane.xlu1 %682 }
 0x32b   :  { %v691_v54 = vsub.f32 %v3940_v22, %v683_v16  ;;  %v804_v22 = vpack.c.bf16 %v3972_v43, %v3972_v43 }
 0x32d   :  { %v706_v0 = vmul.f32 1.442695, %v691_v54  ;;  %v943_v1 = vsel %vm808_vm13, %v804_v22, 0  ;;  %vm1166_vm13 = vcmask 1042434  }
 0x32f   :  { %3013 = vpow2.f32 %v706_v0 }
 0x335   :  { %v4019_v18 = vpop.eup %3013 }
 0x336   :  { %v729_v21 = vsel %vm360_vm2, %v4019_v18, 0.0 }
 0x337   :  { %730 = vadd.xlane.f32.xlu1 %v729_v21 }
 0x342   :  { %v4023_v30 = vpop.f32.mrf.mxu2 }
 0x34a   :  { %v861_v24 = vpop.f32.mrf.mxu2 }
 0x35b   :  { %v719_v25 = vpop.xlane.xlu1 %718 }
 0x35c   :  { %3015 = vrcp.f32 %v719_v25 }
 0x362   :  { %v3016_v3 = vpop.eup %3015 }
 0x363   :  { %v743_v33 = vmul.f32 %v3016_v3, %v3966_v41  ;;  %v229_v41 = vpop.xlane.xlu0 %228 }
 0x364   :  { %v752_v42 = vmul.f32 %v3980_v53, %v229_v41 }
 0x365   :  { %v751_v34 = vmul.f32 %v743_v33, %v226_v27  ;;  %v792_v35 = vpack.c.bf16 %v743_v33, %v743_v33  ;;  %v238_v33 = vpop.xlane.xlu2 %237 }
 0x366   :  { %v761_v45 = vadd.f32 %v4001_v63, %v752_v42 }
 0x367   :  { %v760_v38 = vadd.f32 %v4001_v63, %v751_v34  ;;  %2903 = vmatmul.msk.bf16.vlgmr.msra.gmra.mxu3 %vm360_vm2, %v792_v35 }
 0x368   :  { %952 = vmatpush.bf16.msra.mxu3 %v943_v1  ;;  %v777_v51 = vmul.f32 0.01, %v761_v45  ;;  %vm769_vm14 = vcmp.gt.f32.partialorder %v761_v45, 0.0 }
 0x369   :  { %vm768_vm12 = vcmp.gt.f32.partialorder %v760_v38, 0.0  ;;  %v776_v20 = vmul.f32 0.01, %v760_v38 }
 0x36a   :  { %v785_v23 = vsel %vm769_vm14, %v761_v45, %v777_v51  ;;  %vm1331_vm14 = vcmask 58369  }
 0x36b   :  { %v784_v14 = vsel %vm768_vm12, %v760_v38, %v776_v20  ;;  %v235_v21 = vpop.xlane.xlu0 %234  ;;  %vm1181_vm12 = vcmask 1047559  }
 0x36c   :  { %v959_v58 = vpack.c.bf16 %v784_v14, %v783_v39  ;;  %v754_v3 = vmul.f32 %v4004_v5, %v235_v21 }
 0x36e   :  { %2909 = vmatmul.msk.bf16.gmra.mxu0 %vm360_vm2, %v959_v58  ;;  %v763_v22 = vadd.f32 %v4001_v63, %v754_v3 }
 0x370   :  { %v725_v6 = vpop.xlane.xlu1 %724  ;;  %v779_v38 = vmul.f32 0.01, %v763_v22  ;;  %vm771_vm7 = vcmp.gt.f32.partialorder %v763_v22, 0.0 }
 0x371   :  { %3017 = vrcp.f32 %v725_v6 }
 0x372   :  { %v787_v20 = vsel %vm771_vm7, %v763_v22, %v779_v38  ;;  %vm1707_vm7 = vcmask 60419  }
 0x377   :  { %v3018_v43 = vpop.eup %3017 }
 0x378   :  { %v745_v47 = vmul.f32 %v3018_v43, %v3990_v31 }
 0x37a   :  { %v753_v48 = vmul.f32 %v745_v47, %v232_v44  ;;  %v794_v50 = vpack.c.bf16 %v745_v47, %v745_v47 }
 0x37c   :  { %v762_v52 = vadd.f32 %v4001_v63, %v753_v48  ;;  %2905 = vmatmul.msk.bf16.vlgmr.msrb.gmra.mxu3 %vm360_vm2, %v794_v50 }
 0x37d   :  { %v4039_v17 = vpop.f32.mrf.mxu2  ;;  %1388 = vmatpush.msrb.mxu3 %v3987_v46 }
 0x37e   :  { %vm770_vm15 = vcmp.gt.f32.partialorder %v762_v52, 0.0  ;;  %v778_v53 = vmul.f32 0.01, %v762_v52 }
 0x37f   :  { %v4042_v55 = vpop.f32.mrf.mxu0 }
 0x380   :  { %v786_v56 = vsel %vm770_vm15, %v762_v52, %v778_v53  ;;  %vm1519_vm15 = vcmask 59394  }
 0x381   :  { %v960_v28 = vpack.c.bf16 %v786_v56, %v785_v23 }
 0x383   :  { %2910 = vmatmul.msk.bf16.gmra.mxu0 %vm360_vm2, %v960_v28 }
 0x385   :  { %v899_v31 = vpop.f32.mrf.mxu2 }
 0x387   :  { %v842_v57 = vpop.f32.mrf.mxu0 }
 0x38d   :  { %v4045_v59 = vpop.f32.mrf.mxu2 }
 0x38f   :  { %v991_v19 = vpop.f32.mrf.mxu0 }
 0x390   :  { %v4053_v32 = vadd.f32 %v4050_v4, %v991_v19 }
 0x395   :  { %v937_v62 = vpop.f32.mrf.mxu2 }
 0x397   :  { %v993_v8 = vpop.f32.mrf.mxu0 }
 0x398   :  { %v4058_v10 = vadd.f32 %v4050_v4, %v993_v8 }
 0x39d   :  { %v4055_v9 = vpop.f32.mrf.mxu2 }
 0x39e   :  { %v1037_v11 = vrot.slane %v4055_v9, 1  ;;  %v1052_v12 = vadd.f32 %v4055_v9, %v4053_v32  ;;  %v1038_v6 = vrot.slane %v4055_v9, 2  ;;  %v1039_v44 = vrot.slane %v4055_v9, 3 }
 0x39f   :  { %v1040_v28 = vrot.slane %v4055_v9, 4 }
 0x3a0   :  { %v1053_v13 = vadd.f32 %v1037_v11, %v4058_v10  ;;  %3019 = vtanh.f32 %v1052_v12 }
 0x3a2   :  { %3021 = vtanh.f32 %v1053_v13  ;;  %v1041_v13 = vrot.slane %v4055_v9, 5 }
 0x3a5   :  { %v1085_v40 = vpop.f32.mrf.mxu2 }
 0x3a6   :  { %v1091_v60 = vrot.slane %v1085_v40, 3  ;;  %v1090_v15 = vrot.slane %v1085_v40, 2  ;;  %v1089_v2 = vrot.slane %v1085_v40, 1  ;;  %v3020_v7 = vpop.eup %3019  ;;  %v1094_v25 = vrot.slane %v1085_v40, 6 }
 0x3a7   :  { %1137 = vst.msk [vmem:[#allocation2] sm:$0x1] %vm1136_vm5, %v3020_v7  ;;  %v1092_v26 = vrot.slane %v1085_v40, 4  ;;  %v1093_v37 = vrot.slane %v1085_v40, 5  ;;  %v1095_v36 = vrot.slane %v1085_v40, 7 }
 0x3a8   :  { %v3022_v16 = vpop.eup %3021  ;;  %1100 = vrot.lane.b32.xlu2 %v1091_v60, %s3445_s5  ;;  %1098 = vrot.lane.b32.xlu0 %v1090_v15, %s3445_s5 }
 0x3a9   :  { %1096 = vrot.lane.b32.xlu1 %v1089_v2, %s3445_s5  ;;  %v1162_v54 = vrot.slane %v3022_v16, 7  ;;  %1138 = vst.msk [vmem:[#allocation2 + $0x8] sm:$0x1] %vm1136_vm5, %v3022_v16 }
 0x3aa   :  { %v731_v0 = vpop.xlane.xlu1 %730 }
 0x3ab   :  { %3023 = vrcp.f32 %v731_v0  ;;  %v1164_v24 = vsel %vm1163_vm6, %v1162_v54, %v3020_v7 }
 0x3b0   :  { %1106 = vrot.lane.b32.xlu2 %v1094_v25, %s3445_s5  ;;  %1102 = vrot.lane.b32.xlu0 %v1092_v26, %s3445_s5 }
 0x3b1   :  { %v3024_v27 = vpop.eup %3023  ;;  %1104 = vrot.lane.b32.xlu1 %v1093_v37, %s3445_s5 }
 0x3b2   :  { %v747_v29 = vmul.f32 %v3024_v27, %v4019_v18 }
 0x3b4   :  { %v755_v34 = vmul.f32 %v747_v29, %v238_v33  ;;  %v796_v35 = vpack.c.bf16 %v747_v29, %v747_v29 }
 0x3b6   :  { %2907 = vmatmul.msk.bf16.vlgmr.msra.gmra.mxu3 %vm360_vm2, %v796_v35  ;;  %v764_v5 = vadd.f32 %v4001_v63, %v755_v34 }
 0x3b7   :  { %1654 = vmatpush.msra.mxu3 %v3996_v61 }
 0x3b8   :  { %vm772_vm8 = vcmp.gt.f32.partialorder %v764_v5, 0.0  ;;  %v780_v1 = vmul.f32 0.01, %v764_v5  ;;  %1108 = vrot.lane.b32.xlu0 %v1095_v36, %s3445_s5 }
 0x3b9   :  { %1110 = vrot.lane.b32.xlu1 %v1085_v40, %s3445_s5 }
 0x3ba   :  { %v788_v18 = vsel %vm772_vm8, %v764_v5, %v780_v1  ;;  %vm1528_vm8 = vcmask 128069  }
 0x3bb   :  { %v961_v39 = vpack.c.bf16 %v788_v18, %v787_v20 }
 0x3bd   :  { %2911 = vmatmul.msk.bf16.gmra.mxu0 %vm360_vm2, %v961_v39  ;;  %v1042_v39 = vrot.slane %v4055_v9, 6 }
 0x3ea   :  { %v4082_v14 = vpop.f32.mrf.mxu3 }
 0x3eb   :  { %v996_v58 = vpop.f32.mrf.mxu0 }
 0x3ec   :  { %v4086_v63 = vadd.f32 %v4050_v4, %v996_v58 }
 0x3ee   :  { %v1054_v41 = vadd.f32 %v1038_v6, %v4086_v63 }
 0x3f0   :  { %3025 = vtanh.f32 %v1054_v41 }
 0x3f2   :  { %v880_v42 = vpop.f32.mrf.mxu3 }
 0x3f3   :  { %v998_v43 = vpop.f32.mrf.mxu0 }
 0x3f4   :  { %v4091_v45 = vadd.f32 %v4050_v4, %v998_v43 }
 0x3f6   :  { %v3026_v47 = vpop.eup %3025  ;;  %v1055_v48 = vadd.f32 %v1039_v44, %v4091_v45 }
 0x3f7   :  { %v1165_v50 = vrot.slane %v3026_v47, 6  ;;  %1139 = vst.msk [vmem:[#allocation2 + $0x10] sm:$0x1] %vm1136_vm5, %v3026_v47 }
 0x3f8   :  { %3027 = vtanh.f32 %v1055_v48 }
 0x3f9   :  { %v1167_v51 = vsel %vm1166_vm13, %v1165_v50, %v1164_v24 }
 0x3fe   :  { %v3028_v52 = vpop.eup %3027 }
 0x3ff   :  { %v4096_v53 = vpop.f32.mrf.mxu3  ;;  %v1168_v23 = vrot.slane %v3028_v52, 5  ;;  %1140 = vst.msk [vmem:[#allocation2 + $0x18] sm:$0x1] %vm1136_vm5, %v3028_v52 }
 0x400   :  { %v1001_v56 = vpop.f32.mrf.mxu0 }
 0x401   :  { %v4101_v31 = vadd.f32 %v4050_v4, %v1001_v56  ;;  %v1170_v57 = vsel %vm1169_vm1, %v1168_v23, %v1167_v51  ;;  %v1043_v56 = vrot.slane %v4055_v9, 7 }
 0x402   :  { %v1101_v19 = vpop.permute.xlu2 %1100 }
 0x403   :  { %v1122_v62 = vadd.f32 %v1101_v19, %v4086_v63  ;;  %v1056_v8 = vadd.f32 %v1040_v28, %v4101_v31 }
 0x405   :  { %3029 = vtanh.f32 %v1122_v62 }
 0x406   :  { %3031 = vtanh.f32 %v1056_v8 }
 0x407   :  { %v918_v11 = vpop.f32.mrf.mxu3 }
 0x408   :  { %v1003_v12 = vpop.f32.mrf.mxu0 }
 0x409   :  { %v4108_v40 = vadd.f32 %v4050_v4, %v1003_v12 }
 0x40a   :  { %v1107_v60 = vpop.permute.xlu2 %1106 }
 0x40b   :  { %v3030_v15 = vpop.eup %3029  ;;  %v1125_v2 = vadd.f32 %v1107_v60, %v4108_v40  ;;  %v1057_v7 = vadd.f32 %v1041_v13, %v4108_v40 }
 0x40c   :  { %v3032_v16 = vpop.eup %3031  ;;  %1148 = vst.msk [vmem:[#allocation2 + $0x10] sm:$0x80] %vm1145_vm3, %v3030_v15  ;;  %v1248_v52 = vrot.slane %v3030_v15, 5 }
 0x40d   :  { %3033 = vtanh.f32 %v1125_v2  ;;  %v1171_v54 = vrot.slane %v3032_v16, 4  ;;  %1141 = vst.msk [vmem:[#allocation2 + $0x20] sm:$0x1] %vm1136_vm5, %v3032_v16 }
 0x40e   :  { %3035 = vtanh.f32 %v1057_v7 }
 0x40f   :  { %v1173_v0 = vsel %vm1172_vm9, %v1171_v54, %v1170_v57 }
 0x413   :  { %v4115_v21 = vpop.eup %3033 }
 0x414   :  { %v3036_v24 = vpop.eup %3035  ;;  %1151 = vst.msk [vmem:[#allocation2 + $0x28] sm:$0x80] %vm1145_vm3, %v4115_v21  ;;  %v1254_v2 = vrot.slane %v4115_v21, 2 }
 0x415   :  { %v1174_v25 = vrot.slane %v3036_v24, 3  ;;  %1142 = vst.msk [vmem:[#allocation2 + $0x28] sm:$0x1] %vm1136_vm5, %v3036_v24 }
 0x417   :  { %v1176_v26 = vsel %vm1175_vm10, %v1174_v25, %v1173_v0 }
 0x41a   :  { %v1099_v37 = vpop.permute.xlu0 %1098 }
 0x41b   :  { %v1121_v3 = vadd.f32 %v1099_v37, %v4058_v10  ;;  %v1097_v27 = vpop.permute.xlu1 %1096 }
 0x41c   :  { %v1120_v22 = vadd.f32 %v1097_v27, %v4053_v32 }
 0x41d   :  { %3037 = vtanh.f32 %v1121_v3 }
 0x41e   :  { %3039 = vtanh.f32 %v1120_v22 }
 0x422   :  { %v1103_v29 = vpop.permute.xlu0 %1102 }
 0x423   :  { %v3038_v33 = vpop.eup %3037  ;;  %v1123_v34 = vadd.f32 %v1103_v29, %v4091_v45  ;;  %v1105_v35 = vpop.permute.xlu1 %1104 }
 0x424   :  { %v3040_v36 = vpop.eup %3039  ;;  %1147 = vst.msk [vmem:[#allocation2 + $0x8] sm:$0x80] %vm1145_vm3, %v3038_v33  ;;  %v1124_v38 = vadd.f32 %v1105_v35, %v4101_v31  ;;  %v1246_v43 = vrot.slane %v3038_v33, 6 }
 0x425   :  { %1146 = vst.msk [vmem:[#allocation2] sm:$0x80] %vm1145_vm3, %v3040_v36  ;;  %3041 = vtanh.f32 %v1123_v34  ;;  %v1245_v44 = vrot.slane %v3040_v36, 7 }
 0x426   :  { %3043 = vtanh.f32 %v1124_v38 }
 0x427   :  { %v1247_v48 = vsel %vm1163_vm6, %v1246_v43, %v1245_v44 }
 0x428   :  { %v1249_v8 = vsel %vm1166_vm13, %v1248_v52, %v1247_v48 }
 0x42a   :  { %v1109_v6 = vpop.permute.xlu0 %1108 }
 0x42b   :  { %v3042_v5 = vpop.eup %3041  ;;  %v1111_v28 = vpop.permute.xlu1 %1110 }
 0x42c   :  { %v3044_v1 = vpop.eup %3043  ;;  %1149 = vst.msk [vmem:[#allocation2 + $0x18] sm:$0x80] %vm1145_vm3, %v3042_v5  ;;  %v1250_v50 = vrot.slane %v3042_v5, 4 }
 0x42d   :  { %1150 = vst.msk [vmem:[#allocation2 + $0x20] sm:$0x80] %vm1145_vm3, %v3044_v1  ;;  %v1252_v19 = vrot.slane %v3044_v1, 3 }
 0x42e   :  { %v1251_v13 = vsel %vm1169_vm1, %v1250_v50, %v1249_v8 }
 0x42f   :  { %v1253_v9 = vsel %vm1172_vm9, %v1252_v19, %v1251_v13 }
 0x430   :  { %v1255_v7 = vsel %vm1175_vm10, %v1254_v2, %v1253_v9 }
 0x439   :  { %v4129_v20 = vpop.f32.mrf.mxu3 }
 0x43a   :  { %v1006_v18 = vpop.f32.mrf.mxu0 }
 0x43b   :  { %v4133_v58 = vadd.f32 %v4050_v4, %v1006_v18 }
 0x43d   :  { %v1126_v41 = vadd.f32 %v1109_v6, %v4133_v58  ;;  %v1058_v42 = vadd.f32 %v1042_v39, %v4133_v58 }
 0x43f   :  { %3045 = vtanh.f32 %v1126_v41 }
 0x440   :  { %3047 = vtanh.f32 %v1058_v42 }
 0x441   :  { %v956_v47 = vpop.f32.mrf.mxu3 }
 0x442   :  { %v1008_v51 = vpop.f32.mrf.mxu0 }
 0x443   :  { %v4139_v23 = vadd.f32 %v4050_v4, %v1008_v51 }
 0x445   :  { %v3046_v57 = vpop.eup %3045  ;;  %v1127_v62 = vadd.f32 %v1111_v28, %v4139_v23  ;;  %v1059_v11 = vadd.f32 %v1043_v56, %v4139_v23 }
 0x446   :  { %v3048_v12 = vpop.eup %3047  ;;  %1152 = vst.msk [vmem:[#allocation2 + $0x30] sm:$0x80] %vm1145_vm3, %v3046_v57  ;;  %v1256_v60 = vrot.slane %v3046_v57, 1 }
 0x447   :  { %3049 = vtanh.f32 %v1127_v62  ;;  %v1177_v4 = vrot.slane %v3048_v12, 2  ;;  %1143 = vst.msk [vmem:[#allocation2 + $0x30] sm:$0x1] %vm1136_vm5, %v3048_v12 }
 0x448   :  { %3051 = vtanh.f32 %v1059_v11  ;;  %v1257_v54 = vsel %vm1178_vm11, %v1256_v60, %v1255_v7 }
 0x449   :  { %v1179_v15 = vsel %vm1178_vm11, %v1177_v4, %v1176_v26 }
 0x44d   :  { %v3050_v16 = vpop.eup %3049 }
 0x44e   :  { %v3052_v0 = vpop.eup %3051  ;;  %v1258_v24 = vsel %vm1181_vm12, %v3050_v16, %v1257_v54  ;;  %1153 = vst.msk [vmem:[#allocation2 + $0x38] sm:$0x80] %vm1145_vm3, %v3050_v16  ;;  %vm2083_vm3 = vcmask 62469  }
 0x44f   :  { %1259 = vrot.lane.b32.xlu2 %v1258_v24, %s3447_s1  ;;  %v1180_v25 = vrot.slane %v3052_v0, 1  ;;  %1144 = vst.msk [vmem:[#allocation2 + $0x38] sm:$0x1] %vm1136_vm5, %v3052_v0  ;;  %vm1340_vm5 = vcmask 129094  }
 0x451   :  { %v1182_v26 = vsel %vm1181_vm12, %v1180_v25, %v1179_v15 }
 0x452   :  { %2912 = vmatmul.msk.f32.vlgmr.msrb.gmra.mxu2 %vm360_vm2, %v1182_v26 }
 0x453   :  { %1576 = vmatpush.msrb.mxu2 %v3987_v46 }
 0x4a9   :  { %v1260_v21 = vpop.permute.xlu2 %1259 }
 0x4aa   :  { %2913 = vmatmul.msk.f32.vlgmr.msra.gmra.mxu2 %vm360_vm2, %v1260_v21 }
 0x4ab   :  { %1842 = vmatpush.msra.mxu2 %v3996_v61 }
 0x4d5   :  { %v1202_v37 = vpop.f32.mrf.mxu2 }
 0x4d6   :  { %v1206_v3 = vrot.slane %v1202_v37, 7  ;;  %v1207_v27 = vrot.slane %v1202_v37, 1  ;;  %v1208_v22 = vrot.slane %v1202_v37, 2  ;;  %v1209_v29 = vrot.slane %v1202_v37, 3 }
 0x4d7   :  { %v1210_v33 = vrot.slane %v1202_v37, 4  ;;  %v1211_v34 = vrot.slane %v1202_v37, 5  ;;  %v1222_v35 = vadd.f32 %v1202_v37, %v4058_v10  ;;  %v1212_v1 = vrot.slane %v1202_v37, 6 }
 0x4d8   :  { %v1221_v36 = vadd.f32 %v1206_v3, %v4053_v32  ;;  %v1223_v38 = vadd.f32 %v1207_v27, %v4086_v63  ;;  %v1224_v5 = vadd.f32 %v1208_v22, %v4091_v45  ;;  %v1225_v18 = vadd.f32 %v1209_v29, %v4101_v31 }
 0x4d9   :  { %3053 = vtanh.f32 %v1222_v35  ;;  %v1226_v39 = vadd.f32 %v1210_v33, %v4108_v40  ;;  %v1227_v6 = vadd.f32 %v1211_v34, %v4133_v58  ;;  %v1228_v41 = vadd.f32 %v1212_v1, %v4139_v23 }
 0x4da   :  { %3055 = vtanh.f32 %v1221_v36 }
 0x4db   :  { %3057 = vtanh.f32 %v1223_v38 }
 0x4dc   :  { %3059 = vtanh.f32 %v1224_v5 }
 0x4dd   :  { %3061 = vtanh.f32 %v1225_v18 }
 0x4de   :  { %3063 = vtanh.f32 %v1226_v39 }
 0x4df   :  { %v3054_v42 = vpop.eup %3053  ;;  %3065 = vtanh.f32 %v1227_v6 }
 0x4e0   :  { %v3056_v43 = vpop.eup %3055  ;;  %3067 = vtanh.f32 %v1228_v41  ;;  %1333 = vst.msk [vmem:[#allocation2 + $0x8] sm:$0x2] %vm1331_vm14, %v3054_v42 }
 0x4e1   :  { %v3058_v44 = vpop.eup %3057  ;;  %v1357_v47 = vrot.slane %v3056_v43, 1  ;;  %1332 = vst.msk [vmem:[#allocation2] sm:$0x2] %vm1331_vm14, %v3056_v43 }
 0x4e2   :  { %v3060_v48 = vpop.eup %3059  ;;  %v1359_v50 = vrot.slane %v3058_v44, 7  ;;  %1334 = vst.msk [vmem:[#allocation2 + $0x10] sm:$0x2] %vm1331_vm14, %v3058_v44 }
 0x4e3   :  { %v3062_v51 = vpop.eup %3061  ;;  %v1358_v52 = vsel %vm1163_vm6, %v3054_v42, %v1357_v47  ;;  %v1361_v56 = vrot.slane %v3060_v48, 6  ;;  %1335 = vst.msk [vmem:[#allocation2 + $0x18] sm:$0x2] %vm1331_vm14, %v3060_v48 }
 0x4e4   :  { %v3064_v28 = vpop.eup %3063  ;;  %v1360_v57 = vsel %vm1166_vm13, %v1359_v50, %v1358_v52  ;;  %v1363_v19 = vrot.slane %v3062_v51, 5  ;;  %1336 = vst.msk [vmem:[#allocation2 + $0x20] sm:$0x2] %vm1331_vm14, %v3062_v51 }
 0x4e5   :  { %v3066_v62 = vpop.eup %3065  ;;  %v1362_v8 = vsel %vm1169_vm1, %v1361_v56, %v1360_v57  ;;  %v1365_v11 = vrot.slane %v3064_v28, 4  ;;  %1337 = vst.msk [vmem:[#allocation2 + $0x28] sm:$0x2] %vm1331_vm14, %v3064_v28 }
 0x4e6   :  { %v3068_v12 = vpop.eup %3067  ;;  %v1364_v13 = vsel %vm1172_vm9, %v1363_v19, %v1362_v8  ;;  %v1367_v4 = vrot.slane %v3066_v62, 3  ;;  %1338 = vst.msk [vmem:[#allocation2 + $0x30] sm:$0x2] %vm1331_vm14, %v3066_v62 }
 0x4e7   :  { %v1366_v9 = vsel %vm1175_vm10, %v1365_v11, %v1364_v13  ;;  %v1369_v60 = vrot.slane %v3068_v12, 2  ;;  %1339 = vst.msk [vmem:[#allocation2 + $0x38] sm:$0x2] %vm1331_vm14, %v3068_v12  ;;  %vm1716_vm14 = vcmask 127044  }
 0x4e8   :  { %v1368_v15 = vsel %vm1178_vm11, %v1367_v4, %v1366_v9 }
 0x4e9   :  { %v1370_v2 = vsel %vm1181_vm12, %v1369_v60, %v1368_v15 }
 0x4ea   :  { %2914 = vmatmul.msk.f32.vlgmr.msrb.gmra.mxu3 %vm360_vm2, %v1370_v2 }
 0x4eb   :  { %1952 = vmatpush.msrb.mxu3 %v3987_v46 }
 0x52d   :  { %v1280_v7 = vpop.f32.mrf.mxu2 }
 0x52e   :  { %v1286_v16 = vrot.slane %v1280_v7, 4  ;;  %v1285_v54 = vrot.slane %v1280_v7, 3  ;;  %v1284_v0 = vrot.slane %v1280_v7, 2  ;;  %v1289_v24 = vrot.slane %v1280_v7, 7 }
 0x52f   :  { %v1288_v25 = vrot.slane %v1280_v7, 6  ;;  %v1287_v26 = vrot.slane %v1280_v7, 5  ;;  %v1290_v21 = vrot.slane %v1280_v7, 1 }
 0x530   :  { %1295 = vrot.lane.b32.xlu2 %v1286_v16, %s3445_s5  ;;  %1293 = vrot.lane.b32.xlu1 %v1285_v54, %s3445_s5 }
 0x531   :  { %1291 = vrot.lane.b32.xlu0 %v1284_v0, %s3445_s5 }
 0x538   :  { %1301 = vrot.lane.b32.xlu2 %v1289_v24, %s3445_s5  ;;  %1299 = vrot.lane.b32.xlu1 %v1288_v25, %s3445_s5 }
 0x539   :  { %1297 = vrot.lane.b32.xlu0 %v1287_v26, %s3445_s5 }
 0x540   :  { %1303 = vrot.lane.b32.xlu1 %v1280_v7, %s3445_s5 }
 0x541   :  { %1305 = vrot.lane.b32.xlu0 %v1290_v21, %s3445_s5 }
 0x56d   :  { %v1390_v37 = vpop.f32.mrf.mxu3 }
 0x56e   :  { %v1394_v3 = vrot.slane %v1390_v37, 6  ;;  %v1395_v27 = vrot.slane %v1390_v37, 7  ;;  %v1396_v22 = vrot.slane %v1390_v37, 1  ;;  %v1397_v29 = vrot.slane %v1390_v37, 2 }
 0x56f   :  { %v1398_v33 = vrot.slane %v1390_v37, 3  ;;  %v1399_v34 = vrot.slane %v1390_v37, 4  ;;  %v1411_v35 = vadd.f32 %v1390_v37, %v4086_v63  ;;  %v1400_v1 = vrot.slane %v1390_v37, 5 }
 0x570   :  { %v1409_v36 = vadd.f32 %v1394_v3, %v4053_v32  ;;  %v1410_v38 = vadd.f32 %v1395_v27, %v4058_v10  ;;  %v1412_v5 = vadd.f32 %v1396_v22, %v4091_v45  ;;  %v1413_v18 = vadd.f32 %v1397_v29, %v4101_v31 }
 0x571   :  { %3069 = vtanh.f32 %v1411_v35  ;;  %v1414_v39 = vadd.f32 %v1398_v33, %v4108_v40  ;;  %v1415_v6 = vadd.f32 %v1399_v34, %v4133_v58  ;;  %v1416_v41 = vadd.f32 %v1400_v1, %v4139_v23 }
 0x572   :  { %3071 = vtanh.f32 %v1409_v36 }
 0x573   :  { %3073 = vtanh.f32 %v1410_v38 }
 0x574   :  { %3075 = vtanh.f32 %v1412_v5 }
 0x575   :  { %3077 = vtanh.f32 %v1413_v18 }
 0x576   :  { %3079 = vtanh.f32 %v1414_v39 }
 0x577   :  { %v3070_v42 = vpop.eup %3069  ;;  %3081 = vtanh.f32 %v1415_v6 }
 0x578   :  { %v3072_v43 = vpop.eup %3071  ;;  %3083 = vtanh.f32 %v1416_v41  ;;  %1522 = vst.msk [vmem:[#allocation2 + $0x10] sm:$0x4] %vm1519_vm15, %v3070_v42 }
 0x579   :  { %v3074_v44 = vpop.eup %3073  ;;  %v1545_v47 = vrot.slane %v3072_v43, 2  ;;  %1520 = vst.msk [vmem:[#allocation2] sm:$0x4] %vm1519_vm15, %v3072_v43 }
 0x57a   :  { %v3076_v48 = vpop.eup %3075  ;;  %v1546_v50 = vrot.slane %v3074_v44, 1  ;;  %1521 = vst.msk [vmem:[#allocation2 + $0x8] sm:$0x4] %vm1519_vm15, %v3074_v44 }
 0x57b   :  { %v3078_v51 = vpop.eup %3077  ;;  %1523 = vst.msk [vmem:[#allocation2 + $0x18] sm:$0x4] %vm1519_vm15, %v3076_v48  ;;  %v1549_v28 = vrot.slane %v3076_v48, 7 }
 0x57c   :  { %v3080_v52 = vpop.eup %3079  ;;  %v1547_v56 = vsel %vm1163_vm6, %v1546_v50, %v1545_v47  ;;  %1524 = vst.msk [vmem:[#allocation2 + $0x20] sm:$0x4] %vm1519_vm15, %v3078_v51  ;;  %v1551_v62 = vrot.slane %v3078_v51, 6 }
 0x57d   :  { %v3082_v57 = vpop.eup %3081  ;;  %v1548_v19 = vsel %vm1166_vm13, %v3070_v42, %v1547_v56  ;;  %1525 = vst.msk [vmem:[#allocation2 + $0x28] sm:$0x4] %vm1519_vm15, %v3080_v52  ;;  %v1553_v12 = vrot.slane %v3080_v52, 5 }
 0x57e   :  { %v3084_v8 = vpop.eup %3083  ;;  %v1550_v11 = vsel %vm1169_vm1, %v1549_v28, %v1548_v19  ;;  %1526 = vst.msk [vmem:[#allocation2 + $0x30] sm:$0x4] %vm1519_vm15, %v3082_v57  ;;  %v1555_v4 = vrot.slane %v3082_v57, 4 }
 0x57f   :  { %v1552_v13 = vsel %vm1172_vm9, %v1551_v62, %v1550_v11  ;;  %1527 = vst.msk [vmem:[#allocation2 + $0x38] sm:$0x4] %vm1519_vm15, %v3084_v8  ;;  %v1557_v60 = vrot.slane %v3084_v8, 3  ;;  %vm1895_vm15 = vcmask 61444  }
 0x580   :  { %v1554_v9 = vsel %vm1175_vm10, %v1553_v12, %v1552_v13 }
 0x581   :  { %v1556_v15 = vsel %vm1178_vm11, %v1555_v4, %v1554_v9 }
 0x582   :  { %v1558_v2 = vsel %vm1181_vm12, %v1557_v60, %v1556_v15 }
 0x583   :  { %2916 = vmatmul.msk.f32.vlgmr.msrb.gmra.mxu2 %vm360_vm2, %v1558_v2 }
 0x584   :  { %2140 = vmatpush.msrb.mxu2 %v3987_v46 }
 0x58a   :  { %v1296_v7 = vpop.permute.xlu2 %1295 }
 0x58b   :  { %v1317_v16 = vadd.f32 %v1296_v7, %v4086_v63 }
 0x58d   :  { %3085 = vtanh.f32 %v1317_v16 }
 0x592   :  { %v1302_v54 = vpop.permute.xlu2 %1301 }
 0x593   :  { %v3086_v0 = vpop.eup %3085  ;;  %v1320_v24 = vadd.f32 %v1302_v54, %v4108_v40 }
 0x594   :  { %1343 = vst.msk [vmem:[#allocation2 + $0x10] sm:$0x40] %vm1340_vm5, %v3086_v0  ;;  %v1436_v41 = vrot.slane %v3086_v0, 4 }
 0x595   :  { %3087 = vtanh.f32 %v1320_v24 }
 0x59b   :  { %v3088_v25 = vpop.eup %3087 }
 0x59c   :  { %1346 = vst.msk [vmem:[#allocation2 + $0x28] sm:$0x40] %vm1340_vm5, %v3088_v25  ;;  %v1442_v51 = vrot.slane %v3088_v25, 1 }
 0x5a2   :  { %v1294_v26 = vpop.permute.xlu1 %1293 }
 0x5a3   :  { %v1316_v21 = vadd.f32 %v1294_v26, %v4058_v10  ;;  %v1292_v37 = vpop.permute.xlu0 %1291 }
 0x5a4   :  { %v1315_v46 = vadd.f32 %v1292_v37, %v4053_v32 }
 0x5a5   :  { %3089 = vtanh.f32 %v1316_v21 }
 0x5a6   :  { %3091 = vtanh.f32 %v1315_v46 }
 0x5aa   :  { %v1300_v3 = vpop.permute.xlu1 %1299 }
 0x5ab   :  { %v3090_v27 = vpop.eup %3089  ;;  %v1319_v22 = vadd.f32 %v1300_v3, %v4101_v31  ;;  %v1298_v29 = vpop.permute.xlu0 %1297 }
 0x5ac   :  { %v3092_v33 = vpop.eup %3091  ;;  %1342 = vst.msk [vmem:[#allocation2 + $0x8] sm:$0x40] %vm1340_vm5, %v3090_v27  ;;  %v1318_v34 = vadd.f32 %v1298_v29, %v4091_v45  ;;  %v1434_v35 = vrot.slane %v3090_v27, 5 }
 0x5ad   :  { %1341 = vst.msk [vmem:[#allocation2] sm:$0x40] %vm1340_vm5, %v3092_v33  ;;  %3093 = vtanh.f32 %v1319_v22  ;;  %v1433_v36 = vrot.slane %v3092_v33, 6 }
 0x5ae   :  { %3095 = vtanh.f32 %v1318_v34 }
 0x5af   :  { %v1435_v1 = vsel %vm1163_vm6, %v1434_v35, %v1433_v36 }
 0x5b0   :  { %v1437_v47 = vsel %vm1166_vm13, %v1436_v41, %v1435_v1 }
 0x5b2   :  { %v1304_v38 = vpop.permute.xlu1 %1303 }
 0x5b3   :  { %v3094_v5 = vpop.eup %3093  ;;  %v1321_v18 = vadd.f32 %v1304_v38, %v4133_v58  ;;  %v1306_v39 = vpop.permute.xlu0 %1305 }
 0x5b4   :  { %v3096_v6 = vpop.eup %3095  ;;  %1345 = vst.msk [vmem:[#allocation2 + $0x20] sm:$0x40] %vm1340_vm5, %v3094_v5  ;;  %v1440_v42 = vrot.slane %v3094_v5, 2  ;;  %v1322_v43 = vadd.f32 %v1306_v39, %v4139_v23 }
 0x5b5   :  { %1344 = vst.msk [vmem:[#allocation2 + $0x18] sm:$0x40] %vm1340_vm5, %v3096_v6  ;;  %v1438_v44 = vrot.slane %v3096_v6, 3  ;;  %3097 = vtanh.f32 %v1321_v18 }
 0x5b6   :  { %3099 = vtanh.f32 %v1322_v43 }
 0x5b7   :  { %v1439_v48 = vsel %vm1169_vm1, %v1438_v44, %v1437_v47 }
 0x5b8   :  { %v1441_v50 = vsel %vm1172_vm9, %v1440_v42, %v1439_v48 }
 0x5b9   :  { %v1443_v56 = vsel %vm1175_vm10, %v1442_v51, %v1441_v50  ;;  %v3293_v50 = vld [vmem:[%s4779_s8] sm:$0xff] }
 0x5bb   :  { %v3098_v52 = vpop.eup %3097 }
 0x5bc   :  { %v3100_v28 = vpop.eup %3099  ;;  %1347 = vst.msk [vmem:[#allocation2 + $0x30] sm:$0x40] %vm1340_vm5, %v3098_v52  ;;  %v1444_v57 = vsel %vm1178_vm11, %v3098_v52, %v1443_v56 }
 0x5bd   :  { %1348 = vst.msk [vmem:[#allocation2 + $0x38] sm:$0x40] %vm1340_vm5, %v3100_v28  ;;  %v1445_v19 = vrot.slane %v3100_v28, 7  ;;  %vm2271_vm5 = vcmask 63494  }
 0x5bf   :  { %v1446_v62 = vsel %vm1181_vm12, %v1445_v19, %v1444_v57 }
 0x5c0   :  { %1447 = vrot.lane.b32.xlu2 %v1446_v62, %s3447_s1 }
 0x606   :  { %v1578_v8 = vpop.f32.mrf.mxu2 }
 0x607   :  { %v1582_v11 = vrot.slane %v1578_v8, 5  ;;  %v1583_v12 = vrot.slane %v1578_v8, 6  ;;  %v1584_v13 = vrot.slane %v1578_v8, 7  ;;  %v1585_v4 = vrot.slane %v1578_v8, 1 }
 0x608   :  { %v1586_v9 = vrot.slane %v1578_v8, 2  ;;  %v1587_v60 = vrot.slane %v1578_v8, 3  ;;  %v1600_v15 = vadd.f32 %v1578_v8, %v4091_v45  ;;  %v1588_v54 = vrot.slane %v1578_v8, 4 }
 0x609   :  { %v1597_v2 = vadd.f32 %v1582_v11, %v4053_v32  ;;  %v1598_v7 = vadd.f32 %v1583_v12, %v4058_v10  ;;  %v1599_v16 = vadd.f32 %v1584_v13, %v4086_v63  ;;  %v1601_v0 = vadd.f32 %v1585_v4, %v4101_v31 }
 0x60a   :  { %3101 = vtanh.f32 %v1600_v15  ;;  %v1602_v24 = vadd.f32 %v1586_v9, %v4108_v40  ;;  %v1603_v25 = vadd.f32 %v1587_v60, %v4133_v58  ;;  %v1604_v26 = vadd.f32 %v1588_v54, %v4139_v23 }
 0x60b   :  { %3103 = vtanh.f32 %v1597_v2 }
 0x60c   :  { %3105 = vtanh.f32 %v1598_v7 }
 0x60d   :  { %3107 = vtanh.f32 %v1599_v16 }
 0x60e   :  { %3109 = vtanh.f32 %v1601_v0 }
 0x60f   :  { %3111 = vtanh.f32 %v1602_v24 }
 0x610   :  { %v3102_v21 = vpop.eup %3101  ;;  %3113 = vtanh.f32 %v1603_v25 }
 0x611   :  { %v3104_v37 = vpop.eup %3103  ;;  %3115 = vtanh.f32 %v1604_v26  ;;  %1711 = vst.msk [vmem:[#allocation2 + $0x18] sm:$0x8] %vm1707_vm7, %v3102_v21 }
 0x612   :  { %v3106_v46 = vpop.eup %3105  ;;  %v1733_v3 = vrot.slane %v3104_v37, 3  ;;  %1708 = vst.msk [vmem:[#allocation2] sm:$0x8] %vm1707_vm7, %v3104_v37 }
 0x613   :  { %v3108_v27 = vpop.eup %3107  ;;  %v1734_v22 = vrot.slane %v3106_v46, 2  ;;  %1709 = vst.msk [vmem:[#allocation2 + $0x8] sm:$0x8] %vm1707_vm7, %v3106_v46 }
 0x614   :  { %v3110_v29 = vpop.eup %3109  ;;  %v1736_v33 = vrot.slane %v3108_v27, 1  ;;  %1710 = vst.msk [vmem:[#allocation2 + $0x10] sm:$0x8] %vm1707_vm7, %v3108_v27 }
 0x615   :  { %v3112_v34 = vpop.eup %3111  ;;  %v1735_v35 = vsel %vm1163_vm6, %v1734_v22, %v1733_v3  ;;  %1712 = vst.msk [vmem:[#allocation2 + $0x20] sm:$0x8] %vm1707_vm7, %v3110_v29  ;;  %v1739_v18 = vrot.slane %v3110_v29, 7 }
 0x616   :  { %v3114_v36 = vpop.eup %3113  ;;  %v1737_v38 = vsel %vm1166_vm13, %v1736_v33, %v1735_v35  ;;  %1713 = vst.msk [vmem:[#allocation2 + $0x28] sm:$0x8] %vm1707_vm7, %v3112_v34  ;;  %v1741_v41 = vrot.slane %v3112_v34, 6 }
 0x617   :  { %v3116_v5 = vpop.eup %3115  ;;  %v1738_v1 = vsel %vm1169_vm1, %v3102_v21, %v1737_v38  ;;  %1714 = vst.msk [vmem:[#allocation2 + $0x30] sm:$0x8] %vm1707_vm7, %v3114_v36  ;;  %v1743_v43 = vrot.slane %v3114_v36, 5 }
 0x618   :  { %1715 = vst.msk [vmem:[#allocation2 + $0x38] sm:$0x8] %vm1707_vm7, %v3116_v5  ;;  %v1740_v39 = vsel %vm1172_vm9, %v1739_v18, %v1738_v1  ;;  %v1745_v47 = vrot.slane %v3116_v5, 4  ;;  %vm1904_vm7 = vcmask 126019  }
 0x619   :  { %v1742_v42 = vsel %vm1175_vm10, %v1741_v41, %v1740_v39 }
 0x61a   :  { %v1448_v6 = vpop.permute.xlu2 %1447  ;;  %v1744_v44 = vsel %vm1178_vm11, %v1743_v43, %v1742_v42 }
 0x61b   :  { %2915 = vmatmul.msk.f32.vlgmr.msrb.gmra.mxu1 %vm360_vm2, %v1448_v6  ;;  %v1746_v48 = vsel %vm1181_vm12, %v1745_v47, %v1744_v44 }
 0x61c   :  { %2030 = vmatpush.msrb.mxu1 %v3996_v61 }
 0x623   :  { %2918 = vmatmul.msk.f32.vlgmr.msra.gmra.mxu1 %vm360_vm2, %v1746_v48 }
 0x624   :  { %2328 = vmatpush.msra.mxu1 %v3293_v50 }
 0x698   :  { %v1468_v51 = vpop.f32.mrf.mxu1 }
 0x699   :  { %v1474_v52 = vrot.slane %v1468_v51, 5  ;;  %v1473_v56 = vrot.slane %v1468_v51, 4  ;;  %v1472_v28 = vrot.slane %v1468_v51, 3  ;;  %v1477_v61 = vrot.slane %v1468_v51, 1 }
 0x69a   :  { %v1476_v57 = vrot.slane %v1468_v51, 7  ;;  %v1475_v19 = vrot.slane %v1468_v51, 6  ;;  %v1478_v62 = vrot.slane %v1468_v51, 2 }
 0x69b   :  { %1483 = vrot.lane.b32.xlu2 %v1474_v52, %s3445_s5  ;;  %1481 = vrot.lane.b32.xlu1 %v1473_v56, %s3445_s5 }
 0x69c   :  { %1479 = vrot.lane.b32.xlu0 %v1472_v28, %s3445_s5 }
 0x6a0   :  { %v1766_v48 = vpop.f32.mrf.mxu1 }
 0x6a1   :  { %v1770_v50 = vrot.slane %v1766_v48, 4  ;;  %v1772_v52 = vrot.slane %v1766_v48, 6 }
 0x6a3   :  { %1491 = vrot.lane.b32.xlu2 %v1477_v61, %s3445_s5  ;;  %1487 = vrot.lane.b32.xlu1 %v1476_v57, %s3445_s5  ;;  %v1785_v56 = vadd.f32 %v1770_v50, %v4053_v32  ;;  %v1787_v61 = vadd.f32 %v1772_v52, %v4086_v63  ;;  %v1773_v57 = vrot.slane %v1766_v48, 7 }
 0x6a4   :  { %1485 = vrot.lane.b32.xlu0 %v1475_v19, %s3445_s5 }
 0x6a5   :  { %v1788_v19 = vadd.f32 %v1773_v57, %v4091_v45 }
 0x6ab   :  { %1493 = vrot.lane.b32.xlu1 %v1478_v62, %s3445_s5 }
 0x6ac   :  { %1489 = vrot.lane.b32.xlu0 %v1468_v51, %s3445_s5  ;;  %v1771_v51 = vrot.slane %v1766_v48, 5 }
 0x6ae   :  { %v1786_v28 = vadd.f32 %v1771_v51, %v4058_v10 }
 0x6f5   :  { %v1484_v8 = vpop.permute.xlu2 %1483 }
 0x6f6   :  { %v1505_v11 = vadd.f32 %v1484_v8, %v4086_v63 }
 0x6f8   :  { %3117 = vtanh.f32 %v1505_v11  ;;  %v1774_v11 = vrot.slane %v1766_v48, 1 }
 0x6fd   :  { %v1492_v12 = vpop.permute.xlu2 %1491 }
 0x6fe   :  { %v3118_v13 = vpop.eup %3117  ;;  %v1509_v4 = vadd.f32 %v1492_v12, %v4133_v58 }
 0x6ff   :  { %1531 = vst.msk [vmem:[#allocation2 + $0x10] sm:$0x20] %vm1528_vm8, %v3118_v13  ;;  %v1624_v36 = vrot.slane %v3118_v13, 3  ;;  %v1775_v13 = vrot.slane %v1766_v48, 2 }
 0x700   :  { %3119 = vtanh.f32 %v1509_v4 }
 0x706   :  { %v3120_v9 = vpop.eup %3119 }
 0x707   :  { %1535 = vst.msk [vmem:[#allocation2 + $0x30] sm:$0x20] %vm1528_vm8, %v3120_v9  ;;  %v1631_v6 = vrot.slane %v3120_v9, 7 }
 0x70d   :  { %v1482_v60 = vpop.permute.xlu1 %1481 }
 0x70e   :  { %v1504_v15 = vadd.f32 %v1482_v60, %v4058_v10  ;;  %v1480_v2 = vpop.permute.xlu0 %1479  ;;  %v1790_v60 = vadd.f32 %v1774_v11, %v4108_v40 }
 0x70f   :  { %v1503_v7 = vadd.f32 %v1480_v2, %v4053_v32  ;;  %v1776_v2 = vrot.slane %v1766_v48, 3 }
 0x710   :  { %3121 = vtanh.f32 %v1504_v15  ;;  %v1789_v15 = vadd.f32 %v1766_v48, %v4101_v31 }
 0x711   :  { %3123 = vtanh.f32 %v1503_v7 }
 0x715   :  { %v1488_v54 = vpop.permute.xlu1 %1487 }
 0x716   :  { %v3122_v16 = vpop.eup %3121  ;;  %v1486_v0 = vpop.permute.xlu0 %1485  ;;  %v1507_v25 = vadd.f32 %v1488_v54, %v4101_v31 }
 0x717   :  { %v3124_v24 = vpop.eup %3123  ;;  %1530 = vst.msk [vmem:[#allocation2 + $0x8] sm:$0x20] %vm1528_vm8, %v3122_v16  ;;  %v1506_v26 = vadd.f32 %v1486_v0, %v4091_v45  ;;  %v1622_v21 = vrot.slane %v3122_v16, 4  ;;  %v1791_v16 = vadd.f32 %v1775_v13, %v4133_v58 }
 0x718   :  { %1529 = vst.msk [vmem:[#allocation2] sm:$0x20] %vm1528_vm8, %v3124_v24  ;;  %3125 = vtanh.f32 %v1507_v25  ;;  %v1621_v37 = vrot.slane %v3124_v24, 5  ;;  %v1792_v24 = vadd.f32 %v1776_v2, %v4139_v23 }
 0x719   :  { %3127 = vtanh.f32 %v1506_v26 }
 0x71a   :  { %v1623_v34 = vsel %vm1163_vm6, %v1622_v21, %v1621_v37 }
 0x71b   :  { %v1625_v5 = vsel %vm1166_vm13, %v1624_v36, %v1623_v34  ;;  %v4339_v34 = vld [vmem:[#allocation9] sm:$0xff] }
 0x71d   :  { %v1494_v46 = vpop.permute.xlu1 %1493 }
 0x71e   :  { %v1490_v3 = vpop.permute.xlu0 %1489  ;;  %v3126_v27 = vpop.eup %3125  ;;  %v1510_v22 = vadd.f32 %v1494_v46, %v4139_v23 }
 0x71f   :  { %v1508_v29 = vadd.f32 %v1490_v3, %v4108_v40  ;;  %v3128_v33 = vpop.eup %3127  ;;  %1533 = vst.msk [vmem:[#allocation2 + $0x20] sm:$0x20] %vm1528_vm8, %v3126_v27  ;;  %v1628_v38 = vrot.slane %v3126_v27, 1 }
 0x720   :  { %1532 = vst.msk [vmem:[#allocation2 + $0x18] sm:$0x20] %vm1528_vm8, %v3128_v33  ;;  %v1626_v35 = vrot.slane %v3128_v33, 2  ;;  %3129 = vtanh.f32 %v1510_v22 }
 0x721   :  { %3131 = vtanh.f32 %v1508_v29 }
 0x722   :  { %v1627_v1 = vsel %vm1169_vm1, %v1626_v35, %v1625_v5  ;;  %3133 = vtanh.f32 %v1785_v56 }
 0x723   :  { %v1629_v41 = vsel %vm1172_vm9, %v1628_v38, %v1627_v1  ;;  %3135 = vtanh.f32 %v1786_v28 }
 0x724   :  { %3137 = vtanh.f32 %v1787_v61 }
 0x725   :  { %3139 = vtanh.f32 %v1788_v19 }
 0x726   :  { %v3130_v18 = vpop.eup %3129  ;;  %3141 = vtanh.f32 %v1790_v60 }
 0x727   :  { %v3132_v39 = vpop.eup %3131  ;;  %1536 = vst.msk [vmem:[#allocation2 + $0x38] sm:$0x20] %vm1528_vm8, %v3130_v18  ;;  %v1633_v42 = vrot.slane %v3130_v18, 6  ;;  %3143 = vtanh.f32 %v1789_v15 }
 0x728   :  { %1534 = vst.msk [vmem:[#allocation2 + $0x28] sm:$0x20] %vm1528_vm8, %v3132_v39  ;;  %v1630_v43 = vsel %vm1175_vm10, %v3132_v39, %v1629_v41  ;;  %v4309_v62 = vpop.eup %3133  ;;  %3145 = vtanh.f32 %v1791_v16  ;;  %vm2459_vm8 = vcmask 64519  }
 0x729   :  { %v1632_v44 = vsel %vm1178_vm11, %v1631_v6, %v1630_v43  ;;  %v4311_v8 = vpop.eup %3135  ;;  %v1921_v4 = vrot.slane %v4309_v62, 4  ;;  %3147 = vtanh.f32 %v1792_v24 }
 0x72a   :  { %v1634_v47 = vsel %vm1181_vm12, %v1633_v42, %v1632_v44  ;;  %v4313_v12 = vpop.eup %3137  ;;  %v1922_v9 = vrot.slane %v4311_v8, 3 }
 0x72b   :  { %1635 = vrot.lane.b32.xlu2 %v1634_v47, %s3447_s1  ;;  %v1924_v7 = vrot.slane %v4313_v12, 2  ;;  %v4322_v0 = vpop.eup %3139 }
 0x72c   :  { %v1923_v54 = vsel %vm1163_vm6, %v1922_v9, %v1921_v4  ;;  %v1926_v26 = vrot.slane %v4322_v0, 1  ;;  %v4328_v37 = vpop.eup %3141 }
 0x72d   :  { %v1925_v25 = vsel %vm1166_vm13, %v1924_v7, %v1923_v54  ;;  %v4330_v46 = vpop.eup %3143  ;;  %v1929_v29 = vrot.slane %v4328_v37, 7 }
 0x72e   :  { %v1927_v21 = vsel %vm1169_vm1, %v1926_v26, %v1925_v25  ;;  %v4334_v27 = vpop.eup %3145 }
 0x72f   :  { %v1928_v3 = vsel %vm1172_vm9, %v4330_v46, %v1927_v21  ;;  %v4342_v35 = vpop.eup %3147  ;;  %v1931_v36 = vrot.slane %v4334_v27, 6 }
 0x730   :  { %v1930_v33 = vsel %vm1175_vm10, %v1929_v29, %v1928_v3  ;;  %v1933_v5 = vrot.slane %v4342_v35, 5 }
 0x731   :  { %v1932_v38 = vsel %vm1178_vm11, %v1931_v36, %v1930_v33 }
 0x732   :  { %v1934_v1 = vsel %vm1181_vm12, %v1933_v5, %v1932_v38 }
 0x785   :  { %v1636_v22 = vpop.permute.xlu2 %1635 }
 0x786   :  { %2917 = vmatmul.msk.f32.vlgmr.msra.gmra.mxu3 %vm360_vm2, %v1636_v22 }
 0x787   :  { %2218 = vmatpush.msra.mxu3 %v4339_v34 }
 0x78e   :  { %2920 = vmatmul.msk.f32.vlgmr.msrb.gmra.mxu3 %vm360_vm2, %v1934_v1 }
 0x809   :  { %v1656_v18 = vpop.f32.mrf.mxu3 }
 0x80a   :  { %v1662_v39 = vrot.slane %v1656_v18, 6  ;;  %v1661_v6 = vrot.slane %v1656_v18, 5  ;;  %v1660_v41 = vrot.slane %v1656_v18, 4  ;;  %v1664_v43 = vrot.slane %v1656_v18, 1 }
 0x80b   :  { %v1663_v28 = vrot.slane %v1656_v18, 7  ;;  %v1666_v2 = vrot.slane %v1656_v18, 3  ;;  %v1665_v7 = vrot.slane %v1656_v18, 2 }
 0x80c   :  { %1671 = vrot.lane.b32.xlu2 %v1662_v39, %s3445_s5  ;;  %1669 = vrot.lane.b32.xlu1 %v1661_v6, %s3445_s5 }
 0x80d   :  { %1667 = vrot.lane.b32.xlu0 %v1660_v41, %s3445_s5 }
 0x811   :  { %v1954_v42 = vpop.f32.mrf.mxu3 }
 0x812   :  { %v1958_v44 = vrot.slane %v1954_v42, 3  ;;  %v1959_v47 = vrot.slane %v1954_v42, 4  ;;  %v1960_v48 = vrot.slane %v1954_v42, 5  ;;  %v1961_v50 = vrot.slane %v1954_v42, 6 }
 0x813   :  { %v1962_v51 = vrot.slane %v1954_v42, 7  ;;  %v1963_v52 = vrot.slane %v1954_v42, 1  ;;  %v1978_v56 = vadd.f32 %v1954_v42, %v4108_v40  ;;  %v1964_v11 = vrot.slane %v1954_v42, 2 }
 0x814   :  { %v1973_v61 = vadd.f32 %v1958_v44, %v4053_v32  ;;  %v1974_v57 = vadd.f32 %v1959_v47, %v4058_v10  ;;  %v1975_v19 = vadd.f32 %v1960_v48, %v4086_v63  ;;  %1675 = vrot.lane.b32.xlu2 %v1656_v18, %s3445_s5  ;;  %v1976_v13 = vadd.f32 %v1961_v50, %v4091_v45 }
 0x815   :  { %3149 = vtanh.f32 %v1978_v56  ;;  %1677 = vrot.lane.b32.xlu1 %v1664_v43, %s3445_s5  ;;  %1673 = vrot.lane.b32.xlu0 %v1663_v28, %s3445_s5  ;;  %v1977_v4 = vadd.f32 %v1962_v51, %v4101_v31  ;;  %v1979_v9 = vadd.f32 %v1963_v52, %v4133_v58  ;;  %v1980_v60 = vadd.f32 %v1964_v11, %v4139_v23 }
 0x816   :  { %3151 = vtanh.f32 %v1973_v61 }
 0x817   :  { %3153 = vtanh.f32 %v1974_v57 }
 0x818   :  { %3155 = vtanh.f32 %v1975_v19 }
 0x819   :  { %3157 = vtanh.f32 %v1976_v13 }
 0x81a   :  { %3159 = vtanh.f32 %v1977_v4 }
 0x81b   :  { %v3150_v15 = vpop.eup %3149  ;;  %3161 = vtanh.f32 %v1979_v9 }
 0x81c   :  { %v3152_v16 = vpop.eup %3151  ;;  %2089 = vst.msk [vmem:[#allocation2 + $0x28] sm:$0x20] %vm2083_vm3, %v3150_v15  ;;  %3163 = vtanh.f32 %v1980_v60 }
 0x81d   :  { %v3154_v54 = vpop.eup %3153  ;;  %2084 = vst.msk [vmem:[#allocation2] sm:$0x20] %vm2083_vm3, %v3152_v16  ;;  %1681 = vrot.lane.b32.xlu1 %v1666_v2, %s3445_s5  ;;  %1679 = vrot.lane.b32.xlu0 %v1665_v7, %s3445_s5  ;;  %v2109_v24 = vrot.slane %v3152_v16, 5 }
 0x81e   :  { %v3156_v25 = vpop.eup %3155  ;;  %2085 = vst.msk [vmem:[#allocation2 + $0x8] sm:$0x20] %vm2083_vm3, %v3154_v54  ;;  %v2110_v26 = vrot.slane %v3154_v54, 4 }
 0x81f   :  { %v3158_v21 = vpop.eup %3157  ;;  %2086 = vst.msk [vmem:[#allocation2 + $0x10] sm:$0x20] %vm2083_vm3, %v3156_v25  ;;  %v2112_v3 = vrot.slane %v3156_v25, 3 }
 0x820   :  { %v3160_v22 = vpop.eup %3159  ;;  %2087 = vst.msk [vmem:[#allocation2 + $0x18] sm:$0x20] %vm2083_vm3, %v3158_v21  ;;  %v2111_v29 = vsel %vm1163_vm6, %v2110_v26, %v2109_v24  ;;  %v2114_v33 = vrot.slane %v3158_v21, 2 }
 0x821   :  { %v3162_v36 = vpop.eup %3161  ;;  %2088 = vst.msk [vmem:[#allocation2 + $0x20] sm:$0x20] %vm2083_vm3, %v3160_v22  ;;  %v2113_v38 = vsel %vm1166_vm13, %v2112_v3, %v2111_v29  ;;  %v2116_v5 = vrot.slane %v3160_v22, 1 }
 0x822   :  { %v3164_v1 = vpop.eup %3163  ;;  %2090 = vst.msk [vmem:[#allocation2 + $0x30] sm:$0x20] %vm2083_vm3, %v3162_v36  ;;  %v2115_v18 = vsel %vm1169_vm1, %v2114_v33, %v2113_v38  ;;  %v2119_v6 = vrot.slane %v3162_v36, 7 }
 0x823   :  { %2091 = vst.msk [vmem:[#allocation2 + $0x38] sm:$0x20] %vm2083_vm3, %v3164_v1  ;;  %v2117_v39 = vsel %vm1172_vm9, %v2116_v5, %v2115_v18  ;;  %v2121_v42 = vrot.slane %v3164_v1, 6  ;;  %vm2092_vm3 = vcmask 124994  }
 0x824   :  { %v2118_v41 = vsel %vm1175_vm10, %v3150_v15, %v2117_v39 }
 0x825   :  { %v2120_v43 = vsel %vm1178_vm11, %v2119_v6, %v2118_v41 }
 0x826   :  { %v4380_v44 = vsel %vm1181_vm12, %v2121_v42, %v2120_v43 }
 0x866   :  { %v1672_v47 = vpop.permute.xlu2 %1671 }
 0x867   :  { %v1693_v48 = vadd.f32 %v1672_v47, %v4086_v63 }
 0x869   :  { %3165 = vtanh.f32 %v1693_v48 }
 0x86e   :  { %v1676_v50 = vpop.permute.xlu2 %1675 }
 0x86f   :  { %v3166_v51 = vpop.eup %3165  ;;  %v1695_v52 = vadd.f32 %v1676_v50, %v4101_v31 }
 0x870   :  { %1719 = vst.msk [vmem:[#allocation2 + $0x10] sm:$0x10] %vm1716_vm14, %v3166_v51 }
 0x871   :  { %1898 = vst.msk [vmem:[#allocation2 + $0x10] sm:$0x10] %vm1895_vm15, %v4313_v12  ;;  %3167 = vtanh.f32 %v1695_v52 }
 0x877   :  { %v3168_v56 = vpop.eup %3167 }
 0x878   :  { %1721 = vst.msk [vmem:[#allocation2 + $0x20] sm:$0x10] %vm1716_vm14, %v3168_v56 }
 0x879   :  { %1900 = vst.msk [vmem:[#allocation2 + $0x20] sm:$0x10] %vm1895_vm15, %v4330_v46 }
 0x87e   :  { %v1670_v28 = vpop.permute.xlu1 %1669 }
 0x87f   :  { %v1692_v61 = vadd.f32 %v1670_v28, %v4058_v10  ;;  %v1668_v57 = vpop.permute.xlu0 %1667 }
 0x880   :  { %v1691_v19 = vadd.f32 %v1668_v57, %v4053_v32 }
 0x881   :  { %3169 = vtanh.f32 %v1692_v61 }
 0x882   :  { %3171 = vtanh.f32 %v1691_v19 }
 0x887   :  { %v3170_v11 = vpop.eup %3169  ;;  %v1678_v13 = vpop.permute.xlu1 %1677 }
 0x888   :  { %v1674_v4 = vpop.permute.xlu0 %1673  ;;  %v3172_v9 = vpop.eup %3171  ;;  %1718 = vst.msk [vmem:[#allocation2 + $0x8] sm:$0x10] %vm1716_vm14, %v3170_v11  ;;  %v1696_v12 = vadd.f32 %v1678_v13, %v4108_v40  ;;  %v1810_v46 = vrot.slane %v3170_v11, 3 }
 0x889   :  { %v1694_v60 = vadd.f32 %v1674_v4, %v4091_v45  ;;  %1897 = vst.msk [vmem:[#allocation2 + $0x8] sm:$0x10] %vm1895_vm15, %v4311_v8  ;;  %v1809_v15 = vrot.slane %v3172_v9, 4  ;;  %v1812_v8 = vrot.slane %v3166_v51, 2 }
 0x88a   :  { %1717 = vst.msk [vmem:[#allocation2] sm:$0x10] %vm1716_vm14, %v3172_v9  ;;  %3173 = vtanh.f32 %v1696_v12 }
 0x88b   :  { %1896 = vst.msk [vmem:[#allocation2] sm:$0x10] %vm1895_vm15, %v4309_v62  ;;  %3175 = vtanh.f32 %v1694_v60  ;;  %v1811_v26 = vsel %vm1163_vm6, %v1810_v46, %v1809_v15 }
 0x88c   :  { %v1813_v21 = vsel %vm1166_vm13, %v1812_v8, %v1811_v26 }
 0x88f   :  { %v1682_v2 = vpop.permute.xlu1 %1681 }
 0x890   :  { %v1680_v7 = vpop.permute.xlu0 %1679  ;;  %v3174_v16 = vpop.eup %3173  ;;  %v1698_v54 = vadd.f32 %v1682_v2, %v4139_v23 }
 0x891   :  { %v1697_v24 = vadd.f32 %v1680_v7, %v4133_v58  ;;  %v3176_v25 = vpop.eup %3175  ;;  %1722 = vst.msk [vmem:[#allocation2 + $0x28] sm:$0x10] %vm1716_vm14, %v3174_v16  ;;  %v1817_v36 = vrot.slane %v3174_v16, 7 }
 0x892   :  { %1901 = vst.msk [vmem:[#allocation2 + $0x28] sm:$0x10] %vm1895_vm15, %v4328_v37  ;;  %v1814_v62 = vrot.slane %v3176_v25, 1  ;;  %3177 = vtanh.f32 %v1698_v54 }
 0x893   :  { %1720 = vst.msk [vmem:[#allocation2 + $0x18] sm:$0x10] %vm1716_vm14, %v3176_v25  ;;  %3179 = vtanh.f32 %v1697_v24 }
 0x894   :  { %1899 = vst.msk [vmem:[#allocation2 + $0x18] sm:$0x10] %vm1895_vm15, %v4322_v0  ;;  %v1815_v3 = vsel %vm1169_vm1, %v1814_v62, %v1813_v21 }
 0x895   :  { %v1816_v29 = vsel %vm1172_vm9, %v3168_v56, %v1815_v3 }
 0x896   :  { %v1818_v0 = vsel %vm1175_vm10, %v1817_v36, %v1816_v29 }
 0x898   :  { %v3178_v22 = vpop.eup %3177 }
 0x899   :  { %v3180_v33 = vpop.eup %3179  ;;  %1724 = vst.msk [vmem:[#allocation2 + $0x38] sm:$0x10] %vm1716_vm14, %v3178_v22  ;;  %v1821_v37 = vrot.slane %v3178_v22, 5 }
 0x89a   :  { %1903 = vst.msk [vmem:[#allocation2 + $0x38] sm:$0x10] %vm1895_vm15, %v4342_v35  ;;  %v1819_v38 = vrot.slane %v3180_v33, 6 }
 0x89b   :  { %1723 = vst.msk [vmem:[#allocation2 + $0x30] sm:$0x10] %vm1716_vm14, %v3180_v33  ;;  %vm2280_vm14 = vcmask 123969  }
 0x89c   :  { %1902 = vst.msk [vmem:[#allocation2 + $0x30] sm:$0x10] %vm1895_vm15, %v4334_v27  ;;  %v1820_v5 = vsel %vm1178_vm11, %v1819_v38, %v1818_v0 }
 0x89d   :  { %v1822_v1 = vsel %vm1181_vm12, %v1821_v37, %v1820_v5 }
 0x89e   :  { %1823 = vrot.lane.b32.xlu2 %v1822_v1, %s3447_s1 }
 0x8f8   :  { %v1824_v18 = vpop.permute.xlu2 %1823 }
 0x8f9   :  { %2919 = vmatmul.msk.f32.vlgmr.msra.gmra.mxu2 %vm360_vm2, %v1824_v18 }
 0x8fa   :  { %2406 = vmatpush.msra.mxu2 %v4339_v34 }
 0x901   :  { %2922 = vmatmul.msk.f32.vlgmr.msrb.gmra.mxu2 %vm360_vm2, %v4380_v44 }
 0x97c   :  { %v1844_v35 = vpop.f32.mrf.mxu2 }
 0x97d   :  { %1861 = vrot.lane.b32.xlu1 %v1844_v35, %s3445_s5  ;;  %v1850_v39 = vrot.slane %v1844_v35, 7  ;;  %v1848_v6 = vrot.slane %v1844_v35, 5  ;;  %v1849_v27 = vrot.slane %v1844_v35, 6  ;;  %v1852_v42 = vrot.slane %v1844_v35, 2 }
 0x97e   :  { %v1851_v52 = vrot.slane %v1844_v35, 1  ;;  %v1854_v4 = vrot.slane %v1844_v35, 4  ;;  %v1853_v60 = vrot.slane %v1844_v35, 3 }
 0x97f   :  { %1859 = vrot.lane.b32.xlu2 %v1850_v39, %s3445_s5  ;;  %1855 = vrot.lane.b32.xlu0 %v1848_v6, %s3445_s5 }
 0x984   :  { %v2142_v41 = vpop.f32.mrf.mxu2 }
 0x985   :  { %v2146_v43 = vrot.slane %v2142_v41, 2  ;;  %v2147_v47 = vrot.slane %v2142_v41, 3  ;;  %v2148_v48 = vrot.slane %v2142_v41, 4  ;;  %v2149_v50 = vrot.slane %v2142_v41, 5  ;;  %1857 = vrot.lane.b32.xlu1 %v1849_v27, %s3445_s5 }
 0x986   :  { %v2150_v34 = vrot.slane %v2142_v41, 6  ;;  %v2151_v44 = vrot.slane %v2142_v41, 7  ;;  %v2167_v51 = vadd.f32 %v2142_v41, %v4133_v58  ;;  %v2152_v57 = vrot.slane %v2142_v41, 1 }
 0x987   :  { %v2161_v56 = vadd.f32 %v2146_v43, %v4053_v32  ;;  %v2162_v28 = vadd.f32 %v2147_v47, %v4058_v10  ;;  %v2163_v61 = vadd.f32 %v2148_v48, %v4086_v63  ;;  %1865 = vrot.lane.b32.xlu2 %v1852_v42, %s3445_s5  ;;  %v2164_v19 = vadd.f32 %v2149_v50, %v4091_v45 }
 0x988   :  { %3181 = vtanh.f32 %v2167_v51  ;;  %1863 = vrot.lane.b32.xlu0 %v1851_v52, %s3445_s5  ;;  %v2165_v11 = vadd.f32 %v2150_v34, %v4101_v31  ;;  %v2166_v13 = vadd.f32 %v2151_v44, %v4108_v40  ;;  %v2168_v9 = vadd.f32 %v2152_v57, %v4139_v23 }
 0x989   :  { %3183 = vtanh.f32 %v2161_v56 }
 0x98a   :  { %3185 = vtanh.f32 %v2162_v28 }
 0x98b   :  { %3187 = vtanh.f32 %v2163_v61 }
 0x98c   :  { %3189 = vtanh.f32 %v2164_v19 }
 0x98d   :  { %3191 = vtanh.f32 %v2165_v11  ;;  %1869 = vrot.lane.b32.xlu1 %v1854_v4, %s3445_s5 }
 0x98e   :  { %v3182_v12 = vpop.eup %3181  ;;  %3193 = vtanh.f32 %v2166_v13 }
 0x98f   :  { %v3184_v46 = vpop.eup %3183  ;;  %2278 = vst.msk [vmem:[#allocation2 + $0x30] sm:$0x40] %vm2271_vm5, %v3182_v12  ;;  %3195 = vtanh.f32 %v2168_v9 }
 0x990   :  { %v3186_v15 = vpop.eup %3185  ;;  %2272 = vst.msk [vmem:[#allocation2] sm:$0x40] %vm2271_vm5, %v3184_v46  ;;  %1867 = vrot.lane.b32.xlu0 %v1853_v60, %s3445_s5  ;;  %v2297_v2 = vrot.slane %v3184_v46, 6 }
 0x991   :  { %v3188_v7 = vpop.eup %3187  ;;  %2273 = vst.msk [vmem:[#allocation2 + $0x8] sm:$0x40] %vm2271_vm5, %v3186_v15  ;;  %v2298_v16 = vrot.slane %v3186_v15, 5 }
 0x992   :  { %v3190_v54 = vpop.eup %3189  ;;  %2274 = vst.msk [vmem:[#allocation2 + $0x10] sm:$0x40] %vm2271_vm5, %v3188_v7  ;;  %v2300_v24 = vrot.slane %v3188_v7, 4 }
 0x993   :  { %v3192_v25 = vpop.eup %3191  ;;  %2275 = vst.msk [vmem:[#allocation2 + $0x18] sm:$0x40] %vm2271_vm5, %v3190_v54  ;;  %v2299_v26 = vsel %vm1163_vm6, %v2298_v16, %v2297_v2  ;;  %v2302_v8 = vrot.slane %v3190_v54, 3 }
 0x994   :  { %v3194_v62 = vpop.eup %3193  ;;  %2276 = vst.msk [vmem:[#allocation2 + $0x20] sm:$0x40] %vm2271_vm5, %v3192_v25  ;;  %v2301_v21 = vsel %vm1166_vm13, %v2300_v24, %v2299_v26  ;;  %v2304_v3 = vrot.slane %v3192_v25, 2 }
 0x995   :  { %v3196_v22 = vpop.eup %3195  ;;  %2277 = vst.msk [vmem:[#allocation2 + $0x28] sm:$0x40] %vm2271_vm5, %v3194_v62  ;;  %v2303_v29 = vsel %vm1169_vm1, %v2302_v8, %v2301_v21  ;;  %v2306_v33 = vrot.slane %v3194_v62, 1 }
 0x996   :  { %2279 = vst.msk [vmem:[#allocation2 + $0x38] sm:$0x40] %vm2271_vm5, %v3196_v22  ;;  %v2305_v36 = vsel %vm1172_vm9, %v2304_v3, %v2303_v29  ;;  %v2309_v38 = vrot.slane %v3196_v22, 7 }
 0x997   :  { %v2307_v37 = vsel %vm1175_vm10, %v2306_v33, %v2305_v36 }
 0x998   :  { %v2308_v0 = vsel %vm1178_vm11, %v3182_v12, %v2307_v37 }
 0x999   :  { %v2310_v5 = vsel %vm1181_vm12, %v2309_v38, %v2308_v0 }
 0x9d9   :  { %v1860_v1 = vpop.permute.xlu2 %1859 }
 0x9da   :  { %v1881_v18 = vadd.f32 %v1860_v1, %v4086_v63 }
 0x9dc   :  { %3197 = vtanh.f32 %v1881_v18 }
 0x9e1   :  { %v1866_v35 = vpop.permute.xlu2 %1865 }
 0x9e2   :  { %v3198_v39 = vpop.eup %3197  ;;  %v1884_v6 = vadd.f32 %v1866_v35, %v4108_v40 }
 0x9e3   :  { %1907 = vst.msk [vmem:[#allocation2 + $0x10] sm:$0x8] %vm1904_vm7, %v3198_v39  ;;  %v2000_v11 = vrot.slane %v3198_v39, 1 }
 0x9e4   :  { %3199 = vtanh.f32 %v1884_v6 }
 0x9ea   :  { %v3200_v27 = vpop.eup %3199 }
 0x9eb   :  { %1910 = vst.msk [vmem:[#allocation2 + $0x28] sm:$0x8] %vm1904_vm7, %v3200_v27  ;;  %v2005_v54 = vrot.slane %v3200_v27, 6 }
 0x9ef   :  { %v1862_v41 = vpop.permute.xlu1 %1861 }
 0x9f0   :  { %v1882_v42 = vadd.f32 %v1862_v41, %v4091_v45 }
 0x9f1   :  { %v1856_v43 = vpop.permute.xlu0 %1855 }
 0x9f2   :  { %3201 = vtanh.f32 %v1882_v42  ;;  %v1879_v47 = vadd.f32 %v1856_v43, %v4053_v32 }
 0x9f4   :  { %3203 = vtanh.f32 %v1879_v47 }
 0x9f7   :  { %v1858_v48 = vpop.permute.xlu1 %1857 }
 0x9f8   :  { %v3202_v50 = vpop.eup %3201  ;;  %v1880_v34 = vadd.f32 %v1858_v48, %v4058_v10 }
 0x9f9   :  { %1908 = vst.msk [vmem:[#allocation2 + $0x18] sm:$0x8] %vm1904_vm7, %v3202_v50 }
 0x9fa   :  { %v3204_v44 = vpop.eup %3203  ;;  %3205 = vtanh.f32 %v1880_v34  ;;  %v1864_v51 = vpop.permute.xlu0 %1863 }
 0x9fb   :  { %1905 = vst.msk [vmem:[#allocation2] sm:$0x8] %vm1904_vm7, %v3204_v44  ;;  %v1883_v52 = vadd.f32 %v1864_v51, %v4101_v31  ;;  %v1997_v57 = vrot.slane %v3204_v44, 3 }
 0x9fd   :  { %3207 = vtanh.f32 %v1883_v52 }
 0x9ff   :  { %v1870_v56 = vpop.permute.xlu1 %1869 }
 0xa00   :  { %v3206_v28 = vpop.eup %3205  ;;  %v1886_v61 = vadd.f32 %v1870_v56, %v4139_v23 }
 0xa01   :  { %1906 = vst.msk [vmem:[#allocation2 + $0x8] sm:$0x8] %vm1904_vm7, %v3206_v28  ;;  %v1998_v19 = vrot.slane %v3206_v28, 2 }
 0xa02   :  { %3209 = vtanh.f32 %v1886_v61  ;;  %v1868_v13 = vpop.permute.xlu0 %1867 }
 0xa03   :  { %v3208_v4 = vpop.eup %3207  ;;  %v1999_v9 = vsel %vm1163_vm6, %v1998_v19, %v1997_v57  ;;  %v1885_v12 = vadd.f32 %v1868_v13, %v4133_v58 }
 0xa04   :  { %1909 = vst.msk [vmem:[#allocation2 + $0x20] sm:$0x8] %vm1904_vm7, %v3208_v4  ;;  %v2001_v60 = vsel %vm1166_vm13, %v2000_v11, %v1999_v9  ;;  %v2003_v46 = vrot.slane %v3208_v4, 7 }
 0xa05   :  { %3211 = vtanh.f32 %v1885_v12  ;;  %v2002_v15 = vsel %vm1169_vm1, %v3202_v50, %v2001_v60 }
 0xa06   :  { %v2004_v7 = vsel %vm1172_vm9, %v2003_v46, %v2002_v15 }
 0xa07   :  { %v2006_v25 = vsel %vm1175_vm10, %v2005_v54, %v2004_v7 }
 0xa08   :  { %v3210_v2 = vpop.eup %3209 }
 0xa09   :  { %1912 = vst.msk [vmem:[#allocation2 + $0x38] sm:$0x8] %vm1904_vm7, %v3210_v2  ;;  %v2009_v26 = vrot.slane %v3210_v2, 4 }
 0xa0b   :  { %v3212_v16 = vpop.eup %3211 }
 0xa0c   :  { %1911 = vst.msk [vmem:[#allocation2 + $0x30] sm:$0x8] %vm1904_vm7, %v3212_v16  ;;  %v2007_v24 = vrot.slane %v3212_v16, 5 }
 0xa0e   :  { %v2008_v8 = vsel %vm1178_vm11, %v2007_v24, %v2006_v25 }
 0xa0f   :  { %v2010_v62 = vsel %vm1181_vm12, %v2009_v26, %v2008_v8 }
 0xa10   :  { %2011 = vrot.lane.b32.xlu2 %v2010_v62, %s3447_s1 }
 0xa6a   :  { %v2012_v21 = vpop.permute.xlu2 %2011 }
 0xa6b   :  { %2921 = vmatmul.msk.f32.vlgmr.msrb.gmra.mxu1 %vm360_vm2, %v2012_v21 }
 0xa73   :  { %2924 = vmatmul.msk.f32.vlgmr.msra.gmra.mxu1 %vm360_vm2, %v2310_v5 }
 0xae8   :  { %v2032_v3 = vpop.f32.mrf.mxu1 }
 0xae9   :  { %2047 = vrot.lane.b32.xlu0 %v2032_v3, %s3445_s5  ;;  %v2038_v22 = vrot.slane %v2032_v3, 1  ;;  %v2037_v29 = vrot.slane %v2032_v3, 7  ;;  %v2036_v33 = vrot.slane %v2032_v3, 6  ;;  %v2040_v37 = vrot.slane %v2032_v3, 3 }
 0xaea   :  { %v2039_v6 = vrot.slane %v2032_v3, 2  ;;  %v2041_v44 = vrot.slane %v2032_v3, 4  ;;  %v2042_v52 = vrot.slane %v2032_v3, 5 }
 0xaeb   :  { %2049 = vrot.lane.b32.xlu2 %v2038_v22, %s3445_s5  ;;  %2045 = vrot.lane.b32.xlu1 %v2037_v29, %s3445_s5 }
 0xaf0   :  { %v2330_v36 = vpop.f32.mrf.mxu1 }
 0xaf1   :  { %v2334_v38 = vrot.slane %v2330_v36, 1  ;;  %v2335_v0 = vrot.slane %v2330_v36, 2  ;;  %v2336_v1 = vrot.slane %v2330_v36, 3  ;;  %v2337_v18 = vrot.slane %v2330_v36, 4  ;;  %2043 = vrot.lane.b32.xlu0 %v2036_v33, %s3445_s5 }
 0xaf2   :  { %v2338_v35 = vrot.slane %v2330_v36, 5  ;;  %v2339_v5 = vrot.slane %v2330_v36, 6  ;;  %v2356_v39 = vadd.f32 %v2330_v36, %v4139_v23  ;;  %v2340_v27 = vrot.slane %v2330_v36, 7 }
 0xaf3   :  { %v2349_v41 = vadd.f32 %v2334_v38, %v4053_v32  ;;  %v2350_v42 = vadd.f32 %v2335_v0, %v4058_v10  ;;  %v2351_v43 = vadd.f32 %v2336_v1, %v4086_v63  ;;  %2053 = vrot.lane.b32.xlu2 %v2040_v37, %s3445_s5  ;;  %v2352_v47 = vadd.f32 %v2337_v18, %v4091_v45 }
 0xaf4   :  { %3213 = vtanh.f32 %v2356_v39  ;;  %2051 = vrot.lane.b32.xlu1 %v2039_v6, %s3445_s5  ;;  %v2353_v48 = vadd.f32 %v2338_v35, %v4101_v31  ;;  %v2354_v50 = vadd.f32 %v2339_v5, %v4108_v40  ;;  %v2355_v34 = vadd.f32 %v2340_v27, %v4133_v58 }
 0xaf5   :  { %3215 = vtanh.f32 %v2349_v41 }
 0xaf6   :  { %3217 = vtanh.f32 %v2350_v42 }
 0xaf7   :  { %3219 = vtanh.f32 %v2351_v43 }
 0xaf8   :  { %3221 = vtanh.f32 %v2352_v47 }
 0xaf9   :  { %3223 = vtanh.f32 %v2353_v48  ;;  %2055 = vrot.lane.b32.xlu0 %v2041_v44, %s3445_s5  ;;  %v2967_v44 = vld [vmem:[%s4783_s12 + $0x8] sm:$0xff] }
 0xafa   :  { %v3214_v51 = vpop.eup %3213  ;;  %3225 = vtanh.f32 %v2354_v50  ;;  %2553 = vmatpush.bf16.msrb.mxu3 %v2967_v44 }
 0xafb   :  { %v3216_v56 = vpop.eup %3215  ;;  %3227 = vtanh.f32 %v2355_v34  ;;  %2467 = vst.msk [vmem:[#allocation2 + $0x38] sm:$0x80] %vm2459_vm8, %v3214_v51  ;;  %v2966_v51 = vld [vmem:[%s4783_s12] sm:$0xff] }
 0xafc   :  { %v3218_v28 = vpop.eup %3217  ;;  %2460 = vst.msk [vmem:[#allocation2] sm:$0x80] %vm2459_vm8, %v3216_v56  ;;  %2057 = vrot.lane.b32.xlu1 %v2042_v52, %s3445_s5  ;;  %v2515_v56 = vpack.c.bf16 %v4042_v55, %v4015_v49 }
 0xafd   :  { %v3220_v61 = vpop.eup %3219  ;;  %2461 = vst.msk [vmem:[#allocation2 + $0x8] sm:$0x80] %vm2459_vm8, %v3218_v28  ;;  %v2516_v28 = vpack.c.bf16 %v4082_v14, %v4023_v30 }
 0xafe   :  { %v3222_v57 = vpop.eup %3221  ;;  %2462 = vst.msk [vmem:[#allocation2 + $0x10] sm:$0x80] %vm2459_vm8, %v3220_v61  ;;  %2554 = vmatpush.bf16.msrb.mxu3 %v2966_v51  ;;  %v2517_v61 = vpack.c.bf16 %v4096_v53, %v4039_v17 }
 0xaff   :  { %v3224_v19 = vpop.eup %3223  ;;  %2463 = vst.msk [vmem:[#allocation2 + $0x18] sm:$0x80] %vm2459_vm8, %v3222_v57  ;;  %v2518_v57 = vpack.c.bf16 %v4129_v20, %v4045_v59 }
 0xb00   :  { %v3226_v11 = vpop.eup %3225  ;;  %2464 = vst.msk [vmem:[#allocation2 + $0x20] sm:$0x80] %vm2459_vm8, %v3224_v19 }
 0xb01   :  { %v3228_v13 = vpop.eup %3227  ;;  %2465 = vst.msk [vmem:[#allocation2 + $0x28] sm:$0x80] %vm2459_vm8, %v3226_v11 }
 0xb02   :  { %2466 = vst.msk [vmem:[#allocation2 + $0x30] sm:$0x80] %vm2459_vm8, %v3228_v13 }
 0xb45   :  { %v2050_v4 = vpop.permute.xlu2 %2049 }
 0xb46   :  { %v2070_v9 = vadd.f32 %v2050_v4, %v4091_v45 }
 0xb48   :  { %3229 = vtanh.f32 %v2070_v9 }
 0xb4d   :  { %v2054_v12 = vpop.permute.xlu2 %2053 }
 0xb4e   :  { %v3230_v60 = vpop.eup %3229  ;;  %v2072_v46 = vadd.f32 %v2054_v12, %v4108_v40 }
 0xb4f   :  { %2096 = vst.msk [vmem:[#allocation2 + $0x18] sm:$0x4] %vm2092_vm3, %v3230_v60  ;;  %v2189_v0 = vrot.slane %v3230_v60, 7 }
 0xb50   :  { %3231 = vtanh.f32 %v2072_v46 }
 0xb56   :  { %v3232_v15 = vpop.eup %3231 }
 0xb57   :  { %2098 = vst.msk [vmem:[#allocation2 + $0x28] sm:$0x4] %vm2092_vm3, %v3232_v15  ;;  %v2193_v41 = vrot.slane %v3232_v15, 5 }
 0xb5b   :  { %v2048_v2 = vpop.permute.xlu0 %2047 }
 0xb5c   :  { %v2069_v7 = vadd.f32 %v2048_v2, %v4086_v63 }
 0xb5d   :  { %v2046_v16 = vpop.permute.xlu1 %2045 }
 0xb5e   :  { %3233 = vtanh.f32 %v2069_v7  ;;  %v2068_v54 = vadd.f32 %v2046_v16, %v4058_v10 }
 0xb60   :  { %3235 = vtanh.f32 %v2068_v54 }
 0xb63   :  { %v2044_v24 = vpop.permute.xlu0 %2043 }
 0xb64   :  { %v3234_v25 = vpop.eup %3233  ;;  %v2067_v26 = vadd.f32 %v2044_v24, %v4053_v32 }
 0xb65   :  { %2095 = vst.msk [vmem:[#allocation2 + $0x10] sm:$0x4] %vm2092_vm3, %v3234_v25 }
 0xb66   :  { %v3236_v8 = vpop.eup %3235  ;;  %3237 = vtanh.f32 %v2067_v26  ;;  %v2052_v62 = vpop.permute.xlu1 %2051 }
 0xb67   :  { %2094 = vst.msk [vmem:[#allocation2 + $0x8] sm:$0x4] %vm2092_vm3, %v3236_v8  ;;  %v2071_v21 = vadd.f32 %v2052_v62, %v4101_v31  ;;  %v2186_v33 = vrot.slane %v3236_v8, 1 }
 0xb69   :  { %3239 = vtanh.f32 %v2071_v21 }
 0xb6b   :  { %v2056_v3 = vpop.permute.xlu0 %2055 }
 0xb6c   :  { %v3238_v22 = vpop.eup %3237  ;;  %v2073_v29 = vadd.f32 %v2056_v3, %v4133_v58 }
 0xb6d   :  { %2093 = vst.msk [vmem:[#allocation2] sm:$0x4] %vm2092_vm3, %v3238_v22  ;;  %v2185_v36 = vrot.slane %v3238_v22, 2 }
 0xb6e   :  { %3241 = vtanh.f32 %v2073_v29  ;;  %v2058_v37 = vpop.permute.xlu1 %2057 }
 0xb6f   :  { %v3240_v38 = vpop.eup %3239  ;;  %v2187_v1 = vsel %vm1163_vm6, %v2186_v33, %v2185_v36  ;;  %v2074_v18 = vadd.f32 %v2058_v37, %v4139_v23 }
 0xb70   :  { %2097 = vst.msk [vmem:[#allocation2 + $0x20] sm:$0x4] %vm2092_vm3, %v3240_v38  ;;  %v2191_v35 = vrot.slane %v3240_v38, 6  ;;  %v2188_v5 = vsel %vm1166_vm13, %v3234_v25, %v2187_v1 }
 0xb71   :  { %3243 = vtanh.f32 %v2074_v18  ;;  %v2190_v39 = vsel %vm1169_vm1, %v2189_v0, %v2188_v5 }
 0xb72   :  { %v2192_v6 = vsel %vm1172_vm9, %v2191_v35, %v2190_v39 }
 0xb73   :  { %v2194_v43 = vsel %vm1175_vm10, %v2193_v41, %v2192_v6 }
 0xb74   :  { %v3242_v27 = vpop.eup %3241 }
 0xb75   :  { %2099 = vst.msk [vmem:[#allocation2 + $0x30] sm:$0x4] %vm2092_vm3, %v3242_v27  ;;  %v2195_v42 = vrot.slane %v3242_v27, 4 }
 0xb77   :  { %v3244_v47 = vpop.eup %3243  ;;  %v2196_v48 = vsel %vm1178_vm11, %v2195_v42, %v2194_v43 }
 0xb78   :  { %2100 = vst.msk [vmem:[#allocation2 + $0x38] sm:$0x4] %vm2092_vm3, %v3244_v47  ;;  %v2197_v50 = vrot.slane %v3244_v47, 3 }
 0xb7a   :  { %v2198_v34 = vsel %vm1181_vm12, %v2197_v50, %v2196_v48 }
 0xb7b   :  { %2199 = vrot.lane.b32.xlu2 %v2198_v34, %s3447_s1 }
 0xbd5   :  { %v2200_v52 = vpop.permute.xlu2 %2199 }
 0xbd6   :  { %2923 = vmatmul.msk.f32.vlgmr.msra.gmra.mxu3 %vm360_vm2, %v2200_v52 }
 0xbde   :  { %2934 = vmatmul.msk.bf16.vlgmr.msrb.gmra.mxu3 %vm214_vm0, %v2515_v56 }
 0xbee   :  { %2935 = vmatmul.msk.bf16.gmra.mxu3 %vm214_vm0, %v2516_v28 }
 0xbfe   :  { %2936 = vmatmul.msk.bf16.gmra.mxu3 %vm214_vm0, %v2517_v61 }
 0xc0e   :  { %2937 = vmatmul.msk.bf16.gmra.mxu3 %vm214_vm0, %v2518_v57 }
 0xc59   :  { %v2220_v19 = vpop.f32.mrf.mxu3 }
 0xc5a   :  { %2233 = vrot.lane.b32.xlu2 %v2220_v19, %s3445_s5  ;;  %v2225_v49 = vrot.slane %v2220_v19, 1  ;;  %v2224_v55 = vrot.slane %v2220_v19, 7  ;;  %v2228_v30 = vrot.slane %v2220_v19, 4  ;;  %v2227_v17 = vrot.slane %v2220_v19, 3 }
 0xc5b   :  { %v2226_v14 = vrot.slane %v2220_v19, 2  ;;  %v2230_v59 = vrot.slane %v2220_v19, 6  ;;  %v2229_v53 = vrot.slane %v2220_v19, 5 }
 0xc5c   :  { %2235 = vrot.lane.b32.xlu1 %v2225_v49, %s3445_s5  ;;  %2231 = vrot.lane.b32.xlu0 %v2224_v55, %s3445_s5 }
 0xc62   :  { %2241 = vrot.lane.b32.xlu2 %v2228_v30, %s3445_s5 }
 0xc64   :  { %2239 = vrot.lane.b32.xlu1 %v2227_v17, %s3445_s5  ;;  %2237 = vrot.lane.b32.xlu0 %v2226_v14, %s3445_s5  ;;  %v2965_v17 = vld [vmem:[#allocation10] sm:$0xff] }
 0xc65   :  { %2601 = vmatpush.bf16.msrb.mxu1 %v2965_v17 }
 0xc6c   :  { %2245 = vrot.lane.b32.xlu1 %v2230_v59, %s3445_s5  ;;  %2243 = vrot.lane.b32.xlu0 %v2229_v53, %s3445_s5 }
 0xcb4   :  { %v2234_v20 = vpop.permute.xlu2 %2233 }
 0xcb5   :  { %v2256_v11 = vadd.f32 %v2234_v20, %v4058_v10 }
 0xcb7   :  { %3245 = vtanh.f32 %v2256_v11 }
 0xcbc   :  { %v2242_v13 = vpop.permute.xlu2 %2241 }
 0xcbd   :  { %v3246_v4 = vpop.eup %3245  ;;  %v2260_v9 = vadd.f32 %v2242_v13, %v4108_v40 }
 0xcbe   :  { %2282 = vst.msk [vmem:[#allocation2 + $0x8] sm:$0x2] %vm2280_vm14, %v3246_v4 }
 0xcbf   :  { %3247 = vtanh.f32 %v2260_v9 }
 0xcc5   :  { %v3248_v12 = vpop.eup %3247 }
 0xcc6   :  { %2286 = vst.msk [vmem:[#allocation2 + $0x28] sm:$0x2] %vm2280_vm14, %v3248_v12  ;;  %v2381_v6 = vrot.slane %v3248_v12, 4 }
 0xcce   :  { %v2236_v60 = vpop.permute.xlu1 %2235  ;;  %v2232_v46 = vpop.permute.xlu0 %2231 }
 0xccf   :  { %v2257_v15 = vadd.f32 %v2236_v60, %v4086_v63  ;;  %v2255_v2 = vadd.f32 %v2232_v46, %v4053_v32 }
 0xcd1   :  { %3249 = vtanh.f32 %v2257_v15 }
 0xcd2   :  { %3251 = vtanh.f32 %v2255_v2 }
 0xcd6   :  { %v2240_v7 = vpop.permute.xlu1 %2239  ;;  %v2238_v16 = vpop.permute.xlu0 %2237 }
 0xcd7   :  { %v3250_v54 = vpop.eup %3249  ;;  %v2259_v24 = vadd.f32 %v2240_v7, %v4101_v31  ;;  %v2258_v25 = vadd.f32 %v2238_v16, %v4091_v45 }
 0xcd8   :  { %v3252_v26 = vpop.eup %3251  ;;  %2283 = vst.msk [vmem:[#allocation2 + $0x10] sm:$0x2] %vm2280_vm14, %v3250_v54  ;;  %v2375_v22 = vrot.slane %v3250_v54, 7 }
 0xcd9   :  { %2281 = vst.msk [vmem:[#allocation2] sm:$0x2] %vm2280_vm14, %v3252_v26  ;;  %3253 = vtanh.f32 %v2259_v24  ;;  %v2373_v8 = vrot.slane %v3252_v26, 1 }
 0xcda   :  { %3255 = vtanh.f32 %v2258_v25 }
 0xcdb   :  { %v2374_v37 = vsel %vm1163_vm6, %v3246_v4, %v2373_v8 }
 0xcdc   :  { %v2376_v1 = vsel %vm1166_vm13, %v2375_v22, %v2374_v37 }
 0xcde   :  { %v2246_v62 = vpop.permute.xlu1 %2245  ;;  %v2244_v21 = vpop.permute.xlu0 %2243 }
 0xcdf   :  { %v3254_v3 = vpop.eup %3253  ;;  %v2262_v29 = vadd.f32 %v2246_v62, %v4139_v23  ;;  %v2261_v33 = vadd.f32 %v2244_v21, %v4133_v58 }
 0xce0   :  { %v3256_v36 = vpop.eup %3255  ;;  %2285 = vst.msk [vmem:[#allocation2 + $0x20] sm:$0x2] %vm2280_vm14, %v3254_v3  ;;  %v2379_v0 = vrot.slane %v3254_v3, 5 }
 0xce1   :  { %2284 = vst.msk [vmem:[#allocation2 + $0x18] sm:$0x2] %vm2280_vm14, %v3256_v36  ;;  %v2377_v38 = vrot.slane %v3256_v36, 6  ;;  %3257 = vtanh.f32 %v2262_v29 }
 0xce2   :  { %3259 = vtanh.f32 %v2261_v33 }
 0xce3   :  { %v2378_v18 = vsel %vm1169_vm1, %v2377_v38, %v2376_v1 }
 0xce4   :  { %v2380_v5 = vsel %vm1172_vm9, %v2379_v0, %v2378_v18 }
 0xce5   :  { %v2382_v42 = vsel %vm1175_vm10, %v2381_v6, %v2380_v5 }
 0xce7   :  { %v3258_v35 = vpop.eup %3257 }
 0xce8   :  { %v3260_v39 = vpop.eup %3259  ;;  %2288 = vst.msk [vmem:[#allocation2 + $0x38] sm:$0x2] %vm2280_vm14, %v3258_v35  ;;  %v2385_v27 = vrot.slane %v3258_v35, 2 }
 0xce9   :  { %2287 = vst.msk [vmem:[#allocation2 + $0x30] sm:$0x2] %vm2280_vm14, %v3260_v39  ;;  %v2383_v41 = vrot.slane %v3260_v39, 3 }
 0xceb   :  { %v2384_v43 = vsel %vm1178_vm11, %v2383_v41, %v2382_v42 }
 0xcec   :  { %v2386_v47 = vsel %vm1181_vm12, %v2385_v27, %v2384_v43  ;;  %v2556_v43 = vpop.f32.mrf.mxu3 }
 0xced   :  { %2387 = vrot.lane.b32.xlu2 %v2386_v47, %s3447_s1  ;;  %s3450_s1 = smov 96  }
 0xcf4   :  { %v2558_v47 = vpop.f32.mrf.mxu3 }
 0xd47   :  { %v2388_v48 = vpop.permute.xlu2 %2387 }
 0xd48   :  { %2925 = vmatmul.msk.f32.vlgmr.msra.gmra.mxu2 %vm360_vm2, %v2388_v48  ;;  %vm2468_vm2 = vcmask 122944  }
 0xdcb   :  { %v2408_v50 = vpop.f32.mrf.mxu2 }
 0xdcc   :  { %2419 = vrot.lane.b32.xlu0 %v2408_v50, %s3445_s5  ;;  %v2413_v34 = vrot.slane %v2408_v50, 2  ;;  %v2412_v44 = vrot.slane %v2408_v50, 1  ;;  %v2414_v51 = vrot.slane %v2408_v50, 3  ;;  %v2416_v52 = vrot.slane %v2408_v50, 5 }
 0xdcd   :  { %v2415_v56 = vrot.slane %v2408_v50, 4  ;;  %v2417_v28 = vrot.slane %v2408_v50, 6  ;;  %v2418_v61 = vrot.slane %v2408_v50, 7  ;;  %v2561_v50 = vpop.f32.mrf.mxu3 }
 0xdce   :  { %2423 = vrot.lane.b32.xlu2 %v2413_v34, %s3445_s5  ;;  %2421 = vrot.lane.b32.xlu1 %v2412_v44, %s3445_s5 }
 0xdd4   :  { %2425 = vrot.lane.b32.xlu0 %v2414_v51, %s3445_s5 }
 0xdd5   :  { %v2563_v44 = vpop.f32.mrf.mxu3 }
 0xdd6   :  { %2429 = vrot.lane.b32.xlu2 %v2416_v52, %s3445_s5  ;;  %2427 = vrot.lane.b32.xlu1 %v2415_v56, %s3445_s5  ;;  %v4614_v56 = vld [vmem:[%s4784_s13] ss:$0 sm:$0xff]  ;;  %s3449_s13 = smov 32  }
 0xddc   :  { %2431 = vrot.lane.b32.xlu0 %v2417_v28, %s3445_s5 }
 0xdde   :  { %2433 = vrot.lane.b32.xlu1 %v2418_v61, %s3445_s5 }
 0xe28   :  { %v2424_v57 = vpop.permute.xlu2 %2423 }
 0xe29   :  { %v2445_v19 = vadd.f32 %v2424_v57, %v4086_v63 }
 0xe2b   :  { %3261 = vtanh.f32 %v2445_v19  ;;  %v2566_v19 = vpop.f32.mrf.mxu3 }
 0xe30   :  { %v2430_v49 = vpop.permute.xlu2 %2429 }
 0xe31   :  { %v3262_v55 = vpop.eup %3261  ;;  %v2448_v30 = vadd.f32 %v2430_v49, %v4108_v40 }
 0xe32   :  { %2471 = vst.msk [vmem:[#allocation2 + $0x10] sm:$0x1] %vm2468_vm2, %v3262_v55 }
 0xe33   :  { %3263 = vtanh.f32 %v2448_v30 }
 0xe39   :  { %v3264_v14 = vpop.eup %3263 }
 0xe3a   :  { %2474 = vst.msk [vmem:[#allocation2 + $0x28] sm:$0x1] %vm2468_vm2, %v3264_v14 }
 0xe3e   :  { %v2420_v59 = vpop.permute.xlu0 %2419 }
 0xe3f   :  { %v2443_v53 = vadd.f32 %v2420_v59, %v4053_v32 }
 0xe40   :  { %v2422_v20 = vpop.permute.xlu1 %2421 }
 0xe41   :  { %3265 = vtanh.f32 %v2443_v53  ;;  %v2444_v63 = vadd.f32 %v2422_v20, %v4058_v10  ;;  %v2482_v36 = vld [vmem:[#allocation2 + $0x28] sm:$0xff] }
 0xe42   :  { %v2498_v38 = vmul.f32 0.01, %v2482_v36  ;;  %vm2490_vm14 = vcmp.gt.f32.partialorder %v2482_v36, 0.0 }
 0xe43   :  { %3267 = vtanh.f32 %v2444_v63  ;;  %v2568_v63 = vpop.f32.mrf.mxu3 }
 0xe44   :  { %v2506_v1 = vsel %vm2490_vm14, %v2482_v36, %v2498_v38 }
 0xe46   :  { %v2426_v11 = vpop.permute.xlu0 %2425 }
 0xe47   :  { %v3266_v13 = vpop.eup %3265  ;;  %v2446_v40 = vadd.f32 %v2426_v11, %v4091_v45 }
 0xe48   :  { %2469 = vst.msk [vmem:[#allocation2] sm:$0x1] %vm2468_vm2, %v3266_v13  ;;  %v2428_v4 = vpop.permute.xlu1 %2427 }
 0xe49   :  { %v3268_v9 = vpop.eup %3267  ;;  %3269 = vtanh.f32 %v2446_v40  ;;  %v2447_v12 = vadd.f32 %v2428_v4, %v4101_v31 }
 0xe4a   :  { %2470 = vst.msk [vmem:[#allocation2 + $0x8] sm:$0x1] %vm2468_vm2, %v3268_v9 }
 0xe4b   :  { %3271 = vtanh.f32 %v2447_v12 }
 0xe4e   :  { %v2432_v32 = vpop.permute.xlu0 %2431 }
 0xe4f   :  { %v3270_v60 = vpop.eup %3269  ;;  %v2449_v46 = vadd.f32 %v2432_v32, %v4133_v58  ;;  %v2477_v10 = vld [vmem:[#allocation2] sm:$0xff] }
 0xe50   :  { %2472 = vst.msk [vmem:[#allocation2 + $0x18] sm:$0x1] %vm2468_vm2, %v3270_v60  ;;  %v2434_v15 = vpop.permute.xlu1 %2433  ;;  %v2493_v2 = vmul.f32 0.01, %v2477_v10  ;;  %vm2485_vm15 = vcmp.gt.f32.partialorder %v2477_v10, 0.0 }
 0xe51   :  { %v3272_v45 = vpop.eup %3271  ;;  %3273 = vtanh.f32 %v2449_v46  ;;  %v2450_v7 = vadd.f32 %v2434_v15, %v4139_v23  ;;  %v2478_v16 = vld [vmem:[#allocation2 + $0x8] sm:$0xff]  ;;  %v2479_v23 = vld [vmem:[#allocation2 + $0x10] sm:$0xff] }
 0xe52   :  { %2473 = vst.msk [vmem:[#allocation2 + $0x20] sm:$0x1] %vm2468_vm2, %v3272_v45  ;;  %vm2486_vm5 = vcmp.gt.f32.partialorder %v2478_v16, 0.0  ;;  %v2494_v31 = vmul.f32 0.01, %v2478_v16  ;;  %v2501_v54 = vsel %vm2485_vm15, %v2477_v10, %v2493_v2  ;;  %vm2487_vm8 = vcmp.gt.f32.partialorder %v2479_v23, 0.0 }
 0xe53   :  { %3275 = vtanh.f32 %v2450_v7  ;;  %v2495_v21 = vmul.f32 0.01, %v2479_v23 }
 0xe54   :  { %v2502_v24 = vsel %vm2486_vm5, %v2478_v16, %v2494_v31  ;;  %v2571_v16 = vpop.f32.mrf.mxu3 }
 0xe55   :  { %v2509_v25 = vpack.c.bf16 %v2502_v24, %v2501_v54  ;;  %v2503_v22 = vsel %vm2487_vm8, %v2479_v23, %v2495_v21 }
 0xe57   :  { %v3274_v58 = vpop.eup %3273  ;;  %2942 = vmatmul.msk.bf16.vlgmr.msrb.gmra.mxu1 %vm160_vm4, %v2509_v25  ;;  %v2480_v8 = vld [vmem:[#allocation2 + $0x18] sm:$0xff] }
 0xe58   :  { %2475 = vst.msk [vmem:[#allocation2 + $0x30] sm:$0x1] %vm2468_vm2, %v3274_v58  ;;  %v2496_v62 = vmul.f32 0.01, %v2480_v8  ;;  %vm2488_vm7 = vcmp.gt.f32.partialorder %v2480_v8, 0.0 }
 0xe59   :  { %v3276_v26 = vpop.eup %3275  ;;  %v2481_v33 = vld [vmem:[#allocation2 + $0x20] sm:$0xff] }
 0xe5a   :  { %2476 = vst.msk [vmem:[#allocation2 + $0x38] sm:$0x1] %vm2468_vm2, %v3276_v26  ;;  %v2504_v3 = vsel %vm2488_vm7, %v2480_v8, %v2496_v62  ;;  %v2497_v37 = vmul.f32 0.01, %v2481_v33  ;;  %vm2489_vm3 = vcmp.gt.f32.partialorder %v2481_v33, 0.0 }
 0xe5b   :  { %v2510_v29 = vpack.c.bf16 %v2504_v3, %v2503_v22 }
 0xe5c   :  { %v2505_v0 = vsel %vm2489_vm3, %v2481_v33, %v2497_v37 }
 0xe5d   :  { %v2511_v18 = vpack.c.bf16 %v2506_v1, %v2505_v0 }
 0xe5f   :  { %v2483_v5 = vld [vmem:[#allocation2 + $0x30] sm:$0xff] }
 0xe60   :  { %v2499_v6 = vmul.f32 0.01, %v2483_v5  ;;  %vm2491_vm15 = vcmp.gt.f32.partialorder %v2483_v5, 0.0 }
 0xe61   :  { %v2484_v35 = vld [vmem:[#allocation2 + $0x38] sm:$0xff] }
 0xe62   :  { %v2500_v39 = vmul.f32 0.01, %v2484_v35  ;;  %vm2492_vm2 = vcmp.gt.f32.partialorder %v2484_v35, 0.0  ;;  %v2507_v41 = vsel %vm2491_vm15, %v2483_v5, %v2499_v6 }
 0xe64   :  { %v2508_v27 = vsel %vm2492_vm2, %v2484_v35, %v2500_v39 }
 0xe65   :  { %v2512_v42 = vpack.c.bf16 %v2508_v27, %v2507_v41 }
 0xe67   :  { %2943 = vmatmul.msk.bf16.gmra.mxu1 %vm160_vm4, %v2510_v29 }
 0xe77   :  { %2944 = vmatmul.msk.bf16.gmra.mxu1 %vm160_vm4, %v2511_v18 }
 0xe87   :  { %2945 = vmatmul.msk.bf16.gmra.mxu1 %vm160_vm4, %v2512_v42 }
 0xed4   :  { %v2603_v48 = vpop.f32.mrf.mxu1 }
 0xed5   :  { %v2604_v52 = vadd.f32 %v2603_v48, %v2556_v43 }
 0xed7   :  { %v2627_v61 = vadd.f32 %v4614_v56, %v2604_v52 }
 0xed9   :  { %v2643_v55 = vmul.f32 1.442695, %v2627_v61  ;;  %vm2635_vm4 = vcmp.gt.f32.partialorder %v2627_v61, 0.0 }
 0xedb   :  { %3277 = vpow2.f32 %v2643_v55 }
 0xedc   :  { %v2605_v34 = vpop.f32.mrf.mxu1 }
 0xedd   :  { %v2606_v28 = vadd.f32 %v2605_v34, %v2558_v47  ;;  %v2573_v34 = vpop.f32.mrf.mxu3 }
 0xedf   :  { %v2628_v49 = vadd.f32 %v4614_v56, %v2606_v28 }
 0xee1   :  { %v2645_v17 = vmul.f32 1.442695, %v2628_v49  ;;  %v3278_v40 = vpop.eup %3277  ;;  %vm2636_vm5 = vcmp.gt.f32.partialorder %v2628_v49, 0.0 }
 0xee2   :  { %v2946_v32 = vadd.f32 -1.0, %v3278_v40 }
 0xee3   :  { %3279 = vpow2.f32 %v2645_v17 }
 0xee4   :  { %v2608_v51 = vpop.f32.mrf.mxu1  ;;  %v2667_v45 = vsel %vm2635_vm4, %v2627_v61, %v2946_v32 }
 0xee5   :  { %v2609_v30 = vadd.f32 %v2608_v51, %v2561_v50  ;;  %v2772_v25 = vrot.slane %v2667_v45, 5  ;;  %v2718_v8 = vrot.slane %v2667_v45, 2  ;;  %v2699_v23 = vrot.slane %v2667_v45, 1 }
 0xee6   :  { %v2737_v3 = vrot.slane %v2667_v45, 3  ;;  %v2808_v38 = vrot.slane %v2667_v45, 7  ;;  %v2790_v0 = vrot.slane %v2667_v45, 6  ;;  %v2756_v6 = vrot.slane %v2667_v45, 4 }
 0xee7   :  { %v2629_v14 = vadd.f32 %v4614_v56, %v2609_v30 }
 0xee9   :  { %v2647_v11 = vmul.f32 1.442695, %v2629_v14  ;;  %v3280_v9 = vpop.eup %3279  ;;  %vm2637_vm7 = vcmp.gt.f32.partialorder %v2629_v14, 0.0 }
 0xeea   :  { %v2947_v10 = vadd.f32 -1.0, %v3280_v9 }
 0xeeb   :  { %3281 = vpow2.f32 %v2647_v11 }
 0xeec   :  { %v2610_v57 = vpop.f32.mrf.mxu1  ;;  %v2668_v31 = vsel %vm2636_vm5, %v2628_v49, %v2947_v10 }
 0xeed   :  { %v2611_v53 = vadd.f32 %v2610_v57, %v2563_v44  ;;  %v2773_v62 = vrot.slane %v2668_v31, 4  ;;  %v2719_v21 = vrot.slane %v2668_v31, 1  ;;  %v2738_v22 = vrot.slane %v2668_v31, 2 }
 0xeee   :  { %v2809_v36 = vrot.slane %v2668_v31, 6  ;;  %v2791_v37 = vrot.slane %v2668_v31, 5  ;;  %v2683_v1 = vrot.slane %v2668_v31, 7  ;;  %v2700_v39 = vsel %vm1163_vm6, %v2668_v31, %v2699_v23 }
 0xeef   :  { %v4620_v13 = vadd.f32 %v4614_v56, %v2611_v53  ;;  %v2774_v41 = vsel %vm1163_vm6, %v2773_v62, %v2772_v25  ;;  %v2720_v42 = vsel %vm1163_vm6, %v2719_v21, %v2718_v8  ;;  %v2757_v43 = vrot.slane %v2668_v31, 3 }
 0xef0   :  { %v4638_v47 = vsel %vm1163_vm6, %v2738_v22, %v2737_v3  ;;  %v4641_v48 = vsel %vm1163_vm6, %v2809_v36, %v2808_v38  ;;  %v4644_v50 = vsel %vm1163_vm6, %v2791_v37, %v2790_v0  ;;  %v2684_v61 = vsel %vm1163_vm6, %v2683_v1, %v2667_v45 }
 0xef1   :  { %v2649_v60 = vmul.f32 1.442695, %v4620_v13  ;;  %v3282_v7 = vpop.eup %3281  ;;  %vm2638_vm8 = vcmp.gt.f32.partialorder %v4620_v13, 0.0 }
 0xef2   :  { %v2948_v58 = vadd.f32 -1.0, %v3282_v7 }
 0xef3   :  { %3283 = vpow2.f32 %v2649_v60 }
 0xef4   :  { %v2613_v59 = vpop.f32.mrf.mxu1  ;;  %v4632_v35 = vsel %vm2637_vm7, %v2629_v14, %v2948_v58 }
 0xef5   :  { %v2614_v20 = vadd.f32 %v2613_v59, %v2566_v19  ;;  %v2775_v52 = vrot.slane %v4632_v35, 3  ;;  %v2701_v28 = vrot.slane %v4632_v35, 7  ;;  %v2685_v49 = vrot.slane %v4632_v35, 6 }
 0xef6   :  { %v2759_v55 = vrot.slane %v4632_v35, 2  ;;  %v2721_v17 = vsel %vm1166_vm13, %v4632_v35, %v2720_v42  ;;  %v2740_v14 = vrot.slane %v4632_v35, 1  ;;  %v2758_v59 = vsel %vm1163_vm6, %v2757_v43, %v2756_v6 }
 0xef7   :  { %v4623_v4 = vadd.f32 %v4614_v56, %v2614_v20  ;;  %v2811_v20 = vrot.slane %v4632_v35, 5  ;;  %v2776_v40 = vsel %vm1166_vm13, %v2775_v52, %v2774_v41  ;;  %v2702_v9 = vsel %vm1166_vm13, %v2701_v28, %v2700_v39 }
 0xef9   :  { %v2651_v15 = vmul.f32 1.442695, %v4623_v4  ;;  %v3284_v29 = vpop.eup %3283  ;;  %vm2639_vm3 = vcmp.gt.f32.partialorder %v4623_v4, 0.0 }
 0xefa   :  { %v2949_v27 = vadd.f32 -1.0, %v3284_v29 }
 0xefb   :  { %3285 = vpow2.f32 %v2651_v15 }
 0xefc   :  { %v2615_v12 = vpop.f32.mrf.mxu1  ;;  %v4653_v30 = vsel %vm2638_vm8, %v4620_v13, %v2949_v27 }
 0xefd   :  { %v2616_v46 = vadd.f32 %v2615_v12, %v2568_v63  ;;  %v2793_v63 = vrot.slane %v4632_v35, 4  ;;  %v2777_v60 = vrot.slane %v4653_v30, 2  ;;  %v2722_v15 = vrot.slane %v4653_v30, 7 }
 0xefe   :  { %v2703_v45 = vrot.slane %v4653_v30, 6 }
 0xeff   :  { %v4628_v2 = vadd.f32 %v4614_v56, %v2616_v46  ;;  %v2686_v46 = vsel %vm1166_vm13, %v2685_v49, %v2684_v61  ;;  %v2778_v23 = vsel %vm1169_vm1, %v2777_v60, %v2776_v40  ;;  %v2723_v62 = vsel %vm1169_vm1, %v2722_v15, %v2721_v17 }
 0xf01   :  { %v2653_v54 = vmul.f32 1.442695, %v4628_v2  ;;  %v3286_v18 = vpop.eup %3285  ;;  %vm2640_vm6 = vcmp.gt.f32.partialorder %v4628_v2, 0.0 }
 0xf02   :  { %v2950_v44 = vadd.f32 -1.0, %v3286_v18 }
 0xf03   :  { %3287 = vpow2.f32 %v2653_v54 }
 0xf04   :  { %v2618_v24 = vpop.f32.mrf.mxu1  ;;  %v4664_v11 = vsel %vm2639_vm3, %v4623_v4, %v2950_v44  ;;  %v2687_v4 = vrot.slane %v4653_v30, 5 }
 0xf05   :  { %v2619_v26 = vadd.f32 %v2618_v24, %v2571_v16  ;;  %v2779_v7 = vrot.slane %v4664_v11, 1  ;;  %v2761_v16 = vrot.slane %v4653_v30, 1  ;;  %v2724_v54 = vrot.slane %v4664_v11, 6 }
 0xf06   :  { %v2813_v24 = vrot.slane %v4653_v30, 4  ;;  %v2705_v58 = vrot.slane %v4664_v11, 5  ;;  %v2689_v8 = vrot.slane %v4664_v11, 4  ;;  %v2688_v21 = vsel %vm1169_vm1, %v2687_v4, %v2686_v46 }
 0xf07   :  { %v2633_v33 = vadd.f32 %v4614_v56, %v2619_v26  ;;  %v2795_v26 = vrot.slane %v4653_v30, 3  ;;  %v2780_v3 = vsel %vm1172_vm9, %v2779_v7, %v2778_v23  ;;  %v2725_v37 = vsel %vm1172_vm9, %v2724_v54, %v2723_v62 }
 0xf08   :  { %v2690_v39 = vsel %vm1172_vm9, %v2689_v8, %v2688_v21  ;;  %v2743_v46 = vrot.slane %v4664_v11, 7  ;;  %v2794_v62 = vsel %vm1166_vm13, %v2793_v63, %v4644_v50 }
 0xf09   :  { %v2655_v5 = vmul.f32 1.442695, %v2633_v33  ;;  %v3288_v57 = vpop.eup %3287  ;;  %vm2641_vm14 = vcmp.gt.f32.partialorder %v2633_v33, 0.0 }
 0xf0a   :  { %v2951_v13 = vadd.f32 -1.0, %v3288_v57 }
 0xf0b   :  { %3289 = vpow2.f32 %v2655_v5 }
 0xf0c   :  { %v2620_v51 = vpop.f32.mrf.mxu1  ;;  %v4678_v31 = vsel %vm2640_vm6, %v4628_v2, %v2951_v13  ;;  %v2704_v2 = vsel %vm1169_vm1, %v2703_v45, %v2702_v9  ;;  %v2741_v45 = vsel %vm1166_vm13, %v2740_v14, %v4638_v47 }
 0xf0d   :  { %v2621_v19 = vadd.f32 %v2620_v51, %v2573_v34  ;;  %v2726_v22 = vrot.slane %v4678_v31, 5  ;;  %v2707_v29 = vrot.slane %v4678_v31, 4  ;;  %v2691_v38 = vrot.slane %v4678_v31, 3 }
 0xf0e   :  { %v2764_v0 = vrot.slane %v4678_v31, 7  ;;  %v2706_v5 = vsel %vm1172_vm9, %v2705_v58, %v2704_v2  ;;  %v2781_v41 = vsel %vm1175_vm10, %v4678_v31, %v2780_v3  ;;  %v2745_v4 = vrot.slane %v4678_v31, 6 }
 0xf0f   :  { %v2634_v53 = vadd.f32 %v4614_v56, %v2621_v19  ;;  %v2760_v56 = vsel %vm1166_vm13, %v2759_v55, %v2758_v59  ;;  %v2727_v34 = vsel %vm1175_vm10, %v2726_v22, %v2725_v37  ;;  %v2708_v44 = vsel %vm1175_vm10, %v2707_v29, %v2706_v5 }
 0xf10   :  { %v2692_v61 = vsel %vm1175_vm10, %v2691_v38, %v2690_v39  ;;  %v2817_v7 = vrot.slane %v4678_v31, 2  ;;  %v2812_v58 = vsel %vm1166_vm13, %v2811_v20, %v4641_v48  ;;  %v2799_v23 = vrot.slane %v4678_v31, 1 }
 0xf11   :  { %v3290_v12 = vpop.eup %3289  ;;  %v2657_v32 = vmul.f32 1.442695, %v2634_v53  ;;  %vm2642_vm2 = vcmp.gt.f32.partialorder %v2634_v53, 0.0  ;;  %v2742_v47 = vsel %vm1169_vm1, %v4653_v30, %v2741_v45  ;;  %v2796_v31 = vsel %vm1169_vm1, %v2795_v26, %v2794_v62 }
 0xf12   :  { %v2952_v10 = vadd.f32 -1.0, %v3290_v12  ;;  %v2744_v48 = vsel %vm1172_vm9, %v2743_v46, %v2742_v47  ;;  %vm2735_vm13 = vcmask 785920  }
 0xf13   :  { %3291 = vpow2.f32 %v2657_v32  ;;  %v2746_v21 = vsel %vm1175_vm10, %v2745_v4, %v2744_v48 }
 0xf14   :  { %v4682_v25 = vsel %vm2641_vm14, %v2633_v33, %v2952_v10  ;;  %v2762_v33 = vsel %vm1169_vm1, %v2761_v16, %v2760_v56  ;;  %v2815_v56 = vrot.slane %v4664_v11, 3  ;;  %v2797_v16 = vrot.slane %v4664_v11, 2 }
 0xf15   :  { %v2782_v36 = vrot.slane %v4682_v25, 7  ;;  %v2728_v18 = vrot.slane %v4682_v25, 4  ;;  %v2763_v6 = vsel %vm1172_vm9, %v4664_v11, %v2762_v33  ;;  %v2709_v42 = vrot.slane %v4682_v25, 3 }
 0xf16   :  { %v2693_v43 = vrot.slane %v4682_v25, 2  ;;  %v2766_v51 = vrot.slane %v4682_v25, 6  ;;  %v2765_v57 = vsel %vm1175_vm10, %v2764_v0, %v2763_v6  ;;  %v2747_v54 = vrot.slane %v4682_v25, 5 }
 0xf17   :  { %v2783_v28 = vsel %vm1178_vm11, %v2782_v36, %v2781_v41  ;;  %v2729_v49 = vsel %vm1178_vm11, %v2728_v18, %v2727_v34  ;;  %v2710_v59 = vsel %vm1178_vm11, %v2709_v42, %v2708_v44  ;;  %v2819_v8 = vrot.slane %v4682_v25, 1 }
 0xf18   :  { %v2694_v40 = vsel %vm1178_vm11, %v2693_v43, %v2692_v61  ;;  %v2767_v60 = vsel %vm1178_vm11, %v2766_v51, %v2765_v57  ;;  %v2814_v11 = vsel %vm1169_vm1, %v2813_v24, %v2812_v58  ;;  %v2798_v24 = vsel %vm1172_vm9, %v2797_v16, %v2796_v31 }
 0xf19   :  { %v3292_v1 = vpop.eup %3291  ;;  %v2816_v20 = vsel %vm1172_vm9, %v2815_v56, %v2814_v11  ;;  %v2748_v22 = vsel %vm1178_vm11, %v2747_v54, %v2746_v21  ;;  %v2800_v50 = vsel %vm1175_vm10, %v2799_v23, %v2798_v24  ;;  %vm2754_vm1 = vcmask 1048320  }
 0xf1a   :  { %v2953_v27 = vadd.f32 -1.0, %v3292_v1  ;;  %v2818_v3 = vsel %vm1175_vm10, %v2817_v7, %v2816_v20  ;;  %v2801_v30 = vsel %vm1178_vm11, %v4682_v25, %v2800_v50 }
 0xf1b   :  { %v2820_v35 = vsel %vm1178_vm11, %v2819_v8, %v2818_v3 }
 0xf1c   :  { %v2674_v52 = vsel %vm2642_vm2, %v2634_v53, %v2953_v27 }
 0xf1d   :  { %v2784_v19 = vrot.slane %v2674_v52, 6  ;;  %v2730_v55 = vrot.slane %v2674_v52, 3  ;;  %v2711_v17 = vrot.slane %v2674_v52, 2  ;;  %v2695_v13 = vrot.slane %v2674_v52, 1 }
 0xf1e   :  { %v2768_v9 = vrot.slane %v2674_v52, 5  ;;  %v2749_v14 = vrot.slane %v2674_v52, 4  ;;  %v2802_v2 = vrot.slane %v2674_v52, 7  ;;  %v2821_v29 = vsel %vm1181_vm12, %v2674_v52, %v2820_v35 }
 0xf1f   :  { %v2785_v12 = vsel %vm1181_vm12, %v2784_v19, %v2783_v28  ;;  %v2731_v53 = vsel %vm1181_vm12, %v2730_v55, %v2729_v49  ;;  %v2712_v32 = vsel %vm1181_vm12, %v2711_v17, %v2710_v59  ;;  %v2696_v10 = vsel %vm1181_vm12, %v2695_v13, %v2694_v40 }
 0xf20   :  { %2786 = vrot.lane.b32.xlu0 %v2785_v12, %s3449_s13  ;;  %2732 = vrot.lane.b32.xlu1 %v2731_v53, %s3441_s21  ;;  %v2769_v15 = vsel %vm1181_vm12, %v2768_v9, %v2767_v60  ;;  %2698 = vst.msk [vmem:[#allocation13] sm:$0xff] %vm214_vm0, %v2696_v10  ;;  %v2750_v63 = vsel %vm1181_vm12, %v2749_v14, %v2748_v22 }
 0xf21   :  { %2713 = vrot.lane.b32.xlu2 %v2712_v32, %s3449_s13  ;;  %2771 = vst.msk [vmem:[#allocation13 + $0x8] sm:$0xff] %vm214_vm0, %v2769_v15  ;;  %v2803_v26 = vsel %vm1181_vm12, %v2802_v2, %v2801_v30  ;;  %vm2716_vm0 = vcmask 523520  }
 0xf28   :  { %2751 = vrot.lane.b32.xlu0 %v2750_v63, %s3450_s1  ;;  %2822 = vrot.lane.b32.xlu1 %v2821_v29, %s3450_s1 }
 0xf29   :  { %2804 = vrot.lane.b32.xlu2 %v2803_v26, %s3441_s21 }
 0xf7b   :  { %v2714_v33 = vpop.permute.xlu2 %2713 }
 0xf7c   :  { %2717 = vst.msk [vmem:[#allocation13] sm:$0xff] %vm2716_vm0, %v2714_v33 }
 0xf83   :  { %v2805_v38 = vpop.permute.xlu2 %2804 }
 0xf92   :  { %v2787_v36 = vpop.permute.xlu0 %2786  ;;  %v2733_v37 = vpop.permute.xlu1 %2732 }
 0xf93   :  { %2789 = vst.msk [vmem:[#allocation13 + $0x8] sm:$0xff] %vm2716_vm0, %v2787_v36 }
 0xf94   :  { %2736 = vst.msk [vmem:[#allocation13] sm:$0xff] %vm2735_vm13, %v2733_v37 }
 0xf95   :  { %2807 = vst.msk [vmem:[#allocation13 + $0x8] sm:$0xff] %vm2735_vm13, %v2805_v38 }
 0xf9a   :  { %v2752_v25 = vpop.permute.xlu0 %2751  ;;  %v2823_v0 = vpop.permute.xlu1 %2822 }
 0xf9b   :  { %2755 = vst.msk [vmem:[#allocation13] sm:$0xff] %vm2754_vm1, %v2752_v25 }
 0xf9c   :  { %2825 = vst.msk [vmem:[#allocation13 + $0x8] sm:$0xff] %vm2754_vm1, %v2823_v0 }
 0xf9d   :  { %2836 = dma.vmem_to_hbm [thread:$0]  %s2832_s17, 256, %s2834_s19, [#allocation5]  }
 0xf9e   :  { %3435 = dma.done.wait [#allocation5], 256  }
 0xf9f   :  { %3436 = vsyncadd [#allocation5], 4294967040 }
 0xfa0   :  { %2841 = vsyncpa [#allocation4], 1 }
 0xfa1   :  { %2842 = vsyncpa [#allocation8], 1 }
 0xfa2   :  { %2843 = vsyncpa [#allocation11], 1 }
 0xfa3   :  { %2844 = vsyncpa [#allocation5], 1 }
 0xfa4   :  { %2845 = vsyncpa [#allocation6], 1 }

</bundles_post_ra>
